<compile_context>
chip_gen: v7x
topology: tpu7x:2x2x1
jax: 0.10.0
libtpu: 0.0.40
codegen_flags: <defaults>
</compile_context>

<pallas_src>
import functools

import jax
import jax.numpy as jnp
from jax import lax
from jax.experimental import pallas as pl
from jax.experimental.pallas import tpu as pltpu

# ---- static network geometry (fixed by the module) -------------------------
C_IN, IMG_H, IMG_W = 4, 20, 60
K1, S1, C1 = 8, 4, 32
OH1, OW1 = 4, 14                   # conv1 output grid
NWB = OW1 + 1                      # 15 width blocks of 4 input columns
HALF = K1 * C_IN * S1              # 128 features per (row, width-block) half patch
ROWBLK = OH1 * HALF                # 512 lanes per width block (all 4 output rows)
K2, S2, C2 = 4, 2, 64
OW2 = 6                            # conv2 output width (height collapses to 1)
K3, C3 = 3, 64
OW3 = 4                            # conv3 output width
FLAT = C3 * OW3                    # 256 features into the final Linear
EMBED_DIM = 512
H1_LANES = OW1 * OH1 * C1          # 1792
H2_LANES = OW2 * C2                # 384


# ---- kernel -----------------------------------------------------------------
def _embedder_kernel(xr_ref,                # (15, TB, 512) bf16 half-patch pixels
                     w1a_ref, w1b_ref,      # (512, 128) bf16 (left / right kw half)
                     b1_ref,                # (1, 128) f32
                     w2_ref, b2_ref,        # (512, 64) bf16, (1, 64) f32
                     w3_ref, b3_ref,        # (384, 256) bf16, (1, 256) f32
                     w4_ref, b4_ref,        # (256, 512) bf16, (1, 512) f32
                     o_ref,                 # (TB, 512)
                     h1_ref, h2_ref):       # scratch: (TB, 1792) bf16, (TB, 384) bf16
    f32 = jnp.float32
    w1a = w1a_ref[...]
    w1b = w1b_ref[...]
    b1 = b1_ref[...]

    # ---- conv1: per output column, one fused matmul pair covering all 4 output
    #      rows (block-diagonal weights) -> lane-dense (TB, 128) slab per column.
    for ox in range(OW1):
        xo = xr_ref[ox]                                   # (TB, 512): kw 0..3 half
        xn = xr_ref[ox + 1]                               # (TB, 512): kw 4..7 half
        acc = jnp.dot(xo, w1a, preferred_element_type=f32)
        acc = acc + jnp.dot(xn, w1b, preferred_element_type=f32)
        h1_ref[:, 128 * ox:128 * (ox + 1)] = (
            jnp.maximum(acc + b1, 0.0).astype(jnp.bfloat16))

    # ---- conv2: all 16 taps folded into K -> one K=512 dot per output column,
    #      reading a contiguous 256-aligned slice of h1.
    w2 = w2_ref[...]
    b2 = b2_ref[...]
    for ox2 in range(OW2):
        xin = h1_ref[:, 256 * ox2:256 * ox2 + 512]        # (TB, 512)
        acc = jnp.dot(xin, w2, preferred_element_type=f32)
        h2_ref[:, 64 * ox2:64 * (ox2 + 1)] = (
            jnp.maximum(acc + b2, 0.0).astype(jnp.bfloat16))

    # ---- conv3 (centre kernel row only, all 4 positions in one banded matmul)
    #      followed by the final Linear(256 -> 512), each a single dot.
    h2 = h2_ref[...]                                      # (TB, 384)
    h3 = jnp.maximum(
        jnp.dot(h2, w3_ref[...], preferred_element_type=f32) + b3_ref[...], 0.0)
    acc = jnp.dot(h3.astype(jnp.bfloat16), w4_ref[...], preferred_element_type=f32)
    o_ref[...] = jnp.maximum(acc + b4_ref[...], 0.0).astype(o_ref.dtype)


# ---- host-side helpers -------------------------------------------------------
def _round_up(x, m):
    return ((x + m - 1) // m) * m


def _pack_pixels(x_bf16):
    """(B, 4, 20, 60) bf16 -> (15, B, 512) half-patch layout.

    xr[wb, b, oy*128 + kh*16 + cin*4 + w4] = x[b, cin, 4*oy + kh, 4*wb + w4]
    Only ~1.6x the raw pixel bytes (vs 3x for a full im2col); one XLA gather.
    """
    B = x_bf16.shape[0]
    rows = jnp.stack([x_bf16[:, :, S1 * oy:S1 * oy + K1, :] for oy in range(OH1)],
                     axis=1)                               # (B, oy, cin, kh, 60)
    rows = rows.reshape(B, OH1, C_IN, K1, NWB, S1)         # (B, oy, cin, kh, wb, w4)
    xr = jnp.transpose(rows, (4, 0, 1, 3, 2, 5))           # (wb, B, oy, kh, cin, w4)
    return xr.reshape(NWB, B, ROWBLK)


def prepare_params(torch_params):
    """PyTorch-layout params -> packed kernel layout (bf16 weights, f32 biases)."""
    w1, b1, w2, b2, w3, b3, w4, b4 = torch_params
    f32, bf16 = jnp.float32, jnp.bfloat16

    # conv1: fold /255; split the 8-wide kernel into two width halves; make each
    # half a (512, 128) weight block-diagonal over the 4 output rows (matches the
    # oy-major lane layout of xr and of h1).
    w1n = w1.astype(f32) / 255.0                            # (32, 4, 8, 8)
    w1_left = jnp.transpose(w1n[:, :, :, 0:S1], (2, 1, 3, 0)).reshape(HALF, C1)
    w1_right = jnp.transpose(w1n[:, :, :, S1:K1], (2, 1, 3, 0)).reshape(HALF, C1)

    def block_diag4(w):                                     # (128, 32) -> (512, 128)
        z = jnp.zeros_like(w)
        return jnp.concatenate(
            [jnp.concatenate([w if j == i else z for j in range(OH1)], axis=1)
             for i in range(OH1)], axis=0)

    w1a = block_diag4(w1_left).astype(bf16)
    w1b = block_diag4(w1_right).astype(bf16)
    b1p = jnp.tile(b1.astype(f32), OH1).reshape(1, OH1 * C1)

    # conv2: all 16 taps folded into K; row index = kw*128 + kh*32 + cin.
    w2p = jnp.transpose(w2, (3, 2, 1, 0)).reshape(K2 * K2 * C1, C2).astype(bf16)
    b2p = b2.astype(f32).reshape(1, C2)

    # conv3: the (1, 0) zero height padding keeps only the centre kernel row;
    # fold the 4 output positions into one banded (384, 256) weight.
    w3c = w3[:, :, 1, :].astype(f32)                        # (cout, cin, kw)
    w3p = jnp.zeros((OW2 * C2, OW3 * C3), f32)
    for ox3 in range(OW3):
        for kw in range(K3):
            ox2 = ox3 + kw
            w3p = w3p.at[ox2 * C2:(ox2 + 1) * C2,
                         ox3 * C3:(ox3 + 1) * C3].set(w3c[:, :, kw].T)
    w3p = w3p.astype(bf16)
    b3p = jnp.tile(b3.astype(f32), OW3).reshape(1, OW3 * C3)

    # fc: PyTorch flattens (C=64, H=1, W=4) c-major; our h3 lanes are w-major.
    w4p = jnp.transpose(w4.reshape(EMBED_DIM, C3, OW3), (2, 1, 0)
                        ).reshape(FLAT, EMBED_DIM).astype(bf16)
    b4p = b4.astype(f32).reshape(1, EMBED_DIM)
    return (w1a, w1b, b1p, w2p, b2p, w3p, b3p, w4p, b4p)


def extra_local_pixel_embedder(x, torch_params, *, batch_tile=None,
                               out_dtype=jnp.float32):
    """x: (B, 4, 20, 60) pixels in [0, 255]; returns (B, 512) embedding."""
    B = x.shape[0]
    assert x.shape[1:] == (C_IN, IMG_H, IMG_W), x.shape

    if batch_tile is None:
        # >=4 grid steps when the batch allows (DMA/compute overlap everywhere,
        # 2-TensorCore sharding on v7x); cap at 256 rows so double-buffered
        # blocks fit every generation's VMEM (v6e can pass batch_tile=512).
        batch_tile = min(256, _round_up(max(1, -(-B // 4)), 8))
    batch_tile = max(8, _round_up(batch_tile, 8))
    Bp = _round_up(B, batch_tile)

    # bf16 cast FIRST, pad the small raw tensor, then one layout-gather pass.
    xb = x.astype(jnp.bfloat16)
    if Bp != B:
        xb = jnp.pad(xb, ((0, Bp - B), (0, 0), (0, 0), (0, 0)))
    xr = _pack_pixels(xb)                                   # (15, Bp, 512)

    params = prepare_params(torch_params)

    const2 = lambda i: (0, 0)
    grid_spec = pltpu.PrefetchScalarGridSpec(
        num_scalar_prefetch=0,
        grid=(Bp // batch_tile,),
        in_specs=[
            pl.BlockSpec((NWB, batch_tile, ROWBLK), lambda i: (0, i, 0)),
            pl.BlockSpec((ROWBLK, OH1 * C1), const2),       # w1a
            pl.BlockSpec((ROWBLK, OH1 * C1), const2),       # w1b
            pl.BlockSpec((1, OH1 * C1), const2),            # b1
            pl.BlockSpec((K2 * K2 * C1, C2), const2),       # w2
            pl.BlockSpec((1, C2), const2),                  # b2
            pl.BlockSpec((OW2 * C2, OW3 * C3), const2),     # w3
            pl.BlockSpec((1, OW3 * C3), const2),            # b3
            pl.BlockSpec((FLAT, EMBED_DIM), const2),        # w4
            pl.BlockSpec((1, EMBED_DIM), const2),           # b4
        ],
        out_specs=pl.BlockSpec((batch_tile, EMBED_DIM), lambda i: (i, 0)),
        scratch_shapes=[
            pltpu.VMEM((batch_tile, H1_LANES), jnp.bfloat16),
            pltpu.VMEM((batch_tile, H2_LANES), jnp.bfloat16),
        ],
    )

    out_itemsize = jnp.dtype(out_dtype).itemsize
    weight_bytes = sum(int(w.size) * w.dtype.itemsize for w in params)
    est_vmem = (2 * NWB * batch_tile * ROWBLK * 2           # double-buffered input
                + 2 * batch_tile * EMBED_DIM * out_itemsize # double-buffered output
                + batch_tile * (H1_LANES + H2_LANES) * 2    # scratch
                + 2 * weight_bytes
                + batch_tile * 2048 * 4)                    # f32 temporaries headroom
    vmem_limit = int(min(48 << 20, max(32 << 20, est_vmem + (8 << 20))))

    flops_per_sample = 2 * (OW1 * 2 * ROWBLK * OH1 * C1     # conv1 (row-blocked)
                            + OW2 * (K2 * K2 * C1) * C2     # conv2
                            + (OW2 * C2) * (OW3 * C3)       # conv3 (banded)
                            + FLAT * EMBED_DIM)             # fc
    cost = pl.CostEstimate(
        flops=Bp * flops_per_sample,
        transcendentals=0,
        bytes_accessed=int(xr.size) * 2 + weight_bytes + Bp * EMBED_DIM * out_itemsize)

    out = pl.pallas_call(
        _embedder_kernel,
        out_shape=jax.ShapeDtypeStruct((Bp, EMBED_DIM), out_dtype),
        grid_spec=grid_spec,
        compiler_params=pltpu.CompilerParams(
            dimension_semantics=("parallel",),
            vmem_limit_bytes=vmem_limit),
        cost_estimate=cost,
    )(xr, *params)
    return out[:B]


# ---- pure-JAX reference (float32, exact module semantics) --------------------
def reference_forward(x, torch_params):
    w1, b1, w2, b2, w3, b3, w4, b4 = torch_params
    dn = ("NCHW", "OIHW", "NCHW")
    h = x.astype(jnp.float32) / 255.0
    h = jax.nn.relu(lax.conv_general_dilated(h, w1, (S1, S1), "VALID",
                                             dimension_numbers=dn)
                    + b1[None, :, None, None])
    h = jax.nn.relu(lax.conv_general_dilated(h, w2, (S2, S2), "VALID",
                                             dimension_numbers=dn)
                    + b2[None, :, None, None])
    h = jax.nn.relu(lax.conv_general_dilated(h, w3, (1, 1), ((1, 1), (0, 0)),
                                             dimension_numbers=dn)
                    + b3[None, :, None, None])
    h = h.reshape(h.shape[0], FLAT)      # (B, 64, 1, 4) -> (B, 256), c-major = torch .view
    return jax.nn.relu(h @ w4.T + b4)


def init_torch_params(key):
    """PyTorch default init (uniform +/- 1/sqrt(fan_in)), PyTorch layouts."""
    def layer(k, shape, fan_in):
        kw, kb = jax.random.split(k)
        bound = 1.0 / (fan_in ** 0.5)
        w = jax.random.uniform(kw, shape, jnp.float32, -bound, bound)
        b = jax.random.uniform(kb, (shape[0],), jnp.float32, -bound, bound)
        return w, b
    k1, k2, k3, k4 = jax.random.split(key, 4)
    w1, b1 = layer(k1, (C1, C_IN, K1, K1), C_IN * K1 * K1)
    w2, b2 = layer(k2, (C2, C1, K2, K2), C1 * K2 * K2)
    w3, b3 = layer(k3, (C3, C2, K3, K3), C2 * K3 * K3)
    w4, b4 = layer(k4, (EMBED_DIM, FLAT), FLAT)
    return (w1, b1, w2, b2, w3, b3, w4, b4)


if __name__ == "__main__":
    key = jax.random.PRNGKey(0)
    k_params, k_pix = jax.random.split(key)

    batch = 12      # deliberately not a multiple of the tile -> exercises padding
    pixels = jax.random.randint(
        k_pix, (batch, C_IN, IMG_H, IMG_W), 0, 256).astype(jnp.float32)
    torch_params = init_torch_params(k_params)

    # batch_tile=8 -> grid of 2 steps even at this small demo batch.
    fwd = jax.jit(functools.partial(extra_local_pixel_embedder, batch_tile=8))
    out = jax.block_until_ready(fwd(pixels, torch_params))

    ref = jax.block_until_ready(reference_forward(pixels, torch_params))

    assert out.shape == (batch, EMBED_DIM)
    assert bool(jnp.all(jnp.isfinite(out)))
    max_err = float(jnp.max(jnp.abs(out.astype(jnp.float32) - ref)))
    scale = max(1.0, float(jnp.max(jnp.abs(ref))))
    assert max_err <= 5e-2 * scale, f"mismatch vs reference: max abs err {max_err}"

    print("KERNEL_OK")
</pallas_src>

<mosaic_0001>
module attributes {stable_mosaic.version = 11 : i64} {
  func.func @_embedder_kernel(%arg0: i32, %arg1: memref<15x8x512xbf16, #tpu.memory_space<vmem>>, %arg2: memref<512x128xbf16, #tpu.memory_space<vmem>>, %arg3: memref<512x128xbf16, #tpu.memory_space<vmem>>, %arg4: memref<1x128xf32, #tpu.memory_space<vmem>>, %arg5: memref<512x64xbf16, #tpu.memory_space<vmem>>, %arg6: memref<1x64xf32, #tpu.memory_space<vmem>>, %arg7: memref<384x256xbf16, #tpu.memory_space<vmem>>, %arg8: memref<1x256xf32, #tpu.memory_space<vmem>>, %arg9: memref<256x512xbf16, #tpu.memory_space<vmem>>, %arg10: memref<1x512xf32, #tpu.memory_space<vmem>>, %arg11: memref<8x512xf32, #tpu.memory_space<vmem>>, %arg12: memref<8x1792xbf16, #tpu.memory_space<vmem>>, %arg13: memref<8x384xbf16, #tpu.memory_space<vmem>>) attributes {dimension_semantics = [#tpu.dimension_semantics<parallel>], iteration_bounds = array<i64: 2>, scalar_prefetch = 0 : i64, scratch_operands = 2 : i64, tpu.core_type = #tpu.core_type<tc>, window_params = [{transform_indices = @transform_0, window_bounds = array<i64: 15, 8, 512>}, {pipeline_mode = #tpu.pipeline_mode<synchronous>, transform_indices = @transform_1, window_bounds = array<i64: 512, 128>}, {pipeline_mode = #tpu.pipeline_mode<synchronous>, transform_indices = @transform_2, window_bounds = array<i64: 512, 128>}, {pipeline_mode = #tpu.pipeline_mode<synchronous>, transform_indices = @transform_3, window_bounds = array<i64: 1, 128>}, {pipeline_mode = #tpu.pipeline_mode<synchronous>, transform_indices = @transform_4, window_bounds = array<i64: 512, 64>}, {pipeline_mode = #tpu.pipeline_mode<synchronous>, transform_indices = @transform_5, window_bounds = array<i64: 1, 64>}, {pipeline_mode = #tpu.pipeline_mode<synchronous>, transform_indices = @transform_6, window_bounds = array<i64: 384, 256>}, {pipeline_mode = #tpu.pipeline_mode<synchronous>, transform_indices = @transform_7, window_bounds = array<i64: 1, 256>}, {pipeline_mode = #tpu.pipeline_mode<synchronous>, transform_indices = @transform_8, window_bounds = array<i64: 256, 512>}, {pipeline_mode = #tpu.pipeline_mode<synchronous>, transform_indices = @transform_9, window_bounds = array<i64: 1, 512>}, {transform_indices = @transform_10, window_bounds = array<i64: 8, 512>}]} {
    %c0 = arith.constant 0 : index
    %c0_0 = arith.constant 0 : index
    %0 = vector.load %arg2[%c0, %c0_0] : memref<512x128xbf16, #tpu.memory_space<vmem>>, vector<512x128xbf16>
    %c0_1 = arith.constant 0 : index
    %c0_2 = arith.constant 0 : index
    %1 = vector.load %arg3[%c0_1, %c0_2] : memref<512x128xbf16, #tpu.memory_space<vmem>>, vector<512x128xbf16>
    %c0_3 = arith.constant 0 : index
    %c0_4 = arith.constant 0 : index
    %2 = vector.load %arg4[%c0_3, %c0_4] : memref<1x128xf32, #tpu.memory_space<vmem>>, vector<1x128xf32>
    %c0_5 = arith.constant 0 : index
    %c0_6 = arith.constant 0 : index
    %c0_7 = arith.constant 0 : index
    %3 = vector.load %arg1[%c0_5, %c0_6, %c0_7] : memref<15x8x512xbf16, #tpu.memory_space<vmem>>, vector<1x8x512xbf16>
    %4 = vector.shape_cast %3 : vector<1x8x512xbf16> to vector<8x512xbf16>
    %c1 = arith.constant 1 : index
    %c0_8 = arith.constant 0 : index
    %c0_9 = arith.constant 0 : index
    %5 = vector.load %arg1[%c1, %c0_8, %c0_9] : memref<15x8x512xbf16, #tpu.memory_space<vmem>>, vector<1x8x512xbf16>
    %6 = vector.shape_cast %5 : vector<1x8x512xbf16> to vector<8x512xbf16>
    %cst = arith.constant dense<0.000000e+00> : vector<8x128xf32>
    %7 = tpu.matmul %4, %0, %cst {dimension_numbers = #tpu.dot_dimension_numbers<[1], [0], [0], [1], [0, 0, 1, 1], [], []>} : vector<8x512xbf16>, vector<512x128xbf16>, vector<8x128xf32> -> vector<8x128xf32>
    %cst_10 = arith.constant dense<0.000000e+00> : vector<8x128xf32>
    %8 = tpu.matmul %6, %1, %cst_10 {dimension_numbers = #tpu.dot_dimension_numbers<[1], [0], [0], [1], [0, 0, 1, 1], [], []>} : vector<8x512xbf16>, vector<512x128xbf16>, vector<8x128xf32> -> vector<8x128xf32>
    %9 = arith.addf %7, %8 : vector<8x128xf32>
    %10 = vector.broadcast %2 : vector<1x128xf32> to vector<8x128xf32>
    %11 = arith.addf %9, %10 : vector<8x128xf32>
    %cst_11 = arith.constant 0.000000e+00 : f32
    %12 = vector.broadcast %cst_11 : f32 to vector<8x128xf32>
    %13 = arith.maximumf %11, %12 : vector<8x128xf32>
    %14 = arith.truncf %13 : vector<8x128xf32> to vector<8x128xbf16>
    %c0_12 = arith.constant 0 : index
    %c0_13 = arith.constant 0 : index
    %15 = vector.load %arg12[%c0_12, %c0_13] : memref<8x1792xbf16, #tpu.memory_space<vmem>>, vector<8x128xbf16>
    tpu.vector_store %arg12[%c0_12, %c0_13], %14 {strides = array<i32>} : memref<8x1792xbf16, #tpu.memory_space<vmem>>, vector<8x128xbf16>,
    %c1_14 = arith.constant 1 : index
    %c0_15 = arith.constant 0 : index
    %c0_16 = arith.constant 0 : index
    %16 = vector.load %arg1[%c1_14, %c0_15, %c0_16] : memref<15x8x512xbf16, #tpu.memory_space<vmem>>, vector<1x8x512xbf16>
    %17 = vector.shape_cast %16 : vector<1x8x512xbf16> to vector<8x512xbf16>
    %c2 = arith.constant 2 : index
    %c0_17 = arith.constant 0 : index
    %c0_18 = arith.constant 0 : index
    %18 = vector.load %arg1[%c2, %c0_17, %c0_18] : memref<15x8x512xbf16, #tpu.memory_space<vmem>>, vector<1x8x512xbf16>
    %19 = vector.shape_cast %18 : vector<1x8x512xbf16> to vector<8x512xbf16>
    %cst_19 = arith.constant dense<0.000000e+00> : vector<8x128xf32>
    %20 = tpu.matmul %17, %0, %cst_19 {dimension_numbers = #tpu.dot_dimension_numbers<[1], [0], [0], [1], [0, 0, 1, 1], [], []>} : vector<8x512xbf16>, vector<512x128xbf16>, vector<8x128xf32> -> vector<8x128xf32>
    %cst_20 = arith.constant dense<0.000000e+00> : vector<8x128xf32>
    %21 = tpu.matmul %19, %1, %cst_20 {dimension_numbers = #tpu.dot_dimension_numbers<[1], [0], [0], [1], [0, 0, 1, 1], [], []>} : vector<8x512xbf16>, vector<512x128xbf16>, vector<8x128xf32> -> vector<8x128xf32>
    %22 = arith.addf %20, %21 : vector<8x128xf32>
    %23 = vector.broadcast %2 : vector<1x128xf32> to vector<8x128xf32>
    %24 = arith.addf %22, %23 : vector<8x128xf32>
    %cst_21 = arith.constant 0.000000e+00 : f32
    %25 = vector.broadcast %cst_21 : f32 to vector<8x128xf32>
    %26 = arith.maximumf %24, %25 : vector<8x128xf32>
    %27 = arith.truncf %26 : vector<8x128xf32> to vector<8x128xbf16>
    %c0_22 = arith.constant 0 : index
    %c128 = arith.constant 128 : index
    %28 = vector.load %arg12[%c0_22, %c128] : memref<8x1792xbf16, #tpu.memory_space<vmem>>, vector<8x128xbf16>
    tpu.vector_store %arg12[%c0_22, %c128], %27 {strides = array<i32>} : memref<8x1792xbf16, #tpu.memory_space<vmem>>, vector<8x128xbf16>,
    %c2_23 = arith.constant 2 : index
    %c0_24 = arith.constant 0 : index
    %c0_25 = arith.constant 0 : index
    %29 = vector.load %arg1[%c2_23, %c0_24, %c0_25] : memref<15x8x512xbf16, #tpu.memory_space<vmem>>, vector<1x8x512xbf16>
    %30 = vector.shape_cast %29 : vector<1x8x512xbf16> to vector<8x512xbf16>
    %c3 = arith.constant 3 : index
    %c0_26 = arith.constant 0 : index
    %c0_27 = arith.constant 0 : index
    %31 = vector.load %arg1[%c3, %c0_26, %c0_27] : memref<15x8x512xbf16, #tpu.memory_space<vmem>>, vector<1x8x512xbf16>
    %32 = vector.shape_cast %31 : vector<1x8x512xbf16> to vector<8x512xbf16>
    %cst_28 = arith.constant dense<0.000000e+00> : vector<8x128xf32>
    %33 = tpu.matmul %30, %0, %cst_28 {dimension_numbers = #tpu.dot_dimension_numbers<[1], [0], [0], [1], [0, 0, 1, 1], [], []>} : vector<8x512xbf16>, vector<512x128xbf16>, vector<8x128xf32> -> vector<8x128xf32>
    %cst_29 = arith.constant dense<0.000000e+00> : vector<8x128xf32>
    %34 = tpu.matmul %32, %1, %cst_29 {dimension_numbers = #tpu.dot_dimension_numbers<[1], [0], [0], [1], [0, 0, 1, 1], [], []>} : vector<8x512xbf16>, vector<512x128xbf16>, vector<8x128xf32> -> vector<8x128xf32>
    %35 = arith.addf %33, %34 : vector<8x128xf32>
    %36 = vector.broadcast %2 : vector<1x128xf32> to vector<8x128xf32>
    %37 = arith.addf %35, %36 : vector<8x128xf32>
    %cst_30 = arith.constant 0.000000e+00 : f32
    %38 = vector.broadcast %cst_30 : f32 to vector<8x128xf32>
    %39 = arith.maximumf %37, %38 : vector<8x128xf32>
    %40 = arith.truncf %39 : vector<8x128xf32> to vector<8x128xbf16>
    %c0_31 = arith.constant 0 : index
    %c256 = arith.constant 256 : index
    %41 = vector.load %arg12[%c0_31, %c256] : memref<8x1792xbf16, #tpu.memory_space<vmem>>, vector<8x128xbf16>
    tpu.vector_store %arg12[%c0_31, %c256], %40 {strides = array<i32>} : memref<8x1792xbf16, #tpu.memory_space<vmem>>, vector<8x128xbf16>,
    %c3_32 = arith.constant 3 : index
    %c0_33 = arith.constant 0 : index
    %c0_34 = arith.constant 0 : index
    %42 = vector.load %arg1[%c3_32, %c0_33, %c0_34] : memref<15x8x512xbf16, #tpu.memory_space<vmem>>, vector<1x8x512xbf16>
    %43 = vector.shape_cast %42 : vector<1x8x512xbf16> to vector<8x512xbf16>
    %c4 = arith.constant 4 : index
    %c0_35 = arith.constant 0 : index
    %c0_36 = arith.constant 0 : index
    %44 = vector.load %arg1[%c4, %c0_35, %c0_36] : memref<15x8x512xbf16, #tpu.memory_space<vmem>>, vector<1x8x512xbf16>
    %45 = vector.shape_cast %44 : vector<1x8x512xbf16> to vector<8x512xbf16>
    %cst_37 = arith.constant dense<0.000000e+00> : vector<8x128xf32>
    %46 = tpu.matmul %43, %0, %cst_37 {dimension_numbers = #tpu.dot_dimension_numbers<[1], [0], [0], [1], [0, 0, 1, 1], [], []>} : vector<8x512xbf16>, vector<512x128xbf16>, vector<8x128xf32> -> vector<8x128xf32>
    %cst_38 = arith.constant dense<0.000000e+00> : vector<8x128xf32>
    %47 = tpu.matmul %45, %1, %cst_38 {dimension_numbers = #tpu.dot_dimension_numbers<[1], [0], [0], [1], [0, 0, 1, 1], [], []>} : vector<8x512xbf16>, vector<512x128xbf16>, vector<8x128xf32> -> vector<8x128xf32>
    %48 = arith.addf %46, %47 : vector<8x128xf32>
    %49 = vector.broadcast %2 : vector<1x128xf32> to vector<8x128xf32>
    %50 = arith.addf %48, %49 : vector<8x128xf32>
    %cst_39 = arith.constant 0.000000e+00 : f32
    %51 = vector.broadcast %cst_39 : f32 to vector<8x128xf32>
    %52 = arith.maximumf %50, %51 : vector<8x128xf32>
    %53 = arith.truncf %52 : vector<8x128xf32> to vector<8x128xbf16>
    %c0_40 = arith.constant 0 : index
    %c384 = arith.constant 384 : index
    %54 = vector.load %arg12[%c0_40, %c384] : memref<8x1792xbf16, #tpu.memory_space<vmem>>, vector<8x128xbf16>
    tpu.vector_store %arg12[%c0_40, %c384], %53 {strides = array<i32>} : memref<8x1792xbf16, #tpu.memory_space<vmem>>, vector<8x128xbf16>,
    %c4_41 = arith.constant 4 : index
    %c0_42 = arith.constant 0 : index
    %c0_43 = arith.constant 0 : index
    %55 = vector.load %arg1[%c4_41, %c0_42, %c0_43] : memref<15x8x512xbf16, #tpu.memory_space<vmem>>, vector<1x8x512xbf16>
    %56 = vector.shape_cast %55 : vector<1x8x512xbf16> to vector<8x512xbf16>
    %c5 = arith.constant 5 : index
    %c0_44 = arith.constant 0 : index
    %c0_45 = arith.constant 0 : index
    %57 = vector.load %arg1[%c5, %c0_44, %c0_45] : memref<15x8x512xbf16, #tpu.memory_space<vmem>>, vector<1x8x512xbf16>
    %58 = vector.shape_cast %57 : vector<1x8x512xbf16> to vector<8x512xbf16>
    %cst_46 = arith.constant dense<0.000000e+00> : vector<8x128xf32>
    %59 = tpu.matmul %56, %0, %cst_46 {dimension_numbers = #tpu.dot_dimension_numbers<[1], [0], [0], [1], [0, 0, 1, 1], [], []>} : vector<8x512xbf16>, vector<512x128xbf16>, vector<8x128xf32> -> vector<8x128xf32>
    %cst_47 = arith.constant dense<0.000000e+00> : vector<8x128xf32>
    %60 = tpu.matmul %58, %1, %cst_47 {dimension_numbers = #tpu.dot_dimension_numbers<[1], [0], [0], [1], [0, 0, 1, 1], [], []>} : vector<8x512xbf16>, vector<512x128xbf16>, vector<8x128xf32> -> vector<8x128xf32>
    %61 = arith.addf %59, %60 : vector<8x128xf32>
    %62 = vector.broadcast %2 : vector<1x128xf32> to vector<8x128xf32>
    %63 = arith.addf %61, %62 : vector<8x128xf32>
    %cst_48 = arith.constant 0.000000e+00 : f32
    %64 = vector.broadcast %cst_48 : f32 to vector<8x128xf32>
    %65 = arith.maximumf %63, %64 : vector<8x128xf32>
    %66 = arith.truncf %65 : vector<8x128xf32> to vector<8x128xbf16>
    %c0_49 = arith.constant 0 : index
    %c512 = arith.constant 512 : index
    %67 = vector.load %arg12[%c0_49, %c512] : memref<8x1792xbf16, #tpu.memory_space<vmem>>, vector<8x128xbf16>
    tpu.vector_store %arg12[%c0_49, %c512], %66 {strides = array<i32>} : memref<8x1792xbf16, #tpu.memory_space<vmem>>, vector<8x128xbf16>,
    %c5_50 = arith.constant 5 : index
    %c0_51 = arith.constant 0 : index
    %c0_52 = arith.constant 0 : index
    %68 = vector.load %arg1[%c5_50, %c0_51, %c0_52] : memref<15x8x512xbf16, #tpu.memory_space<vmem>>, vector<1x8x512xbf16>
    %69 = vector.shape_cast %68 : vector<1x8x512xbf16> to vector<8x512xbf16>
    %c6 = arith.constant 6 : index
    %c0_53 = arith.constant 0 : index
    %c0_54 = arith.constant 0 : index
    %70 = vector.load %arg1[%c6, %c0_53, %c0_54] : memref<15x8x512xbf16, #tpu.memory_space<vmem>>, vector<1x8x512xbf16>
    %71 = vector.shape_cast %70 : vector<1x8x512xbf16> to vector<8x512xbf16>
    %cst_55 = arith.constant dense<0.000000e+00> : vector<8x128xf32>
    %72 = tpu.matmul %69, %0, %cst_55 {dimension_numbers = #tpu.dot_dimension_numbers<[1], [0], [0], [1], [0, 0, 1, 1], [], []>} : vector<8x512xbf16>, vector<512x128xbf16>, vector<8x128xf32> -> vector<8x128xf32>
    %cst_56 = arith.constant dense<0.000000e+00> : vector<8x128xf32>
    %73 = tpu.matmul %71, %1, %cst_56 {dimension_numbers = #tpu.dot_dimension_numbers<[1], [0], [0], [1], [0, 0, 1, 1], [], []>} : vector<8x512xbf16>, vector<512x128xbf16>, vector<8x128xf32> -> vector<8x128xf32>
    %74 = arith.addf %72, %73 : vector<8x128xf32>
    %75 = vector.broadcast %2 : vector<1x128xf32> to vector<8x128xf32>
    %76 = arith.addf %74, %75 : vector<8x128xf32>
    %cst_57 = arith.constant 0.000000e+00 : f32
    %77 = vector.broadcast %cst_57 : f32 to vector<8x128xf32>
    %78 = arith.maximumf %76, %77 : vector<8x128xf32>
    %79 = arith.truncf %78 : vector<8x128xf32> to vector<8x128xbf16>
    %c0_58 = arith.constant 0 : index
    %c640 = arith.constant 640 : index
    %80 = vector.load %arg12[%c0_58, %c640] : memref<8x1792xbf16, #tpu.memory_space<vmem>>, vector<8x128xbf16>
    tpu.vector_store %arg12[%c0_58, %c640], %79 {strides = array<i32>} : memref<8x1792xbf16, #tpu.memory_space<vmem>>, vector<8x128xbf16>,
    %c6_59 = arith.constant 6 : index
    %c0_60 = arith.constant 0 : index
    %c0_61 = arith.constant 0 : index
    %81 = vector.load %arg1[%c6_59, %c0_60, %c0_61] : memref<15x8x512xbf16, #tpu.memory_space<vmem>>, vector<1x8x512xbf16>
    %82 = vector.shape_cast %81 : vector<1x8x512xbf16> to vector<8x512xbf16>
    %c7 = arith.constant 7 : index
    %c0_62 = arith.constant 0 : index
    %c0_63 = arith.constant 0 : index
    %83 = vector.load %arg1[%c7, %c0_62, %c0_63] : memref<15x8x512xbf16, #tpu.memory_space<vmem>>, vector<1x8x512xbf16>
    %84 = vector.shape_cast %83 : vector<1x8x512xbf16> to vector<8x512xbf16>
    %cst_64 = arith.constant dense<0.000000e+00> : vector<8x128xf32>
    %85 = tpu.matmul %82, %0, %cst_64 {dimension_numbers = #tpu.dot_dimension_numbers<[1], [0], [0], [1], [0, 0, 1, 1], [], []>} : vector<8x512xbf16>, vector<512x128xbf16>, vector<8x128xf32> -> vector<8x128xf32>
    %cst_65 = arith.constant dense<0.000000e+00> : vector<8x128xf32>
    %86 = tpu.matmul %84, %1, %cst_65 {dimension_numbers = #tpu.dot_dimension_numbers<[1], [0], [0], [1], [0, 0, 1, 1], [], []>} : vector<8x512xbf16>, vector<512x128xbf16>, vector<8x128xf32> -> vector<8x128xf32>
    %87 = arith.addf %85, %86 : vector<8x128xf32>
    %88 = vector.broadcast %2 : vector<1x128xf32> to vector<8x128xf32>
    %89 = arith.addf %87, %88 : vector<8x128xf32>
    %cst_66 = arith.constant 0.000000e+00 : f32
    %90 = vector.broadcast %cst_66 : f32 to vector<8x128xf32>
    %91 = arith.maximumf %89, %90 : vector<8x128xf32>
    %92 = arith.truncf %91 : vector<8x128xf32> to vector<8x128xbf16>
    %c0_67 = arith.constant 0 : index
    %c768 = arith.constant 768 : index
    %93 = vector.load %arg12[%c0_67, %c768] : memref<8x1792xbf16, #tpu.memory_space<vmem>>, vector<8x128xbf16>
    tpu.vector_store %arg12[%c0_67, %c768], %92 {strides = array<i32>} : memref<8x1792xbf16, #tpu.memory_space<vmem>>, vector<8x128xbf16>,
    %c7_68 = arith.constant 7 : index
    %c0_69 = arith.constant 0 : index
    %c0_70 = arith.constant 0 : index
    %94 = vector.load %arg1[%c7_68, %c0_69, %c0_70] : memref<15x8x512xbf16, #tpu.memory_space<vmem>>, vector<1x8x512xbf16>
    %95 = vector.shape_cast %94 : vector<1x8x512xbf16> to vector<8x512xbf16>
    %c8 = arith.constant 8 : index
    %c0_71 = arith.constant 0 : index
    %c0_72 = arith.constant 0 : index
    %96 = vector.load %arg1[%c8, %c0_71, %c0_72] : memref<15x8x512xbf16, #tpu.memory_space<vmem>>, vector<1x8x512xbf16>
    %97 = vector.shape_cast %96 : vector<1x8x512xbf16> to vector<8x512xbf16>
    %cst_73 = arith.constant dense<0.000000e+00> : vector<8x128xf32>
    %98 = tpu.matmul %95, %0, %cst_73 {dimension_numbers = #tpu.dot_dimension_numbers<[1], [0], [0], [1], [0, 0, 1, 1], [], []>} : vector<8x512xbf16>, vector<512x128xbf16>, vector<8x128xf32> -> vector<8x128xf32>
    %cst_74 = arith.constant dense<0.000000e+00> : vector<8x128xf32>
    %99 = tpu.matmul %97, %1, %cst_74 {dimension_numbers = #tpu.dot_dimension_numbers<[1], [0], [0], [1], [0, 0, 1, 1], [], []>} : vector<8x512xbf16>, vector<512x128xbf16>, vector<8x128xf32> -> vector<8x128xf32>
    %100 = arith.addf %98, %99 : vector<8x128xf32>
    %101 = vector.broadcast %2 : vector<1x128xf32> to vector<8x128xf32>
    %102 = arith.addf %100, %101 : vector<8x128xf32>
    %cst_75 = arith.constant 0.000000e+00 : f32
    %103 = vector.broadcast %cst_75 : f32 to vector<8x128xf32>
    %104 = arith.maximumf %102, %103 : vector<8x128xf32>
    %105 = arith.truncf %104 : vector<8x128xf32> to vector<8x128xbf16>
    %c0_76 = arith.constant 0 : index
    %c896 = arith.constant 896 : index
    %106 = vector.load %arg12[%c0_76, %c896] : memref<8x1792xbf16, #tpu.memory_space<vmem>>, vector<8x128xbf16>
    tpu.vector_store %arg12[%c0_76, %c896], %105 {strides = array<i32>} : memref<8x1792xbf16, #tpu.memory_space<vmem>>, vector<8x128xbf16>,
    %c8_77 = arith.constant 8 : index
    %c0_78 = arith.constant 0 : index
    %c0_79 = arith.constant 0 : index
    %107 = vector.load %arg1[%c8_77, %c0_78, %c0_79] : memref<15x8x512xbf16, #tpu.memory_space<vmem>>, vector<1x8x512xbf16>
    %108 = vector.shape_cast %107 : vector<1x8x512xbf16> to vector<8x512xbf16>
    %c9 = arith.constant 9 : index
    %c0_80 = arith.constant 0 : index
    %c0_81 = arith.constant 0 : index
    %109 = vector.load %arg1[%c9, %c0_80, %c0_81] : memref<15x8x512xbf16, #tpu.memory_space<vmem>>, vector<1x8x512xbf16>
    %110 = vector.shape_cast %109 : vector<1x8x512xbf16> to vector<8x512xbf16>
    %cst_82 = arith.constant dense<0.000000e+00> : vector<8x128xf32>
    %111 = tpu.matmul %108, %0, %cst_82 {dimension_numbers = #tpu.dot_dimension_numbers<[1], [0], [0], [1], [0, 0, 1, 1], [], []>} : vector<8x512xbf16>, vector<512x128xbf16>, vector<8x128xf32> -> vector<8x128xf32>
    %cst_83 = arith.constant dense<0.000000e+00> : vector<8x128xf32>
    %112 = tpu.matmul %110, %1, %cst_83 {dimension_numbers = #tpu.dot_dimension_numbers<[1], [0], [0], [1], [0, 0, 1, 1], [], []>} : vector<8x512xbf16>, vector<512x128xbf16>, vector<8x128xf32> -> vector<8x128xf32>
    %113 = arith.addf %111, %112 : vector<8x128xf32>
    %114 = vector.broadcast %2 : vector<1x128xf32> to vector<8x128xf32>
    %115 = arith.addf %113, %114 : vector<8x128xf32>
    %cst_84 = arith.constant 0.000000e+00 : f32
    %116 = vector.broadcast %cst_84 : f32 to vector<8x128xf32>
    %117 = arith.maximumf %115, %116 : vector<8x128xf32>
    %118 = arith.truncf %117 : vector<8x128xf32> to vector<8x128xbf16>
    %c0_85 = arith.constant 0 : index
    %c1024 = arith.constant 1024 : index
    %119 = vector.load %arg12[%c0_85, %c1024] : memref<8x1792xbf16, #tpu.memory_space<vmem>>, vector<8x128xbf16>
    tpu.vector_store %arg12[%c0_85, %c1024], %118 {strides = array<i32>} : memref<8x1792xbf16, #tpu.memory_space<vmem>>, vector<8x128xbf16>,
    %c9_86 = arith.constant 9 : index
    %c0_87 = arith.constant 0 : index
    %c0_88 = arith.constant 0 : index
    %120 = vector.load %arg1[%c9_86, %c0_87, %c0_88] : memref<15x8x512xbf16, #tpu.memory_space<vmem>>, vector<1x8x512xbf16>
    %121 = vector.shape_cast %120 : vector<1x8x512xbf16> to vector<8x512xbf16>
    %c10 = arith.constant 10 : index
    %c0_89 = arith.constant 0 : index
    %c0_90 = arith.constant 0 : index
    %122 = vector.load %arg1[%c10, %c0_89, %c0_90] : memref<15x8x512xbf16, #tpu.memory_space<vmem>>, vector<1x8x512xbf16>
    %123 = vector.shape_cast %122 : vector<1x8x512xbf16> to vector<8x512xbf16>
    %cst_91 = arith.constant dense<0.000000e+00> : vector<8x128xf32>
    %124 = tpu.matmul %121, %0, %cst_91 {dimension_numbers = #tpu.dot_dimension_numbers<[1], [0], [0], [1], [0, 0, 1, 1], [], []>} : vector<8x512xbf16>, vector<512x128xbf16>, vector<8x128xf32> -> vector<8x128xf32>
    %cst_92 = arith.constant dense<0.000000e+00> : vector<8x128xf32>
    %125 = tpu.matmul %123, %1, %cst_92 {dimension_numbers = #tpu.dot_dimension_numbers<[1], [0], [0], [1], [0, 0, 1, 1], [], []>} : vector<8x512xbf16>, vector<512x128xbf16>, vector<8x128xf32> -> vector<8x128xf32>
    %126 = arith.addf %124, %125 : vector<8x128xf32>
    %127 = vector.broadcast %2 : vector<1x128xf32> to vector<8x128xf32>
    %128 = arith.addf %126, %127 : vector<8x128xf32>
    %cst_93 = arith.constant 0.000000e+00 : f32
    %129 = vector.broadcast %cst_93 : f32 to vector<8x128xf32>
    %130 = arith.maximumf %128, %129 : vector<8x128xf32>
    %131 = arith.truncf %130 : vector<8x128xf32> to vector<8x128xbf16>
    %c0_94 = arith.constant 0 : index
    %c1152 = arith.constant 1152 : index
    %132 = vector.load %arg12[%c0_94, %c1152] : memref<8x1792xbf16, #tpu.memory_space<vmem>>, vector<8x128xbf16>
    tpu.vector_store %arg12[%c0_94, %c1152], %131 {strides = array<i32>} : memref<8x1792xbf16, #tpu.memory_space<vmem>>, vector<8x128xbf16>,
    %c10_95 = arith.constant 10 : index
    %c0_96 = arith.constant 0 : index
    %c0_97 = arith.constant 0 : index
    %133 = vector.load %arg1[%c10_95, %c0_96, %c0_97] : memref<15x8x512xbf16, #tpu.memory_space<vmem>>, vector<1x8x512xbf16>
    %134 = vector.shape_cast %133 : vector<1x8x512xbf16> to vector<8x512xbf16>
    %c11 = arith.constant 11 : index
    %c0_98 = arith.constant 0 : index
    %c0_99 = arith.constant 0 : index
    %135 = vector.load %arg1[%c11, %c0_98, %c0_99] : memref<15x8x512xbf16, #tpu.memory_space<vmem>>, vector<1x8x512xbf16>
    %136 = vector.shape_cast %135 : vector<1x8x512xbf16> to vector<8x512xbf16>
    %cst_100 = arith.constant dense<0.000000e+00> : vector<8x128xf32>
    %137 = tpu.matmul %134, %0, %cst_100 {dimension_numbers = #tpu.dot_dimension_numbers<[1], [0], [0], [1], [0, 0, 1, 1], [], []>} : vector<8x512xbf16>, vector<512x128xbf16>, vector<8x128xf32> -> vector<8x128xf32>
    %cst_101 = arith.constant dense<0.000000e+00> : vector<8x128xf32>
    %138 = tpu.matmul %136, %1, %cst_101 {dimension_numbers = #tpu.dot_dimension_numbers<[1], [0], [0], [1], [0, 0, 1, 1], [], []>} : vector<8x512xbf16>, vector<512x128xbf16>, vector<8x128xf32> -> vector<8x128xf32>
    %139 = arith.addf %137, %138 : vector<8x128xf32>
    %140 = vector.broadcast %2 : vector<1x128xf32> to vector<8x128xf32>
    %141 = arith.addf %139, %140 : vector<8x128xf32>
    %cst_102 = arith.constant 0.000000e+00 : f32
    %142 = vector.broadcast %cst_102 : f32 to vector<8x128xf32>
    %143 = arith.maximumf %141, %142 : vector<8x128xf32>
    %144 = arith.truncf %143 : vector<8x128xf32> to vector<8x128xbf16>
    %c0_103 = arith.constant 0 : index
    %c1280 = arith.constant 1280 : index
    %145 = vector.load %arg12[%c0_103, %c1280] : memref<8x1792xbf16, #tpu.memory_space<vmem>>, vector<8x128xbf16>
    tpu.vector_store %arg12[%c0_103, %c1280], %144 {strides = array<i32>} : memref<8x1792xbf16, #tpu.memory_space<vmem>>, vector<8x128xbf16>,
    %c11_104 = arith.constant 11 : index
    %c0_105 = arith.constant 0 : index
    %c0_106 = arith.constant 0 : index
    %146 = vector.load %arg1[%c11_104, %c0_105, %c0_106] : memref<15x8x512xbf16, #tpu.memory_space<vmem>>, vector<1x8x512xbf16>
    %147 = vector.shape_cast %146 : vector<1x8x512xbf16> to vector<8x512xbf16>
    %c12 = arith.constant 12 : index
    %c0_107 = arith.constant 0 : index
    %c0_108 = arith.constant 0 : index
    %148 = vector.load %arg1[%c12, %c0_107, %c0_108] : memref<15x8x512xbf16, #tpu.memory_space<vmem>>, vector<1x8x512xbf16>
    %149 = vector.shape_cast %148 : vector<1x8x512xbf16> to vector<8x512xbf16>
    %cst_109 = arith.constant dense<0.000000e+00> : vector<8x128xf32>
    %150 = tpu.matmul %147, %0, %cst_109 {dimension_numbers = #tpu.dot_dimension_numbers<[1], [0], [0], [1], [0, 0, 1, 1], [], []>} : vector<8x512xbf16>, vector<512x128xbf16>, vector<8x128xf32> -> vector<8x128xf32>
    %cst_110 = arith.constant dense<0.000000e+00> : vector<8x128xf32>
    %151 = tpu.matmul %149, %1, %cst_110 {dimension_numbers = #tpu.dot_dimension_numbers<[1], [0], [0], [1], [0, 0, 1, 1], [], []>} : vector<8x512xbf16>, vector<512x128xbf16>, vector<8x128xf32> -> vector<8x128xf32>
    %152 = arith.addf %150, %151 : vector<8x128xf32>
    %153 = vector.broadcast %2 : vector<1x128xf32> to vector<8x128xf32>
    %154 = arith.addf %152, %153 : vector<8x128xf32>
    %cst_111 = arith.constant 0.000000e+00 : f32
    %155 = vector.broadcast %cst_111 : f32 to vector<8x128xf32>
    %156 = arith.maximumf %154, %155 : vector<8x128xf32>
    %157 = arith.truncf %156 : vector<8x128xf32> to vector<8x128xbf16>
    %c0_112 = arith.constant 0 : index
    %c1408 = arith.constant 1408 : index
    %158 = vector.load %arg12[%c0_112, %c1408] : memref<8x1792xbf16, #tpu.memory_space<vmem>>, vector<8x128xbf16>
    tpu.vector_store %arg12[%c0_112, %c1408], %157 {strides = array<i32>} : memref<8x1792xbf16, #tpu.memory_space<vmem>>, vector<8x128xbf16>,
    %c12_113 = arith.constant 12 : index
    %c0_114 = arith.constant 0 : index
    %c0_115 = arith.constant 0 : index
    %159 = vector.load %arg1[%c12_113, %c0_114, %c0_115] : memref<15x8x512xbf16, #tpu.memory_space<vmem>>, vector<1x8x512xbf16>
    %160 = vector.shape_cast %159 : vector<1x8x512xbf16> to vector<8x512xbf16>
    %c13 = arith.constant 13 : index
    %c0_116 = arith.constant 0 : index
    %c0_117 = arith.constant 0 : index
    %161 = vector.load %arg1[%c13, %c0_116, %c0_117] : memref<15x8x512xbf16, #tpu.memory_space<vmem>>, vector<1x8x512xbf16>
    %162 = vector.shape_cast %161 : vector<1x8x512xbf16> to vector<8x512xbf16>
    %cst_118 = arith.constant dense<0.000000e+00> : vector<8x128xf32>
    %163 = tpu.matmul %160, %0, %cst_118 {dimension_numbers = #tpu.dot_dimension_numbers<[1], [0], [0], [1], [0, 0, 1, 1], [], []>} : vector<8x512xbf16>, vector<512x128xbf16>, vector<8x128xf32> -> vector<8x128xf32>
    %cst_119 = arith.constant dense<0.000000e+00> : vector<8x128xf32>
    %164 = tpu.matmul %162, %1, %cst_119 {dimension_numbers = #tpu.dot_dimension_numbers<[1], [0], [0], [1], [0, 0, 1, 1], [], []>} : vector<8x512xbf16>, vector<512x128xbf16>, vector<8x128xf32> -> vector<8x128xf32>
    %165 = arith.addf %163, %164 : vector<8x128xf32>
    %166 = vector.broadcast %2 : vector<1x128xf32> to vector<8x128xf32>
    %167 = arith.addf %165, %166 : vector<8x128xf32>
    %cst_120 = arith.constant 0.000000e+00 : f32
    %168 = vector.broadcast %cst_120 : f32 to vector<8x128xf32>
    %169 = arith.maximumf %167, %168 : vector<8x128xf32>
    %170 = arith.truncf %169 : vector<8x128xf32> to vector<8x128xbf16>
    %c0_121 = arith.constant 0 : index
    %c1536 = arith.constant 1536 : index
    %171 = vector.load %arg12[%c0_121, %c1536] : memref<8x1792xbf16, #tpu.memory_space<vmem>>, vector<8x128xbf16>
    tpu.vector_store %arg12[%c0_121, %c1536], %170 {strides = array<i32>} : memref<8x1792xbf16, #tpu.memory_space<vmem>>, vector<8x128xbf16>,
    %c13_122 = arith.constant 13 : index
    %c0_123 = arith.constant 0 : index
    %c0_124 = arith.constant 0 : index
    %172 = vector.load %arg1[%c13_122, %c0_123, %c0_124] : memref<15x8x512xbf16, #tpu.memory_space<vmem>>, vector<1x8x512xbf16>
    %173 = vector.shape_cast %172 : vector<1x8x512xbf16> to vector<8x512xbf16>
    %c14 = arith.constant 14 : index
    %c0_125 = arith.constant 0 : index
    %c0_126 = arith.constant 0 : index
    %174 = vector.load %arg1[%c14, %c0_125, %c0_126] : memref<15x8x512xbf16, #tpu.memory_space<vmem>>, vector<1x8x512xbf16>
    %175 = vector.shape_cast %174 : vector<1x8x512xbf16> to vector<8x512xbf16>
    %cst_127 = arith.constant dense<0.000000e+00> : vector<8x128xf32>
    %176 = tpu.matmul %173, %0, %cst_127 {dimension_numbers = #tpu.dot_dimension_numbers<[1], [0], [0], [1], [0, 0, 1, 1], [], []>} : vector<8x512xbf16>, vector<512x128xbf16>, vector<8x128xf32> -> vector<8x128xf32>
    %cst_128 = arith.constant dense<0.000000e+00> : vector<8x128xf32>
    %177 = tpu.matmul %175, %1, %cst_128 {dimension_numbers = #tpu.dot_dimension_numbers<[1], [0], [0], [1], [0, 0, 1, 1], [], []>} : vector<8x512xbf16>, vector<512x128xbf16>, vector<8x128xf32> -> vector<8x128xf32>
    %178 = arith.addf %176, %177 : vector<8x128xf32>
    %179 = vector.broadcast %2 : vector<1x128xf32> to vector<8x128xf32>
    %180 = arith.addf %178, %179 : vector<8x128xf32>
    %cst_129 = arith.constant 0.000000e+00 : f32
    %181 = vector.broadcast %cst_129 : f32 to vector<8x128xf32>
    %182 = arith.maximumf %180, %181 : vector<8x128xf32>
    %183 = arith.truncf %182 : vector<8x128xf32> to vector<8x128xbf16>
    %c0_130 = arith.constant 0 : index
    %c1664 = arith.constant 1664 : index
    %184 = vector.load %arg12[%c0_130, %c1664] : memref<8x1792xbf16, #tpu.memory_space<vmem>>, vector<8x128xbf16>
    tpu.vector_store %arg12[%c0_130, %c1664], %183 {strides = array<i32>} : memref<8x1792xbf16, #tpu.memory_space<vmem>>, vector<8x128xbf16>,
    %c0_131 = arith.constant 0 : index
    %c0_132 = arith.constant 0 : index
    %185 = vector.load %arg5[%c0_131, %c0_132] : memref<512x64xbf16, #tpu.memory_space<vmem>>, vector<512x64xbf16>
    %c0_133 = arith.constant 0 : index
    %c0_134 = arith.constant 0 : index
    %186 = vector.load %arg6[%c0_133, %c0_134] : memref<1x64xf32, #tpu.memory_space<vmem>>, vector<1x64xf32>
    %c0_135 = arith.constant 0 : index
    %c0_136 = arith.constant 0 : index
    %187 = vector.load %arg12[%c0_135, %c0_136] : memref<8x1792xbf16, #tpu.memory_space<vmem>>, vector<8x512xbf16>
    %cst_137 = arith.constant dense<0.000000e+00> : vector<8x64xf32>
    %188 = tpu.matmul %187, %185, %cst_137 {dimension_numbers = #tpu.dot_dimension_numbers<[1], [0], [0], [1], [0, 0, 1, 1], [], []>} : vector<8x512xbf16>, vector<512x64xbf16>, vector<8x64xf32> -> vector<8x64xf32>
    %189 = vector.broadcast %186 : vector<1x64xf32> to vector<8x64xf32>
    %190 = arith.addf %188, %189 : vector<8x64xf32>
    %cst_138 = arith.constant 0.000000e+00 : f32
    %191 = vector.broadcast %cst_138 : f32 to vector<8x64xf32>
    %192 = arith.maximumf %190, %191 : vector<8x64xf32>
    %193 = arith.truncf %192 : vector<8x64xf32> to vector<8x64xbf16>
    %c0_139 = arith.constant 0 : index
    %c0_140 = arith.constant 0 : index
    %194 = vector.load %arg13[%c0_139, %c0_140] : memref<8x384xbf16, #tpu.memory_space<vmem>>, vector<8x64xbf16>
    tpu.vector_store %arg13[%c0_139, %c0_140], %193 {strides = array<i32>} : memref<8x384xbf16, #tpu.memory_space<vmem>>, vector<8x64xbf16>,
    %c0_141 = arith.constant 0 : index
    %c256_142 = arith.constant 256 : index
    %195 = vector.load %arg12[%c0_141, %c256_142] : memref<8x1792xbf16, #tpu.memory_space<vmem>>, vector<8x512xbf16>
    %cst_143 = arith.constant dense<0.000000e+00> : vector<8x64xf32>
    %196 = tpu.matmul %195, %185, %cst_143 {dimension_numbers = #tpu.dot_dimension_numbers<[1], [0], [0], [1], [0, 0, 1, 1], [], []>} : vector<8x512xbf16>, vector<512x64xbf16>, vector<8x64xf32> -> vector<8x64xf32>
    %197 = vector.broadcast %186 : vector<1x64xf32> to vector<8x64xf32>
    %198 = arith.addf %196, %197 : vector<8x64xf32>
    %cst_144 = arith.constant 0.000000e+00 : f32
    %199 = vector.broadcast %cst_144 : f32 to vector<8x64xf32>
    %200 = arith.maximumf %198, %199 : vector<8x64xf32>
    %201 = arith.truncf %200 : vector<8x64xf32> to vector<8x64xbf16>
    %c0_145 = arith.constant 0 : index
    %c64 = arith.constant 64 : index
    %202 = vector.load %arg13[%c0_145, %c64] : memref<8x384xbf16, #tpu.memory_space<vmem>>, vector<8x64xbf16>
    tpu.vector_store %arg13[%c0_145, %c64], %201 {strides = array<i32>} : memref<8x384xbf16, #tpu.memory_space<vmem>>, vector<8x64xbf16>,
    %c0_146 = arith.constant 0 : index
    %c512_147 = arith.constant 512 : index
    %203 = vector.load %arg12[%c0_146, %c512_147] : memref<8x1792xbf16, #tpu.memory_space<vmem>>, vector<8x512xbf16>
    %cst_148 = arith.constant dense<0.000000e+00> : vector<8x64xf32>
    %204 = tpu.matmul %203, %185, %cst_148 {dimension_numbers = #tpu.dot_dimension_numbers<[1], [0], [0], [1], [0, 0, 1, 1], [], []>} : vector<8x512xbf16>, vector<512x64xbf16>, vector<8x64xf32> -> vector<8x64xf32>
    %205 = vector.broadcast %186 : vector<1x64xf32> to vector<8x64xf32>
    %206 = arith.addf %204, %205 : vector<8x64xf32>
    %cst_149 = arith.constant 0.000000e+00 : f32
    %207 = vector.broadcast %cst_149 : f32 to vector<8x64xf32>
    %208 = arith.maximumf %206, %207 : vector<8x64xf32>
    %209 = arith.truncf %208 : vector<8x64xf32> to vector<8x64xbf16>
    %c0_150 = arith.constant 0 : index
    %c128_151 = arith.constant 128 : index
    %210 = vector.load %arg13[%c0_150, %c128_151] : memref<8x384xbf16, #tpu.memory_space<vmem>>, vector<8x64xbf16>
    tpu.vector_store %arg13[%c0_150, %c128_151], %209 {strides = array<i32>} : memref<8x384xbf16, #tpu.memory_space<vmem>>, vector<8x64xbf16>,
    %c0_152 = arith.constant 0 : index
    %c768_153 = arith.constant 768 : index
    %211 = vector.load %arg12[%c0_152, %c768_153] : memref<8x1792xbf16, #tpu.memory_space<vmem>>, vector<8x512xbf16>
    %cst_154 = arith.constant dense<0.000000e+00> : vector<8x64xf32>
    %212 = tpu.matmul %211, %185, %cst_154 {dimension_numbers = #tpu.dot_dimension_numbers<[1], [0], [0], [1], [0, 0, 1, 1], [], []>} : vector<8x512xbf16>, vector<512x64xbf16>, vector<8x64xf32> -> vector<8x64xf32>
    %213 = vector.broadcast %186 : vector<1x64xf32> to vector<8x64xf32>
    %214 = arith.addf %212, %213 : vector<8x64xf32>
    %cst_155 = arith.constant 0.000000e+00 : f32
    %215 = vector.broadcast %cst_155 : f32 to vector<8x64xf32>
    %216 = arith.maximumf %214, %215 : vector<8x64xf32>
    %217 = arith.truncf %216 : vector<8x64xf32> to vector<8x64xbf16>
    %c0_156 = arith.constant 0 : index
    %c192 = arith.constant 192 : index
    %218 = vector.load %arg13[%c0_156, %c192] : memref<8x384xbf16, #tpu.memory_space<vmem>>, vector<8x64xbf16>
    tpu.vector_store %arg13[%c0_156, %c192], %217 {strides = array<i32>} : memref<8x384xbf16, #tpu.memory_space<vmem>>, vector<8x64xbf16>,
    %c0_157 = arith.constant 0 : index
    %c1024_158 = arith.constant 1024 : index
    %219 = vector.load %arg12[%c0_157, %c1024_158] : memref<8x1792xbf16, #tpu.memory_space<vmem>>, vector<8x512xbf16>
    %cst_159 = arith.constant dense<0.000000e+00> : vector<8x64xf32>
    %220 = tpu.matmul %219, %185, %cst_159 {dimension_numbers = #tpu.dot_dimension_numbers<[1], [0], [0], [1], [0, 0, 1, 1], [], []>} : vector<8x512xbf16>, vector<512x64xbf16>, vector<8x64xf32> -> vector<8x64xf32>
    %221 = vector.broadcast %186 : vector<1x64xf32> to vector<8x64xf32>
    %222 = arith.addf %220, %221 : vector<8x64xf32>
    %cst_160 = arith.constant 0.000000e+00 : f32
    %223 = vector.broadcast %cst_160 : f32 to vector<8x64xf32>
    %224 = arith.maximumf %222, %223 : vector<8x64xf32>
    %225 = arith.truncf %224 : vector<8x64xf32> to vector<8x64xbf16>
    %c0_161 = arith.constant 0 : index
    %c256_162 = arith.constant 256 : index
    %226 = vector.load %arg13[%c0_161, %c256_162] : memref<8x384xbf16, #tpu.memory_space<vmem>>, vector<8x64xbf16>
    tpu.vector_store %arg13[%c0_161, %c256_162], %225 {strides = array<i32>} : memref<8x384xbf16, #tpu.memory_space<vmem>>, vector<8x64xbf16>,
    %c0_163 = arith.constant 0 : index
    %c1280_164 = arith.constant 1280 : index
    %227 = vector.load %arg12[%c0_163, %c1280_164] : memref<8x1792xbf16, #tpu.memory_space<vmem>>, vector<8x512xbf16>
    %cst_165 = arith.constant dense<0.000000e+00> : vector<8x64xf32>
    %228 = tpu.matmul %227, %185, %cst_165 {dimension_numbers = #tpu.dot_dimension_numbers<[1], [0], [0], [1], [0, 0, 1, 1], [], []>} : vector<8x512xbf16>, vector<512x64xbf16>, vector<8x64xf32> -> vector<8x64xf32>
    %229 = vector.broadcast %186 : vector<1x64xf32> to vector<8x64xf32>
    %230 = arith.addf %228, %229 : vector<8x64xf32>
    %cst_166 = arith.constant 0.000000e+00 : f32
    %231 = vector.broadcast %cst_166 : f32 to vector<8x64xf32>
    %232 = arith.maximumf %230, %231 : vector<8x64xf32>
    %233 = arith.truncf %232 : vector<8x64xf32> to vector<8x64xbf16>
    %c0_167 = arith.constant 0 : index
    %c320 = arith.constant 320 : index
    %234 = vector.load %arg13[%c0_167, %c320] : memref<8x384xbf16, #tpu.memory_space<vmem>>, vector<8x64xbf16>
    tpu.vector_store %arg13[%c0_167, %c320], %233 {strides = array<i32>} : memref<8x384xbf16, #tpu.memory_space<vmem>>, vector<8x64xbf16>,
    %c0_168 = arith.constant 0 : index
    %c0_169 = arith.constant 0 : index
    %235 = vector.load %arg13[%c0_168, %c0_169] : memref<8x384xbf16, #tpu.memory_space<vmem>>, vector<8x384xbf16>
    %c0_170 = arith.constant 0 : index
    %c0_171 = arith.constant 0 : index
    %236 = vector.load %arg7[%c0_170, %c0_171] : memref<384x256xbf16, #tpu.memory_space<vmem>>, vector<384x256xbf16>
    %cst_172 = arith.constant dense<0.000000e+00> : vector<8x256xf32>
    %237 = tpu.matmul %235, %236, %cst_172 {dimension_numbers = #tpu.dot_dimension_numbers<[1], [0], [0], [1], [0, 0, 1, 1], [], []>} : vector<8x384xbf16>, vector<384x256xbf16>, vector<8x256xf32> -> vector<8x256xf32>
    %c0_173 = arith.constant 0 : index
    %c0_174 = arith.constant 0 : index
    %238 = vector.load %arg8[%c0_173, %c0_174] : memref<1x256xf32, #tpu.memory_space<vmem>>, vector<1x256xf32>
    %239 = vector.broadcast %238 : vector<1x256xf32> to vector<8x256xf32>
    %240 = arith.addf %237, %239 : vector<8x256xf32>
    %cst_175 = arith.constant 0.000000e+00 : f32
    %241 = vector.broadcast %cst_175 : f32 to vector<8x256xf32>
    %242 = arith.maximumf %240, %241 : vector<8x256xf32>
    %243 = arith.truncf %242 : vector<8x256xf32> to vector<8x256xbf16>
    %c0_176 = arith.constant 0 : index
    %c0_177 = arith.constant 0 : index
    %244 = vector.load %arg9[%c0_176, %c0_177] : memref<256x512xbf16, #tpu.memory_space<vmem>>, vector<256x512xbf16>
    %cst_178 = arith.constant dense<0.000000e+00> : vector<8x512xf32>
    %245 = tpu.matmul %243, %244, %cst_178 {dimension_numbers = #tpu.dot_dimension_numbers<[1], [0], [0], [1], [0, 0, 1, 1], [], []>} : vector<8x256xbf16>, vector<256x512xbf16>, vector<8x512xf32> -> vector<8x512xf32>
    %c0_179 = arith.constant 0 : index
    %c0_180 = arith.constant 0 : index
    %246 = vector.load %arg10[%c0_179, %c0_180] : memref<1x512xf32, #tpu.memory_space<vmem>>, vector<1x512xf32>
    %247 = vector.broadcast %246 : vector<1x512xf32> to vector<8x512xf32>
    %248 = arith.addf %245, %247 : vector<8x512xf32>
    %cst_181 = arith.constant 0.000000e+00 : f32
    %249 = vector.broadcast %cst_181 : f32 to vector<8x512xf32>
    %250 = arith.maximumf %248, %249 : vector<8x512xf32>
    %c0_182 = arith.constant 0 : index
    %c0_183 = arith.constant 0 : index
    %251 = vector.load %arg11[%c0_182, %c0_183] : memref<8x512xf32, #tpu.memory_space<vmem>>, vector<8x512xf32>
    tpu.vector_store %arg11[%c0_182, %c0_183], %250 {strides = array<i32>} : memref<8x512xf32, #tpu.memory_space<vmem>>, vector<8x512xf32>,
    return
  }
  func.func @transform_0(%arg0: i32) -> (i32, i32, i32) {
    %c0_i32 = arith.constant 0 : i32
    %c0_i32_0 = arith.constant 0 : i32
    %c0_i32_1 = arith.constant 0 : i32
    return %c0_i32, %arg0, %c0_i32_0 : i32, i32, i32
  }
  func.func @transform_1(%arg0: i32) -> (i32, i32) {
    %c0_i32 = arith.constant 0 : i32
    %c0_i32_0 = arith.constant 0 : i32
    %c0_i32_1 = arith.constant 0 : i32
    return %c0_i32, %c0_i32_0 : i32, i32
  }
  func.func @transform_2(%arg0: i32) -> (i32, i32) {
    %c0_i32 = arith.constant 0 : i32
    %c0_i32_0 = arith.constant 0 : i32
    %c0_i32_1 = arith.constant 0 : i32
    return %c0_i32, %c0_i32_0 : i32, i32
  }
  func.func @transform_3(%arg0: i32) -> (i32, i32) {
    %c0_i32 = arith.constant 0 : i32
    %c0_i32_0 = arith.constant 0 : i32
    %c0_i32_1 = arith.constant 0 : i32
    return %c0_i32, %c0_i32_0 : i32, i32
  }
  func.func @transform_4(%arg0: i32) -> (i32, i32) {
    %c0_i32 = arith.constant 0 : i32
    %c0_i32_0 = arith.constant 0 : i32
    %c0_i32_1 = arith.constant 0 : i32
    return %c0_i32, %c0_i32_0 : i32, i32
  }
  func.func @transform_5(%arg0: i32) -> (i32, i32) {
    %c0_i32 = arith.constant 0 : i32
    %c0_i32_0 = arith.constant 0 : i32
    %c0_i32_1 = arith.constant 0 : i32
    return %c0_i32, %c0_i32_0 : i32, i32
  }
  func.func @transform_6(%arg0: i32) -> (i32, i32) {
    %c0_i32 = arith.constant 0 : i32
    %c0_i32_0 = arith.constant 0 : i32
    %c0_i32_1 = arith.constant 0 : i32
    return %c0_i32, %c0_i32_0 : i32, i32
  }
  func.func @transform_7(%arg0: i32) -> (i32, i32) {
    %c0_i32 = arith.constant 0 : i32
    %c0_i32_0 = arith.constant 0 : i32
    %c0_i32_1 = arith.constant 0 : i32
    return %c0_i32, %c0_i32_0 : i32, i32
  }
  func.func @transform_8(%arg0: i32) -> (i32, i32) {
    %c0_i32 = arith.constant 0 : i32
    %c0_i32_0 = arith.constant 0 : i32
    %c0_i32_1 = arith.constant 0 : i32
    return %c0_i32, %c0_i32_0 : i32, i32
  }
  func.func @transform_9(%arg0: i32) -> (i32, i32) {
    %c0_i32 = arith.constant 0 : i32
    %c0_i32_0 = arith.constant 0 : i32
    %c0_i32_1 = arith.constant 0 : i32
    return %c0_i32, %c0_i32_0 : i32, i32
  }
  func.func @transform_10(%arg0: i32) -> (i32, i32) {
    %c0_i32 = arith.constant 0 : i32
    %c0_i32_0 = arith.constant 0 : i32
    return %arg0, %c0_i32 : i32, i32
  }
}

</mosaic_0001>

<bundles_post_ra>
// kernel: tile.13
= control target key start
LH: loop header
LB: loop body
LE: loop exit
PB: predicated region body
PF: predicated region fallthrough
CT: control target
= control target key end

     0   :  { %s22_s0 = inlined_call_operand.vmem [shape: f32[32], index: 0, kind: input, shape index: {}]   ;;  %s23_s1 = inlined_call_operand.vmem [shape: f32[4,32], index: 1, kind: output, shape index: {}]  }
   0x1   :  { %v4_v0 = vld [vmem:[%s22_s0] ss:$0 sm:$0xff] }
   0x2   :  { %5 = vst [vmem:[%s23_s1] sm:$0xf] %v4_v0 }

// kernel: tile.14
= control target key start
LH: loop header
LB: loop body
LE: loop exit
PB: predicated region body
PF: predicated region fallthrough
CT: control target
= control target key end

     0   :  { %vm7_vm0 = vcmask 261120   ;;  %s37_s8 = smov 32   ;;  %s38_s9 = smov 64   ;;  %vm13_vm1 = vcmask 1048320   ;;  %vm19_vm2 = vcmask 785920   ;;  %vm25_vm3 = vcmask 523520   ;;  %s55_s0 = inlined_call_operand.vmem [shape: f32[4,32], index: 0, kind: input, shape index: {}]   ;;  %s56_s1 = inlined_call_operand.vmem [shape: f32[1,128], index: 1, kind: output, shape index: {}]  }
   0x1   :  { %v4_v0 = vld [vmem:[%s55_s0] sm:$0xf]  ;;  %s36_s0 = smov 96  }
   0x2   :  { %5 = vst [vmem:[#allocation1] sm:$0xf] %v4_v0 }
   0x9   :  { %v10_v1 = vld [vmem:[#allocation1 + $0x3] sm:$0x1]   ;;  %v22_v2 = vld [vmem:[#allocation1 + $0x1] sm:$0x1]   ;;  %v6_v3 = vld [vmem:[#allocation1] sm:$0x1]  }
   0xa   :  { %11 = vrot.lane.b32.xlu0 %v10_v1, %s36_s0  ;;  %23 = vrot.lane.b32.xlu1 %v22_v2, %s37_s8  ;;  %v16_v4 = vld [vmem:[#allocation1 + $0x2] sm:$0x1]   ;;  %8 = vst.msk [vmem:[#allocation0] sm:$0x1] %vm7_vm0, %v6_v3  }
   0xe   :  { %17 = vrot.lane.b32.xlu0 %v16_v4, %s38_s9 }
  0x7c   :  { %v12_v5 = vpop.permute.xlu0 %11   ;;  %v24_v6 = vpop.permute.xlu1 %23  }
  0x7d   :  { %14 = vst.msk [vmem:[#allocation0] sm:$0x1] %vm13_vm1, %v12_v5  }
  0x80   :  { %v18_v7 = vpop.permute.xlu0 %17  }
  0x81   :  { %20 = vst.msk [vmem:[#allocation0] sm:$0x1] %vm19_vm2, %v18_v7  }
  0x82   :  { %26 = vst.msk [vmem:[#allocation0] sm:$0x1] %vm25_vm3, %v24_v6  }
  0x89   :  { %v30_v8 = vld [vmem:[#allocation0] sm:$0x1] }
  0x8a   :  { %32 = vst [vmem:[%s56_s1] sm:$0x1] %v30_v8 }

// kernel: tile.18
= control target key start
LH: loop header
LB: loop body
LE: loop exit
PB: predicated region body
PF: predicated region fallthrough
CT: control target
= control target key end

     0   :  { %s22_s0 = inlined_call_operand.vmem [shape: f32[64], index: 0, kind: input, shape index: {}]   ;;  %s23_s1 = inlined_call_operand.vmem [shape: f32[4,64], index: 1, kind: output, shape index: {}]  }
   0x1   :  { %v4_v0 = vld [vmem:[%s22_s0] ss:$0 sm:$0xff] }
   0x2   :  { %5 = vst [vmem:[%s23_s1] sm:$0xf] %v4_v0 }

// kernel: tile.19
= control target key start
LH: loop header
LB: loop body
LE: loop exit
PB: predicated region body
PF: predicated region fallthrough
CT: control target
= control target key end

     0   :  { %s6_s8 = smov 3  ;;  %vm8_vm0 = vcmask 523264   ;;  %s30_s9 = smov 64   ;;  %vm15_vm1 = vcmask 1048064   ;;  %s50_s0 = inlined_call_operand.vmem [shape: f32[4,64], index: 0, kind: input, shape index: {}]   ;;  %s51_s1 = inlined_call_operand.vmem [shape: f32[1,256], index: 1, kind: output, shape index: {}]  }
   0x1   :  { %v4_v0 = vld [vmem:[%s50_s0] sm:$0xf]  ;;  %s11_s0 = smov 3 }
   0x2   :  { %5 = vst [vmem:[#allocation1] sm:$0xf] %v4_v0 }
   0x9   :  { %v12_v1 = vld [vmem:[#allocation1 + $0x1] ss:$2 sm:%s11_s0]   ;;  %v7_v2 = vld [vmem:[#allocation1] ss:$2 sm:%s6_s8]  }
   0xa   :  { %13 = vrot.lane.b32.xlu0 %v12_v1, %s30_s9  ;;  %9 = vst.msk [vmem:[#allocation0] ss:$8 sm:$0x3] %vm8_vm0, %v7_v2  }
  0x7c   :  { %v14_v3 = vpop.permute.xlu0 %13  }
  0x7d   :  { %16 = vst.msk [vmem:[#allocation0] ss:$8 sm:$0x3] %vm15_vm1, %v14_v3  }
  0x84   :  { %v20_v4 = vld [vmem:[#allocation0] sm:$0x1]  ;;  %v24_v5 = vld [vmem:[#allocation0 + $0x8] sm:$0x1] }
  0x85   :  { %22 = vst [vmem:[%s51_s1] sm:$0x1] %v20_v4  ;;  %28 = vst [vmem:[%s51_s1 + $0x1] sm:$0x1] %v24_v5 }

// kernel: extra_local_pixel_embedder.1
= control target key start
LH: loop header
LB: loop body
LE: loop exit
PB: predicated region body
PF: predicated region fallthrough
CT: control target
= control target key end

     0   :  { %15 = vsyncpa [#allocation6], 0  ;;  %s11282_s0 = inlined_call_operand.vmem [shape: bf16[15,16,512], index: 0, kind: input, shape index: {}]   ;;  %s11283_s1 = inlined_call_operand.vmem [shape: bf16[512,128], index: 1, kind: input, shape index: {}]   ;;  %s11284_s2 = inlined_call_operand.vmem [shape: bf16[512,128], index: 2, kind: input, shape index: {}]   ;;  %s11285_s3 = inlined_call_operand.vmem [shape: f32[1,128], index: 3, kind: input, shape index: {}]   ;;  %s11286_s4 = inlined_call_operand.vmem [shape: bf16[512,64], index: 4, kind: input, shape index: {}]   ;;  %s11287_s5 = inlined_call_operand.vmem [shape: f32[1,64], index: 5, kind: input, shape index: {}]   ;;  %s11288_s6 = inlined_call_operand.vmem [shape: bf16[384,256], index: 6, kind: input, shape index: {}]   ;;  %s11289_s7 = inlined_call_operand.vmem [shape: f32[1,256], index: 7, kind: input, shape index: {}]   ;;  %s11290_s8 = inlined_call_operand.vmem [shape: bf16[256,512], index: 8, kind: input, shape index: {}]   ;;  %s11291_s9 = inlined_call_operand.vmem [shape: f32[1,512], index: 9, kind: input, shape index: {}]   ;;  %s11292_s10 = inlined_call_operand.hbm [shape: f32[16,512], index: 10, kind: output, shape index: {}]  }
   0x1   :  { %17 = vsyncpa [#allocation6 + $0x1], 0  ;;  %s8147_s13 = smov 0   ;;  %s8149_s14 = smov 0  }
   0x2   :  { %s8151_s15 = smov 0   ;;  %s8153_s16 = smov 0  }
   0x3 LB: > { %s11456_s17 = sadd.s32 4294967295, %s8087_s16   ;;  %s5566_s18 = sadd.s32 4294967294, %s8087_s16   ;;  %s8087_s16 = sphi %s8153_s16, %s11697_s16   ;;  %s8083_s15 = sphi %s8151_s15, %s11696_s15   ;;  %s8079_s14 = sphi %s8149_s14, %s11695_s14   ;;  %s8075_s13 = sphi %s8147_s13, %s11694_s13  }
   0x4   : > { %s8170_s19 = sadd.s32 1, %s8087_s16   ;;  %s30_s20 = sadd.s32 1, %s8083_s15 }
   0x5   : > { %s27_s21 = ssub.s32 %s8087_s16, %s8170_s19  ;;  %p37_p0 = scmp.ne.s32.totalorder %s8083_s15, %s8079_s14 }
   0x6   : > { %p28_p1 = scmp.eq.s32.totalorder %s27_s21, 0  ;;  %p38_p2 = scmp.eq.s32.totalorder %s8087_s16, 0 }
   0x7   : > { %p256_p3 = scmp.eq.s32.totalorder %s11456_s17, 1  ;;  %p261_p4 = scmp.ne.s32.totalorder %s8079_s14, %s8075_s13 }
   0x8   : > { %s8183_s22 = scalar_select %p28_p1, %s8083_s15, %s30_s20  }
   0x9   : > { %p39_p5 = por %p38_p2, %p37_p0  ;;  %p8185_p6 = por %p256_p3, %p37_p0 }
   0xa   : > { %p262_p7 = scmp.eq.s32.totalorder %s5566_s18, 1  ;;  %p5568_p9 = scmp.ge.s32.totalorder %s8087_s16, 2 }
   0xc   : > { %p8189_p8 = por %p262_p7, %p261_p4  ;;  %305 = sbr.rel (%p5568_p9) target bundleno = 38 (0x26), region = 52 }
  0x13   : > { %308 = sbr.rel (!%p39_p5) target bundleno = 38 (0x26), region = 56  ;;  %s310_s25 = sand.u32 (%p39_p5), 1, %s8083_s15  }
  0x14   : > { %s5984_s26 = sshll.u32 (%p39_p5), %s8087_s16, 4  ;;  %s7491_s27 = smul.u32 (%p39_p5), 240, %s310_s25 }
  0x15   : > { %s8201_s30 = scalar_lea.vmem (%p39_p5), %s11282_s0, %s5984_s26 }
  0x16   : > { %v328_v0 = vld [vmem:[%s8201_s30] sm:$0xff] (%p39_p5)  ;;  %v330_v1 = vld [vmem:[%s8201_s30 + $0x8] sm:$0xff] (%p39_p5)  ;;  %s8209_s11 = scalar_lea.vmem (%p39_p5), [#allocation4], %s7491_s27 }
  0x17   : > { %v332_v2 = vld [vmem:[%s8201_s30 + $0x20] sm:$0xff] (%p39_p5)  ;;  %v334_v3 = vld [vmem:[%s8201_s30 + $0x28] sm:$0xff] (%p39_p5)  ;;  %329 = vst [vmem:[%s8209_s11] sm:$0xff] (%p39_p5), %v328_v0  ;;  %331 = vst [vmem:[%s8209_s11 + $0x8] sm:$0xff] (%p39_p5), %v330_v1 }
  0x18   : > { %v336_v4 = vld [vmem:[%s8201_s30 + $0x40] sm:$0xff] (%p39_p5)  ;;  %v338_v5 = vld [vmem:[%s8201_s30 + $0x48] sm:$0xff] (%p39_p5)  ;;  %333 = vst [vmem:[%s8209_s11 + $0x10] sm:$0xff] (%p39_p5), %v332_v2  ;;  %335 = vst [vmem:[%s8209_s11 + $0x18] sm:$0xff] (%p39_p5), %v334_v3 }
  0x19   : > { %337 = vst [vmem:[%s8209_s11 + $0x20] sm:$0xff] (%p39_p5), %v336_v4  ;;  %339 = vst [vmem:[%s8209_s11 + $0x28] sm:$0xff] (%p39_p5), %v338_v5  ;;  %v340_v6 = vld [vmem:[%s8201_s30 + $0x60] sm:$0xff] (%p39_p5)  ;;  %v342_v7 = vld [vmem:[%s8201_s30 + $0x68] sm:$0xff] (%p39_p5) }
  0x1a   : > { %v344_v8 = vld [vmem:[%s8201_s30 + $0x80] sm:$0xff]  ;;  %341 = vst [vmem:[%s8209_s11 + $0x30] sm:$0xff] %v340_v6  ;;  %343 = vst [vmem:[%s8209_s11 + $0x38] sm:$0xff] %v342_v7  ;;  %v346_v9 = vld [vmem:[%s8201_s30 + $0x88] sm:$0xff] }
  0x1b   : > { %345 = vst [vmem:[%s8209_s11 + $0x40] sm:$0xff] %v344_v8  ;;  %v348_v10 = vld [vmem:[%s8201_s30 + $0xa0] sm:$0xff]  ;;  %v350_v11 = vld [vmem:[%s8201_s30 + $0xa8] sm:$0xff]  ;;  %347 = vst [vmem:[%s8209_s11 + $0x48] sm:$0xff] %v346_v9 }
  0x1c   : > { %349 = vst [vmem:[%s8209_s11 + $0x50] sm:$0xff] %v348_v10  ;;  %351 = vst [vmem:[%s8209_s11 + $0x58] sm:$0xff] %v350_v11  ;;  %v352_v12 = vld [vmem:[%s8201_s30 + $0xc0] sm:$0xff]  ;;  %v354_v13 = vld [vmem:[%s8201_s30 + $0xc8] sm:$0xff] }
  0x1d   : > { %v356_v14 = vld [vmem:[%s8201_s30 + $0xe0] sm:$0xff]  ;;  %353 = vst [vmem:[%s8209_s11 + $0x60] sm:$0xff] %v352_v12  ;;  %355 = vst [vmem:[%s8209_s11 + $0x68] sm:$0xff] %v354_v13  ;;  %v358_v15 = vld [vmem:[%s8201_s30 + $0xe8] sm:$0xff] }
  0x1e   : > { %357 = vst [vmem:[%s8209_s11 + $0x70] sm:$0xff] %v356_v14  ;;  %v360_v16 = vld [vmem:[%s8201_s30 + $0x100] sm:$0xff]  ;;  %v362_v17 = vld [vmem:[%s8201_s30 + $0x108] sm:$0xff]  ;;  %359 = vst [vmem:[%s8209_s11 + $0x78] sm:$0xff] %v358_v15 }
  0x1f   : > { %361 = vst [vmem:[%s8209_s11 + $0x80] sm:$0xff] %v360_v16  ;;  %363 = vst [vmem:[%s8209_s11 + $0x88] sm:$0xff] %v362_v17  ;;  %v364_v18 = vld [vmem:[%s8201_s30 + $0x120] sm:$0xff]  ;;  %v366_v19 = vld [vmem:[%s8201_s30 + $0x128] sm:$0xff] }
  0x20   : > { %v368_v20 = vld [vmem:[%s8201_s30 + $0x140] sm:$0xff]  ;;  %365 = vst [vmem:[%s8209_s11 + $0x90] sm:$0xff] %v364_v18  ;;  %367 = vst [vmem:[%s8209_s11 + $0x98] sm:$0xff] %v366_v19  ;;  %v370_v21 = vld [vmem:[%s8201_s30 + $0x148] sm:$0xff] }
  0x21   : > { %369 = vst [vmem:[%s8209_s11 + $0xa0] sm:$0xff] %v368_v20  ;;  %v372_v22 = vld [vmem:[%s8201_s30 + $0x160] sm:$0xff]  ;;  %v374_v23 = vld [vmem:[%s8201_s30 + $0x168] sm:$0xff]  ;;  %371 = vst [vmem:[%s8209_s11 + $0xa8] sm:$0xff] %v370_v21 }
  0x22   : > { %373 = vst [vmem:[%s8209_s11 + $0xb0] sm:$0xff] %v372_v22  ;;  %375 = vst [vmem:[%s8209_s11 + $0xb8] sm:$0xff] %v374_v23  ;;  %v376_v24 = vld [vmem:[%s8201_s30 + $0x180] sm:$0xff]  ;;  %v378_v25 = vld [vmem:[%s8201_s30 + $0x188] sm:$0xff] }
  0x23   : > { %v380_v26 = vld [vmem:[%s8201_s30 + $0x1a0] sm:$0xff]  ;;  %377 = vst [vmem:[%s8209_s11 + $0xc0] sm:$0xff] %v376_v24  ;;  %379 = vst [vmem:[%s8209_s11 + $0xc8] sm:$0xff] %v378_v25  ;;  %v382_v27 = vld [vmem:[%s8201_s30 + $0x1a8] sm:$0xff] }
  0x24   : > { %381 = vst [vmem:[%s8209_s11 + $0xd0] sm:$0xff] %v380_v26  ;;  %v384_v28 = vld [vmem:[%s8201_s30 + $0x1c0] sm:$0xff]  ;;  %v386_v29 = vld [vmem:[%s8201_s30 + $0x1c8] sm:$0xff]  ;;  %383 = vst [vmem:[%s8209_s11 + $0xd8] sm:$0xff] %v382_v27 }
  0x25   : > { %385 = vst [vmem:[%s8209_s11 + $0xe0] sm:$0xff] %v384_v28  ;;  %387 = vst [vmem:[%s8209_s11 + $0xe8] sm:$0xff] %v386_v29 }
  0x26 PF: > { %p5571_p10 = scmp.ge.s32.totalorder %s8087_s16, 1  ;;  %p392_p11 = scmp.lt.s32.totalorder %s8087_s16, 3 }
  0x28   : > { %p393_p12 = pnand %p5571_p10, %p392_p11 }
  0x2a   : > { %396 = sbr.rel (%p393_p12) target bundleno = 2042 (0x7fa), region = 79 }
  0x31   : > { %v8270_v30 = vld [vmem:[%s11284_s2 + $0x40] sm:$0xff]   ;;  %v8293_v34 = vld [vmem:[%s11284_s2 + $0x48] sm:$0xff]   ;;  %v8317_v38 = vld [vmem:[%s11284_s2 + $0x50] sm:$0xff]   ;;  %s8404_s20 = sand.u32 1, %s8079_s14   ;;  %vm4075_vm0 = vcmask 519168   ;;  %s8089_s25 = smov 64  }
  0x32   : > { %v8275_v31 = vld [vmem:[%s11284_s2 + $0xc0] sm:$0xff]   ;;  %5989 = vmatprep.subr.bf16.mxu0 %v8270_v30  ;;  %v8299_v35 = vld [vmem:[%s11284_s2 + $0xc8] sm:$0xff]   ;;  %v8323_v39 = vld [vmem:[%s11284_s2 + $0xd0] sm:$0xff]   ;;  %s7492_s30 = smul.u32 240, %s8404_s20  ;;  %vm4181_vm1 = vcmask 1043968   ;;  %s5572_s27 = sshll.u32 %s8404_s20, 5 }
  0x33   : > { %v8281_v32 = vld [vmem:[%s11284_s2] sm:$0xff]   ;;  %6011 = vmatprep.subr.bf16.mxu1 %v8275_v31  ;;  %v8305_v36 = vld [vmem:[%s11284_s2 + $0x8] sm:$0xff]   ;;  %v8329_v40 = vld [vmem:[%s11284_s2 + $0x10] sm:$0xff]   ;;  %s11693_s28 = sadd.s32 4294967295, %s8087_s16  }
  0x34   : > { %v8287_v33 = vld [vmem:[%s11284_s2 + $0x80] sm:$0xff]   ;;  %5990 = vmatpush3.bf16.msra.mxu0 %v8281_v32  ;;  %v8311_v37 = vld [vmem:[%s11284_s2 + $0x88] sm:$0xff]   ;;  %v8335_v41 = vld [vmem:[%s11284_s2 + $0x90] sm:$0xff]   ;;  %s8462_s21 = scalar_lea.vmem [#allocation4], %s7492_s30  ;;  %s5988_s29 = sshll.u32 %s11693_s28, 9 }
  0x35   : > { %6012 = vmatpush3.bf16.msra.mxu1 %v8287_v33  ;;  %5991 = vmatprep.subr.bf16.mxu0 %v8293_v34  ;;  %v8341_v42 = vld [vmem:[%s11284_s2 + $0x58] sm:$0xff]   ;;  %v8365_v46 = vld [vmem:[%s11284_s2 + $0x60] sm:$0xff]   ;;  %v8389_v50 = vld [vmem:[%s11284_s2 + $0x68] sm:$0xff]   ;;  %s11238_s18 = scalar_lea.hbm %s11292_s10, %s5988_s29  ;;  %s8091_s30 = smov [#allocation5]  }
  0x36   : > { %6013 = vmatprep.subr.bf16.mxu1 %v8299_v35  ;;  %v8347_v43 = vld [vmem:[%s11284_s2 + $0xd8] sm:$0xff]   ;;  %v8371_v47 = vld [vmem:[%s11284_s2 + $0xe0] sm:$0xff]   ;;  %v8395_v51 = vld [vmem:[%s11284_s2 + $0xe8] sm:$0xff]  }
  0x37   : > { %v8353_v44 = vld [vmem:[%s11284_s2 + $0x18] sm:$0xff]   ;;  %v8377_v48 = vld [vmem:[%s11284_s2 + $0x20] sm:$0xff]   ;;  %v8401_v52 = vld [vmem:[%s11284_s2 + $0x28] sm:$0xff]  }
  0x38   : > { %5992 = vmatpush3.bf16.msra.mxu0 %v8305_v36  ;;  %v8359_v45 = vld [vmem:[%s11284_s2 + $0x98] sm:$0xff]   ;;  %v8383_v49 = vld [vmem:[%s11284_s2 + $0xa0] sm:$0xff]   ;;  %v8410_v53 = vld [vmem:[%s11284_s2 + $0xa8] sm:$0xff]  }
  0x39   : > { %6014 = vmatpush3.bf16.msra.mxu1 %v8311_v37  ;;  %5993 = vmatprep.subr.bf16.mxu0 %v8317_v38  ;;  %v8416_v54 = vld [vmem:[%s11284_s2 + $0x70] sm:$0xff]   ;;  %v8441_v58 = vld [vmem:[%s11284_s2 + $0x78] sm:$0xff]   ;;  %v8478_v4 = vld [vmem:[%s11283_s1 + $0x40] sm:$0xff]  }
  0x3a   : > { %6015 = vmatprep.subr.bf16.mxu1 %v8323_v39  ;;  %v8422_v55 = vld [vmem:[%s11284_s2 + $0xf0] sm:$0xff]   ;;  %v8447_v59 = vld [vmem:[%s11284_s2 + $0xf8] sm:$0xff]   ;;  %v8483_v5 = vld [vmem:[%s11283_s1 + $0xc0] sm:$0xff]  }
  0x3b   : > { %v8429_v56 = vld [vmem:[%s11284_s2 + $0x30] sm:$0xff]   ;;  %v8453_v60 = vld [vmem:[%s11284_s2 + $0x38] sm:$0xff]   ;;  %v8490_v6 = vld [vmem:[%s11283_s1] sm:$0xff]  }
  0x3c   : > { %5994 = vmatpush3.bf16.msra.mxu0 %v8329_v40  ;;  %v8435_v57 = vld [vmem:[%s11284_s2 + $0xb0] sm:$0xff]   ;;  %v8459_v61 = vld [vmem:[%s11284_s2 + $0xb8] sm:$0xff]   ;;  %v8497_v7 = vld [vmem:[%s11283_s1 + $0x80] sm:$0xff]  }
  0x3d   : > { %6016 = vmatpush3.bf16.msra.mxu1 %v8335_v41  ;;  %5995 = vmatprep.subr.bf16.mxu0 %v8341_v42  ;;  %v5573_v62 = vld [vmem:[%s8462_s21 + $0x10] sm:$0xff]  ;;  %v5574_v63 = vld [vmem:[%s8462_s21 + $0x18] sm:$0xff] }
  0x3e   : > { %6017 = vmatprep.subr.bf16.mxu1 %v8347_v43  ;;  %v8467_v0 = vcombine.low %v5573_v62, %v5573_v62  ;;  %v8469_v1 = vcombine.high %v5573_v62, %v5573_v62  ;;  %v8471_v2 = vcombine.low %v5574_v63, %v5574_v63  ;;  %v8473_v3 = vcombine.high %v5574_v63, %v5574_v63  ;;  %v8504_v8 = vld [vmem:[%s11283_s1 + $0x48] sm:$0xff]   ;;  %v8528_v12 = vld [vmem:[%s11283_s1 + $0x50] sm:$0xff]   ;;  %v8552_v16 = vld [vmem:[%s11283_s1 + $0x58] sm:$0xff]  }
  0x3f   : > { %v8511_v9 = vld [vmem:[%s11283_s1 + $0xc8] sm:$0xff]   ;;  %v8535_v13 = vld [vmem:[%s11283_s1 + $0xd0] sm:$0xff]   ;;  %v8559_v17 = vld [vmem:[%s11283_s1 + $0xd8] sm:$0xff]  }
  0x40   : > { %5996 = vmatpush3.bf16.msra.mxu0 %v8353_v44  ;;  %11459 = vst [vmem:[#allocation8_spill] sm:$0xff] %v8467_v0  ;;  %11460 = vst [vmem:[#allocation9_spill] sm:$0xff] %v8471_v2  ;;  %809 = vmatprep.mubr.bf16.mxu0 %v8469_v1  ;;  %v8517_v10 = vld [vmem:[%s11283_s1 + $0x8] sm:$0xff]   ;;  %v8541_v14 = vld [vmem:[%s11283_s1 + $0x10] sm:$0xff]  }
  0x41   : > { %6018 = vmatpush3.bf16.msra.mxu1 %v8359_v45  ;;  %5997 = vmatprep.subr.bf16.mxu0 %v8365_v46  ;;  %v8523_v11 = vld [vmem:[%s11283_s1 + $0x88] sm:$0xff]   ;;  %v8547_v15 = vld [vmem:[%s11283_s1 + $0x90] sm:$0xff]   ;;  %v8565_v18 = vld [vmem:[%s11283_s1 + $0x18] sm:$0xff]  }
  0x42   : > { %6019 = vmatprep.subr.bf16.mxu1 %v8371_v47  ;;  %849 = vmatprep.mubr.bf16.mxu1 %v8473_v3  ;;  %v8571_v19 = vld [vmem:[%s11283_s1 + $0x98] sm:$0xff]   ;;  %v8576_v20 = vld [vmem:[%s11283_s1 + $0x60] sm:$0xff]   ;;  %v8600_v24 = vld [vmem:[%s11283_s1 + $0x68] sm:$0xff]  }
  0x43   : > { %v8583_v21 = vld [vmem:[%s11283_s1 + $0xe0] sm:$0xff]   ;;  %11463 = vst [vmem:[#allocation12_spill] sm:$0xff] %v8600_v24  ;;  %v8607_v25 = vld [vmem:[%s11283_s1 + $0xe8] sm:$0xff]   ;;  %v8624_v28 = vld [vmem:[%s11283_s1 + $0x70] sm:$0xff]  }
  0x44   : > { %5998 = vmatpush3.bf16.msra.mxu0 %v8377_v48  ;;  %v8589_v22 = vld [vmem:[%s11283_s1 + $0x20] sm:$0xff]   ;;  %11464 = vst [vmem:[#allocation13_spill] sm:$0xff] %v8607_v25  ;;  %v8613_v26 = vld [vmem:[%s11283_s1 + $0x28] sm:$0xff]   ;;  %11467 = vst [vmem:[#allocation16_spill] sm:$0xff] %v8624_v28 }
  0x45   : > { %6020 = vmatpush3.bf16.msra.mxu1 %v8383_v49  ;;  %5999 = vmatprep.subr.bf16.mxu0 %v8389_v50  ;;  %11461 = vst [vmem:[#allocation10_spill] sm:$0xff] %v8589_v22  ;;  %v8595_v23 = vld [vmem:[%s11283_s1 + $0xa0] sm:$0xff]   ;;  %11465 = vst [vmem:[#allocation14_spill] sm:$0xff] %v8613_v26  ;;  %v8619_v27 = vld [vmem:[%s11283_s1 + $0xa8] sm:$0xff]  }
  0x46   : > { %6021 = vmatprep.subr.bf16.mxu1 %v8395_v51  ;;  %11462 = vst [vmem:[#allocation11_spill] sm:$0xff] %v8595_v23  ;;  %11466 = vst [vmem:[#allocation15_spill] sm:$0xff] %v8619_v27  ;;  %v8631_v29 = vld [vmem:[%s11283_s1 + $0xf0] sm:$0xff]  }
  0x47   : > { %11468 = vst [vmem:[#allocation17_spill] sm:$0xff] %v8631_v29  ;;  %v8637_v62 = vld [vmem:[%s11283_s1 + $0x30] sm:$0xff]  }
  0x48   : > { %6000 = vmatpush3.bf16.msra.mxu0 %v8401_v52  ;;  %11469 = vst [vmem:[#allocation18_spill] sm:$0xff] %v8637_v62  ;;  %v8643_v63 = vld [vmem:[%s11283_s1 + $0xb0] sm:$0xff]  }
  0x49   : > { %6022 = vmatpush3.bf16.msra.mxu1 %v8410_v53  ;;  %6001 = vmatprep.subr.bf16.mxu0 %v8416_v54  ;;  %11470 = vst [vmem:[#allocation19_spill] sm:$0xff] %v8643_v63 }
  0x4a   : > { %6023 = vmatprep.subr.bf16.mxu1 %v8422_v55 }
  0x4c   : > { %6002 = vmatpush3.bf16.msra.mxu0 %v8429_v56 }
  0x4d   : > { %6024 = vmatpush3.bf16.msra.mxu1 %v8435_v57  ;;  %6003 = vmatprep.subr.bf16.mxu0 %v8441_v58 }
  0x4e   : > { %6025 = vmatprep.subr.bf16.mxu1 %v8447_v59 }
  0x50   : > { %6004 = vmatpush3.bf16.msra.mxu0 %v8453_v60 }
  0x51   : > { %6026 = vmatpush3.bf16.msra.mxu1 %v8459_v61  ;;  %6033 = vmatprep.subr.bf16.mxu0 %v8478_v4 }
  0x52   : > { %6055 = vmatprep.subr.bf16.mxu1 %v8483_v5 }
  0x53   : > { %810 = vmatmul.mubr.bf16.vlgmr.msra.gmra.mrb[0].mxu0 %v8467_v0  ;;  %v8655_v0 = vld [vmem:[%s11283_s1 + $0xf8] sm:$0xff]  }
  0x54   : > { %850 = vmatmul.mubr.bf16.vlgmr.msra.gmra.mrb[0].mxu1 %v8471_v2  ;;  %6034 = vmatpush3.bf16.msra.mxu0 %v8490_v6  ;;  %v8648_v2 = vld [vmem:[%s11283_s1 + $0x78] sm:$0xff]   ;;  %11472 = vst [vmem:[#allocation21_spill] sm:$0xff] %v8655_v0 }
  0x55   : > { %6056 = vmatpush3.bf16.msra.mxu1 %v8497_v7  ;;  %6035 = vmatprep.subr.bf16.mxu0 %v8504_v8  ;;  %11471 = vst [vmem:[#allocation20_spill] sm:$0xff] %v8648_v2 }
  0x56   : > { %6057 = vmatprep.subr.bf16.mxu1 %v8511_v9 }
  0x58   : > { %6036 = vmatpush3.bf16.msra.mxu0 %v8517_v10 }
  0x59   : > { %6058 = vmatpush3.bf16.msra.mxu1 %v8523_v11  ;;  %6037 = vmatprep.subr.bf16.mxu0 %v8528_v12 }
  0x5a   : > { %6059 = vmatprep.subr.bf16.mxu1 %v8535_v13 }
  0x5c   : > { %6038 = vmatpush3.bf16.msra.mxu0 %v8541_v14 }
  0x5d   : > { %6060 = vmatpush3.bf16.msra.mxu1 %v8547_v15  ;;  %6039 = vmatprep.subr.bf16.mxu0 %v8552_v16 }
  0x5e   : > { %6061 = vmatprep.subr.bf16.mxu1 %v8559_v17 }
  0x60   : > { %6040 = vmatpush3.bf16.msra.mxu0 %v8565_v18 }
  0x61   : > { %6062 = vmatpush3.bf16.msra.mxu1 %v8571_v19  ;;  %6041 = vmatprep.subr.bf16.mxu0 %v8576_v20 }
  0x62   : > { %6063 = vmatprep.subr.bf16.mxu1 %v8583_v21 }
  0x64   : > { %6042 = vmatpush3.bf16.msra.mxu0 %v8589_v22 }
  0x65   : > { %6064 = vmatpush3.bf16.msra.mxu1 %v8595_v23  ;;  %6043 = vmatprep.subr.bf16.mxu0 %v8600_v24  ;;  %v5651_v24 = vld [vmem:[%s8462_s21 + $0x28] sm:$0xff] }
  0x66   : > { %6065 = vmatprep.subr.bf16.mxu1 %v8607_v25  ;;  %v5650_v25 = vld [vmem:[%s8462_s21 + $0x20] sm:$0xff]  ;;  %v8679_v22 = vcombine.high %v5651_v24, %v5651_v24 }
  0x68   : > { %6044 = vmatpush3.bf16.msra.mxu0 %v8613_v26  ;;  %v567_v26 = vld [vmem:[%s8462_s21 + $0x8] sm:$0xff] }
  0x69   : > { %6066 = vmatpush3.bf16.msra.mxu1 %v8619_v27  ;;  %6045 = vmatprep.subr.bf16.mxu0 %v8624_v28  ;;  %v5614_v23 = vcombine.high %v567_v26, %v567_v26 }
  0x6a   : > { %6067 = vmatprep.subr.bf16.mxu1 %v8631_v29  ;;  %v8661_v29 = vld [vmem:[%s11283_s1 + $0x38] sm:$0xff]  }
  0x6b   : > { %11473 = vst [vmem:[#allocation22_spill] sm:$0xff] %v8661_v29  ;;  %1135 = vmatprep.mubr.bf16.mxu1 %v5614_v23  ;;  %v11487_v23 = vld [vmem:[#allocation20_spill] sm:$0xff] }
  0x6c   : > { %6046 = vmatpush3.bf16.msra.mxu0 %v8637_v62  ;;  %v8667_v62 = vld [vmem:[%s11283_s1 + $0xb8] sm:$0xff]  }
  0x6d   : > { %6068 = vmatpush3.bf16.msra.mxu1 %v8643_v63  ;;  %6047 = vmatprep.subr.bf16.mxu0 %v8648_v2  ;;  %11474 = vst [vmem:[#allocation23_spill] sm:$0xff] %v8667_v62  ;;  %v566_v63 = vld [vmem:[%s8462_s21] sm:$0xff]  ;;  %v5613_v2 = vcombine.low %v567_v26, %v567_v26  ;;  %v5663_v26 = vld [vmem:[%s8462_s21 + $0x38] sm:$0xff] }
  0x6e   : > { %6069 = vmatprep.subr.bf16.mxu1 %v8655_v0  ;;  %v5611_v28 = vcombine.low %v566_v63, %v566_v63  ;;  %v5612_v27 = vcombine.high %v566_v63, %v566_v63  ;;  %v8677_v0 = vcombine.high %v5650_v25, %v5650_v25 }
  0x70   : > { %6048 = vmatpush3.bf16.msra.mxu0 %v8661_v29  ;;  %1095 = vmatprep.mubr.bf16.mxu0 %v5612_v27  ;;  %v8758_v27 = vld [vmem:[%s11284_s2 + $0x40] sm:$0xff]  }
  0x71   : > { %6070 = vmatpush3.bf16.msra.mxu1 %v8667_v62  ;;  %6077 = vmatprep.subr.bf16.mxu0 %v8270_v30  ;;  %v8711_v30 = vcombine.low %v5650_v25, %v5650_v25  ;;  %v5662_v25 = vld [vmem:[%s8462_s21 + $0x30] sm:$0xff] }
  0x72   : > { %6099 = vmatprep.subr.bf16.mxu1 %v8275_v31  ;;  %v8713_v31 = vcombine.low %v5651_v24, %v5651_v24  ;;  %v11488_v24 = vld [vmem:[#allocation21_spill] sm:$0xff]  ;;  %v8767_v63 = vcombine.high %v5662_v25, %v5662_v25 }
  0x73   : > { %1096 = vmatmul.mubr.bf16.vlgmr.msra.gmra.mrb[4].mxu0 %v5611_v28  ;;  %11475 = vst [vmem:[#allocation24_spill] sm:$0xff] %v8711_v30  ;;  %v8764_v28 = vld [vmem:[%s11284_s2 + $0xc0] sm:$0xff]  }
  0x74   : > { %1136 = vmatmul.mubr.bf16.vlgmr.msra.gmra.mrb[4].mxu1 %v5613_v2  ;;  %6078 = vmatpush3.bf16.msra.mxu0 %v8281_v32  ;;  %11476 = vst [vmem:[#allocation25_spill] sm:$0xff] %v8713_v31  ;;  %v11477_v32 = vld [vmem:[#allocation10_spill] sm:$0xff] }
  0x75   : > { %6100 = vmatpush3.bf16.msra.mxu1 %v8287_v33  ;;  %6079 = vmatprep.subr.bf16.mxu0 %v8293_v34  ;;  %v11478_v33 = vld [vmem:[#allocation11_spill] sm:$0xff]  ;;  %v11479_v34 = vld [vmem:[#allocation12_spill] sm:$0xff]  ;;  %v11485_v2 = vld [vmem:[#allocation18_spill] sm:$0xff]  ;;  %11489 = vst [vmem:[#allocation10_spill] sm:$0xff] %v8758_v27 }
  0x76   : > { %6101 = vmatprep.subr.bf16.mxu1 %v8299_v35  ;;  %1204 = vmatprep.mubr.bf16.mxu0 %v8677_v0  ;;  %v11480_v35 = vld [vmem:[#allocation13_spill] sm:$0xff]  ;;  %11490 = vst [vmem:[#allocation11_spill] sm:$0xff] %v8767_v63 }
  0x77   : > { %1244 = vmatprep.mubr.bf16.mxu1 %v8679_v22 }
  0x78   : > { %6080 = vmatpush3.bf16.msra.mxu0 %v8305_v36  ;;  %v11481_v36 = vld [vmem:[#allocation14_spill] sm:$0xff] }
  0x79   : > { %6102 = vmatpush3.bf16.msra.mxu1 %v8311_v37  ;;  %6081 = vmatprep.subr.bf16.mxu0 %v8317_v38  ;;  %v11482_v37 = vld [vmem:[#allocation15_spill] sm:$0xff]  ;;  %v11483_v38 = vld [vmem:[#allocation16_spill] sm:$0xff] }
  0x7a   : > { %6103 = vmatprep.subr.bf16.mxu1 %v8323_v39 }
  0x7c   : > { %6082 = vmatpush3.bf16.msra.mxu0 %v8329_v40 }
  0x7d   : > { %6104 = vmatpush3.bf16.msra.mxu1 %v8335_v41  ;;  %6083 = vmatprep.subr.bf16.mxu0 %v8341_v42 }
  0x7e   : > { %6105 = vmatprep.subr.bf16.mxu1 %v8347_v43 }
  0x80   : > { %6084 = vmatpush3.bf16.msra.mxu0 %v8353_v44 }
  0x81   : > { %6106 = vmatpush3.bf16.msra.mxu1 %v8359_v45  ;;  %6085 = vmatprep.subr.bf16.mxu0 %v8365_v46 }
  0x82   : > { %6107 = vmatprep.subr.bf16.mxu1 %v8371_v47 }
  0x84   : > { %6086 = vmatpush3.bf16.msra.mxu0 %v8377_v48 }
  0x85   : > { %6108 = vmatpush3.bf16.msra.mxu1 %v8383_v49  ;;  %6087 = vmatprep.subr.bf16.mxu0 %v8389_v50 }
  0x86   : > { %6109 = vmatprep.subr.bf16.mxu1 %v8395_v51 }
  0x88   : > { %6088 = vmatpush3.bf16.msra.mxu0 %v8401_v52 }
  0x89   : > { %6110 = vmatpush3.bf16.msra.mxu1 %v8410_v53  ;;  %6089 = vmatprep.subr.bf16.mxu0 %v8416_v54 }
  0x8a   : > { %6111 = vmatprep.subr.bf16.mxu1 %v8422_v55 }
  0x8c   : > { %6090 = vmatpush3.bf16.msra.mxu0 %v8429_v56 }
  0x8d   : > { %6112 = vmatpush3.bf16.msra.mxu1 %v8435_v57  ;;  %6091 = vmatprep.subr.bf16.mxu0 %v8441_v58 }
  0x8e   : > { %6113 = vmatprep.subr.bf16.mxu1 %v8447_v59 }
  0x90   : > { %6092 = vmatpush3.bf16.msra.mxu0 %v8453_v60 }
  0x91   : > { %6114 = vmatpush3.bf16.msra.mxu1 %v8459_v61  ;;  %6121 = vmatprep.subr.bf16.mxu0 %v8478_v4 }
  0x92   : > { %6143 = vmatprep.subr.bf16.mxu1 %v8483_v5 }
  0x93   : > { %1205 = vmatmul.mubr.bf16.vlgmr.msra.gmra.mrb[8].mxu0 %v8711_v30  ;;  %v11491_v30 = vld [vmem:[#allocation8_spill] sm:$0xff] }
  0x94   : > { %1245 = vmatmul.mubr.bf16.vlgmr.msra.gmra.mrb[8].mxu1 %v8713_v31  ;;  %6122 = vmatpush3.bf16.msra.mxu0 %v8490_v6  ;;  %v8769_v31 = vcombine.high %v5663_v26, %v5663_v26 }
  0x95   : > { %6144 = vmatpush3.bf16.msra.mxu1 %v8497_v7  ;;  %6123 = vmatprep.subr.bf16.mxu0 %v8504_v8 }
  0x96   : > { %6145 = vmatprep.subr.bf16.mxu1 %v8511_v9  ;;  %1298 = vmatprep.mubr.bf16.mxu0 %v8469_v1  ;;  %v11484_v1 = vld [vmem:[#allocation17_spill] sm:$0xff] }
  0x97   : > { %1338 = vmatprep.mubr.bf16.mxu1 %v8473_v3  ;;  %v11486_v3 = vld [vmem:[#allocation19_spill] sm:$0xff] }
  0x98   : > { %6124 = vmatpush3.bf16.msra.mxu0 %v8517_v10 }
  0x99   : > { %6146 = vmatpush3.bf16.msra.mxu1 %v8523_v11  ;;  %6125 = vmatprep.subr.bf16.mxu0 %v8528_v12 }
  0x9a   : > { %6147 = vmatprep.subr.bf16.mxu1 %v8535_v13 }
  0x9c   : > { %6126 = vmatpush3.bf16.msra.mxu0 %v8541_v14 }
  0x9d   : > { %6148 = vmatpush3.bf16.msra.mxu1 %v8547_v15  ;;  %6127 = vmatprep.subr.bf16.mxu0 %v8552_v16 }
  0x9e   : > { %6149 = vmatprep.subr.bf16.mxu1 %v8559_v17 }
  0xa0   : > { %6128 = vmatpush3.bf16.msra.mxu0 %v8565_v18 }
  0xa1   : > { %6150 = vmatpush3.bf16.msra.mxu1 %v8571_v19  ;;  %6129 = vmatprep.subr.bf16.mxu0 %v8576_v20 }
  0xa2   : > { %6151 = vmatprep.subr.bf16.mxu1 %v8583_v21 }
  0xa4   : > { %6130 = vmatpush3.bf16.msra.mxu0 %v11477_v32 }
  0xa5   : > { %6152 = vmatpush3.bf16.msra.mxu1 %v11478_v33  ;;  %6131 = vmatprep.subr.bf16.mxu0 %v11479_v34 }
  0xa6   : > { %6153 = vmatprep.subr.bf16.mxu1 %v11480_v35 }
  0xa8   : > { %6132 = vmatpush3.bf16.msra.mxu0 %v11481_v36 }
  0xa9   : > { %6154 = vmatpush3.bf16.msra.mxu1 %v11482_v37  ;;  %6133 = vmatprep.subr.bf16.mxu0 %v11483_v38 }
  0xaa   : > { %6155 = vmatprep.subr.bf16.mxu1 %v11484_v1 }
  0xac   : > { %6134 = vmatpush3.bf16.msra.mxu0 %v11485_v2 }
  0xad   : > { %6156 = vmatpush3.bf16.msra.mxu1 %v11486_v3  ;;  %6135 = vmatprep.subr.bf16.mxu0 %v11487_v23 }
  0xae   : > { %6157 = vmatprep.subr.bf16.mxu1 %v11488_v24 }
  0xb0   : > { %6136 = vmatpush3.bf16.msra.mxu0 %v8661_v29  ;;  %v8776_v29 = vld [vmem:[%s11284_s2] sm:$0xff]  }
  0xb1   : > { %6158 = vmatpush3.bf16.msra.mxu1 %v8667_v62  ;;  %6165 = vmatprep.subr.bf16.mxu0 %v8758_v27  ;;  %v11492_v62 = vld [vmem:[#allocation9_spill] sm:$0xff]  ;;  %v8782_v27 = vld [vmem:[%s11284_s2 + $0x80] sm:$0xff]  }
  0xb2   : > { %6187 = vmatprep.subr.bf16.mxu1 %v8764_v28  ;;  %11493 = vst [vmem:[#allocation12_spill] sm:$0xff] %v8782_v27 }
  0xb3   : > { %1299 = vmatmul.mubr.bf16.vlgmr.msra.gmra.mrb[12].mxu0 %v11491_v30  ;;  %v8788_v30 = vld [vmem:[%s11284_s2 + $0x48] sm:$0xff]  }
  0xb4   : > { %1339 = vmatmul.mubr.bf16.vlgmr.msra.gmra.mrb[12].mxu1 %v11492_v62  ;;  %6166 = vmatpush3.bf16.msra.mxu0 %v8776_v29  ;;  %11494 = vst [vmem:[#allocation13_spill] sm:$0xff] %v8788_v30  ;;  %v8794_v62 = vld [vmem:[%s11284_s2 + $0xc8] sm:$0xff]  }
  0xb5   : > { %6188 = vmatpush3.bf16.msra.mxu1 %v8782_v27  ;;  %6167 = vmatprep.subr.bf16.mxu0 %v8788_v30  ;;  %v8802_v27 = vld [vmem:[%s11284_s2 + $0x8] sm:$0xff]  }
  0xb6   : > { %6189 = vmatprep.subr.bf16.mxu1 %v8794_v62  ;;  %1401 = vmatprep.mubr.bf16.mxu0 %v8767_v63  ;;  %11495 = vst [vmem:[#allocation14_spill] sm:$0xff] %v8802_v27  ;;  %v8808_v30 = vld [vmem:[%s11284_s2 + $0x88] sm:$0xff]   ;;  %v8814_v63 = vld [vmem:[%s11284_s2 + $0x50] sm:$0xff]  }
  0xb7   : > { %1441 = vmatprep.mubr.bf16.mxu1 %v8769_v31  ;;  %11496 = vst [vmem:[#allocation15_spill] sm:$0xff] %v8808_v30  ;;  %11497 = vst [vmem:[#allocation16_spill] sm:$0xff] %v8814_v63 }
  0xb8   : > { %6168 = vmatpush3.bf16.msra.mxu0 %v8802_v27 }
  0xb9   : > { %6190 = vmatpush3.bf16.msra.mxu1 %v8808_v30  ;;  %6169 = vmatprep.subr.bf16.mxu0 %v8814_v63 }
  0xba   : > { %6191 = vmatprep.subr.bf16.mxu1 %v8323_v39  ;;  %v8838_v39 = vcombine.low %v5662_v25, %v5662_v25  ;;  %v8980_v25 = vld [vmem:[%s11284_s2 + $0x28] sm:$0xff]  }
  0xbc   : > { %6170 = vmatpush3.bf16.msra.mxu0 %v8329_v40  ;;  %v8840_v40 = vcombine.low %v5663_v26, %v5663_v26  ;;  %v8986_v26 = vld [vmem:[%s11284_s2 + $0xa8] sm:$0xff]  }
  0xbd   : > { %6192 = vmatpush3.bf16.msra.mxu1 %v8335_v41  ;;  %6171 = vmatprep.subr.bf16.mxu0 %v8341_v42  ;;  %v5674_v41 = vld [vmem:[%s8462_s21 + $0x40] sm:$0xff]  ;;  %v5675_v42 = vld [vmem:[%s8462_s21 + $0x48] sm:$0xff] }
  0xbe   : > { %6193 = vmatprep.subr.bf16.mxu1 %v8347_v43  ;;  %v11498_v43 = vld [vmem:[#allocation22_spill] sm:$0xff] }
  0xc0   : > { %6172 = vmatpush3.bf16.msra.mxu0 %v8353_v44  ;;  %v11499_v44 = vld [vmem:[#allocation23_spill] sm:$0xff] }
  0xc1   : > { %6194 = vmatpush3.bf16.msra.mxu1 %v8359_v45  ;;  %6173 = vmatprep.subr.bf16.mxu0 %v8365_v46  ;;  %v11500_v45 = vld [vmem:[#allocation10_spill] sm:$0xff]  ;;  %v8884_v46 = vcombine.high %v5674_v41, %v5674_v41 }
  0xc2   : > { %6195 = vmatprep.subr.bf16.mxu1 %v8371_v47  ;;  %v8886_v47 = vcombine.high %v5675_v42, %v5675_v42 }
  0xc3   : > { %11501 = vst [vmem:[#allocation17_spill] sm:$0xff] %v8884_v46 }
  0xc4   : > { %6174 = vmatpush3.bf16.msra.mxu0 %v8377_v48  ;;  %11502 = vst [vmem:[#allocation18_spill] sm:$0xff] %v8886_v47  ;;  %v11503_v48 = vld [vmem:[#allocation24_spill] sm:$0xff] }
  0xc5   : > { %6196 = vmatpush3.bf16.msra.mxu1 %v8383_v49  ;;  %6175 = vmatprep.subr.bf16.mxu0 %v8389_v50  ;;  %v11504_v49 = vld [vmem:[#allocation25_spill] sm:$0xff]  ;;  %v11505_v50 = vld [vmem:[#allocation12_spill] sm:$0xff] }
  0xc6   : > { %6197 = vmatprep.subr.bf16.mxu1 %v8395_v51  ;;  %v11506_v51 = vld [vmem:[#allocation13_spill] sm:$0xff] }
  0xc7   : > { %11518 = vst [vmem:[#allocation13_spill] sm:$0xff] %v8986_v26 }
  0xc8   : > { %6176 = vmatpush3.bf16.msra.mxu0 %v8401_v52  ;;  %v8902_v52 = vld [vmem:[%s11284_s2 + $0xd0] sm:$0xff]  }
  0xc9   : > { %6198 = vmatpush3.bf16.msra.mxu1 %v8410_v53  ;;  %6177 = vmatprep.subr.bf16.mxu0 %v8416_v54  ;;  %11507 = vst [vmem:[#allocation19_spill] sm:$0xff] %v8902_v52  ;;  %v8908_v53 = vld [vmem:[%s11284_s2 + $0x10] sm:$0xff]  }
  0xca   : > { %6199 = vmatprep.subr.bf16.mxu1 %v8422_v55  ;;  %11508 = vst [vmem:[#allocation20_spill] sm:$0xff] %v8908_v53  ;;  %v8914_v54 = vld [vmem:[%s11284_s2 + $0x90] sm:$0xff]   ;;  %v8920_v55 = vld [vmem:[%s11284_s2 + $0x58] sm:$0xff]  }
  0xcb   : > { %11509 = vst [vmem:[#allocation21_spill] sm:$0xff] %v8914_v54  ;;  %11510 = vst [vmem:[#allocation8_spill] sm:$0xff] %v8920_v55 }
  0xcc   : > { %6178 = vmatpush3.bf16.msra.mxu0 %v8429_v56  ;;  %v8926_v56 = vld [vmem:[%s11284_s2 + $0xd8] sm:$0xff]  }
  0xcd   : > { %6200 = vmatpush3.bf16.msra.mxu1 %v8435_v57  ;;  %6179 = vmatprep.subr.bf16.mxu0 %v8441_v58  ;;  %11511 = vst [vmem:[#allocation9_spill] sm:$0xff] %v8926_v56  ;;  %v8932_v57 = vld [vmem:[%s11284_s2 + $0x18] sm:$0xff]  }
  0xce   : > { %6201 = vmatprep.subr.bf16.mxu1 %v8447_v59  ;;  %11512 = vst [vmem:[#allocation22_spill] sm:$0xff] %v8932_v57  ;;  %v8938_v58 = vld [vmem:[%s11284_s2 + $0x98] sm:$0xff]   ;;  %v8944_v59 = vld [vmem:[%s11284_s2 + $0x60] sm:$0xff]  }
  0xcf   : > { %11513 = vst [vmem:[#allocation23_spill] sm:$0xff] %v8938_v58 }
  0xd0   : > { %6180 = vmatpush3.bf16.msra.mxu0 %v8453_v60  ;;  %v8950_v60 = vld [vmem:[%s11284_s2 + $0xe0] sm:$0xff]  }
  0xd1   : > { %6202 = vmatpush3.bf16.msra.mxu1 %v8459_v61  ;;  %6209 = vmatprep.subr.bf16.mxu0 %v8478_v4  ;;  %11514 = vst [vmem:[#allocation10_spill] sm:$0xff] %v8950_v60  ;;  %v8956_v61 = vld [vmem:[%s11284_s2 + $0x20] sm:$0xff]   ;;  %v8968_v4 = vld [vmem:[%s11284_s2 + $0x68] sm:$0xff]  }
  0xd2   : > { %6231 = vmatprep.subr.bf16.mxu1 %v8483_v5  ;;  %11515 = vst [vmem:[#allocation24_spill] sm:$0xff] %v8956_v61  ;;  %11516 = vst [vmem:[#allocation25_spill] sm:$0xff] %v8968_v4 }
  0xd3   : > { %1402 = vmatmul.mubr.bf16.vlgmr.msra.gmra.mrb[16].mxu0 %v8838_v39 }
  0xd4   : > { %1442 = vmatmul.mubr.bf16.vlgmr.msra.gmra.mrb[16].mxu1 %v8840_v40  ;;  %6210 = vmatpush3.bf16.msra.mxu0 %v8490_v6 }
  0xd5   : > { %6232 = vmatpush3.bf16.msra.mxu1 %v8497_v7  ;;  %6211 = vmatprep.subr.bf16.mxu0 %v8504_v8 }
  0xd6   : > { %6233 = vmatprep.subr.bf16.mxu1 %v8511_v9  ;;  %1495 = vmatprep.mubr.bf16.mxu0 %v8677_v0  ;;  %v8962_v0 = vld [vmem:[%s11284_s2 + $0xa0] sm:$0xff]  }
  0xd7   : > { %1535 = vmatprep.mubr.bf16.mxu1 %v8679_v22  ;;  %v8974_v22 = vld [vmem:[%s11284_s2 + $0xe8] sm:$0xff]  }
  0xd8   : > { %6212 = vmatpush3.bf16.msra.mxu0 %v8517_v10  ;;  %11517 = vst [vmem:[#allocation12_spill] sm:$0xff] %v8974_v22 }
  0xd9   : > { %6234 = vmatpush3.bf16.msra.mxu1 %v8523_v11  ;;  %6213 = vmatprep.subr.bf16.mxu0 %v8528_v12 }
  0xda   : > { %6235 = vmatprep.subr.bf16.mxu1 %v8535_v13 }
  0xdc   : > { %6214 = vmatpush3.bf16.msra.mxu0 %v8541_v14 }
  0xdd   : > { %6236 = vmatpush3.bf16.msra.mxu1 %v8547_v15  ;;  %6215 = vmatprep.subr.bf16.mxu0 %v8552_v16 }
  0xde   : > { %6237 = vmatprep.subr.bf16.mxu1 %v8559_v17 }
  0xe0   : > { %6216 = vmatpush3.bf16.msra.mxu0 %v8565_v18 }
  0xe1   : > { %6238 = vmatpush3.bf16.msra.mxu1 %v8571_v19  ;;  %6217 = vmatprep.subr.bf16.mxu0 %v8576_v20 }
  0xe2   : > { %6239 = vmatprep.subr.bf16.mxu1 %v8583_v21 }
  0xe4   : > { %6218 = vmatpush3.bf16.msra.mxu0 %v11477_v32 }
  0xe5   : > { %6240 = vmatpush3.bf16.msra.mxu1 %v11478_v33  ;;  %6219 = vmatprep.subr.bf16.mxu0 %v11479_v34 }
  0xe6   : > { %6241 = vmatprep.subr.bf16.mxu1 %v11480_v35 }
  0xe8   : > { %6220 = vmatpush3.bf16.msra.mxu0 %v11481_v36 }
  0xe9   : > { %6242 = vmatpush3.bf16.msra.mxu1 %v11482_v37  ;;  %6221 = vmatprep.subr.bf16.mxu0 %v11483_v38 }
  0xea   : > { %6243 = vmatprep.subr.bf16.mxu1 %v11484_v1 }
  0xec   : > { %6222 = vmatpush3.bf16.msra.mxu0 %v11485_v2 }
  0xed   : > { %6244 = vmatpush3.bf16.msra.mxu1 %v11486_v3  ;;  %6223 = vmatprep.subr.bf16.mxu0 %v11487_v23 }
  0xee   : > { %6245 = vmatprep.subr.bf16.mxu1 %v11488_v24 }
  0xf0   : > { %6224 = vmatpush3.bf16.msra.mxu0 %v11498_v43 }
  0xf1   : > { %6246 = vmatpush3.bf16.msra.mxu1 %v11499_v44  ;;  %6253 = vmatprep.subr.bf16.mxu0 %v11500_v45 }
  0xf2   : > { %6275 = vmatprep.subr.bf16.mxu1 %v8764_v28 }
  0xf3   : > { %1496 = vmatmul.mubr.bf16.vlgmr.msra.gmra.mrb[20].mxu0 %v11503_v48  ;;  %v8992_v48 = vld [vmem:[%s11284_s2 + $0x70] sm:$0xff]  }
  0xf4   : > { %1536 = vmatmul.mubr.bf16.vlgmr.msra.gmra.mrb[20].mxu1 %v11504_v49  ;;  %6254 = vmatpush3.bf16.msra.mxu0 %v8776_v29  ;;  %11519 = vst [vmem:[#allocation26_spill] sm:$0xff] %v8992_v48  ;;  %v8998_v49 = vld [vmem:[%s11284_s2 + $0xf0] sm:$0xff]  }
  0xf5   : > { %6276 = vmatpush3.bf16.msra.mxu1 %v11505_v50  ;;  %6255 = vmatprep.subr.bf16.mxu0 %v11506_v51  ;;  %11520 = vst [vmem:[#allocation27_spill] sm:$0xff] %v8998_v49 }
  0xf6   : > { %6277 = vmatprep.subr.bf16.mxu1 %v8794_v62  ;;  %1598 = vmatprep.mubr.bf16.mxu0 %v8884_v46  ;;  %v9010_v46 = vld [vmem:[%s11284_s2 + $0xb0] sm:$0xff]  }
  0xf7   : > { %1638 = vmatprep.mubr.bf16.mxu1 %v8886_v47  ;;  %v9004_v47 = vld [vmem:[%s11284_s2 + $0x30] sm:$0xff]   ;;  %11522 = vst [vmem:[#allocation29_spill] sm:$0xff] %v9010_v46 }
  0xf8   : > { %6256 = vmatpush3.bf16.msra.mxu0 %v8802_v27  ;;  %11521 = vst [vmem:[#allocation28_spill] sm:$0xff] %v9004_v47 }
  0xf9   : > { %6278 = vmatpush3.bf16.msra.mxu1 %v8808_v30  ;;  %6257 = vmatprep.subr.bf16.mxu0 %v8814_v63 }
  0xfa   : > { %6279 = vmatprep.subr.bf16.mxu1 %v8902_v52 }
  0xfc   : > { %6258 = vmatpush3.bf16.msra.mxu0 %v8908_v53 }
  0xfd   : > { %6280 = vmatpush3.bf16.msra.mxu1 %v8914_v54  ;;  %6259 = vmatprep.subr.bf16.mxu0 %v8920_v55 }
  0xfe   : > { %6281 = vmatprep.subr.bf16.mxu1 %v8926_v56 }
 0x100   : > { %6260 = vmatpush3.bf16.msra.mxu0 %v8932_v57 }
 0x101   : > { %6282 = vmatpush3.bf16.msra.mxu1 %v8938_v58  ;;  %6261 = vmatprep.subr.bf16.mxu0 %v8944_v59 }
 0x102   : > { %6283 = vmatprep.subr.bf16.mxu1 %v8950_v60 }
 0x104   : > { %6262 = vmatpush3.bf16.msra.mxu0 %v8956_v61 }
 0x105   : > { %6284 = vmatpush3.bf16.msra.mxu1 %v8962_v0  ;;  %6263 = vmatprep.subr.bf16.mxu0 %v8968_v4 }
 0x106   : > { %6285 = vmatprep.subr.bf16.mxu1 %v8974_v22 }
 0x108   : > { %6264 = vmatpush3.bf16.msra.mxu0 %v8980_v25 }
 0x109   : > { %6286 = vmatpush3.bf16.msra.mxu1 %v8986_v26  ;;  %6265 = vmatprep.subr.bf16.mxu0 %v8992_v48  ;;  %v9016_v48 = vld [vmem:[%s11284_s2 + $0x78] sm:$0xff]   ;;  %v9027_v26 = vcombine.low %v5675_v42, %v5675_v42 }
 0x10a   : > { %6287 = vmatprep.subr.bf16.mxu1 %v8998_v49  ;;  %11523 = vst [vmem:[#allocation30_spill] sm:$0xff] %v9016_v48  ;;  %v9022_v49 = vld [vmem:[%s11284_s2 + $0xf8] sm:$0xff]  }
 0x10b   : > { %v11524_v42 = vld [vmem:[#allocation11_spill] sm:$0xff] }
 0x10c   : > { %6266 = vmatpush3.bf16.msra.mxu0 %v9004_v47  ;;  %v9025_v47 = vcombine.low %v5674_v41, %v5674_v41  ;;  %v9044_v41 = vld [vmem:[%s11283_s1 + $0x40] sm:$0xff]  }
 0x10d   : > { %6288 = vmatpush3.bf16.msra.mxu1 %v9010_v46  ;;  %6267 = vmatprep.subr.bf16.mxu0 %v9016_v48  ;;  %v9032_v46 = vld [vmem:[%s11284_s2 + $0x38] sm:$0xff]  }
 0x10e   : > { %6289 = vmatprep.subr.bf16.mxu1 %v9022_v49  ;;  %v9038_v48 = vld [vmem:[%s11284_s2 + $0xb8] sm:$0xff]  }
 0x110   : > { %6268 = vmatpush3.bf16.msra.mxu0 %v9032_v46 }
 0x111   : > { %6290 = vmatpush3.bf16.msra.mxu1 %v9038_v48  ;;  %6297 = vmatprep.subr.bf16.mxu0 %v9044_v41 }
 0x112   : > { %6319 = vmatprep.subr.bf16.mxu1 %v8483_v5 }
 0x113   : > { %1599 = vmatmul.mubr.bf16.vlgmr.msra.gmra.mrb[24].mxu0 %v9025_v47 }
 0x114   : > { %1639 = vmatmul.mubr.bf16.vlgmr.msra.gmra.mrb[24].mxu1 %v9027_v26  ;;  %6298 = vmatpush3.bf16.msra.mxu0 %v8490_v6 }
 0x115   : > { %6320 = vmatpush3.bf16.msra.mxu1 %v8497_v7  ;;  %6299 = vmatprep.subr.bf16.mxu0 %v8504_v8 }
 0x116   : > { %6321 = vmatprep.subr.bf16.mxu1 %v8511_v9  ;;  %1692 = vmatprep.mubr.bf16.mxu0 %v11524_v42 }
 0x117   : > { %1732 = vmatprep.mubr.bf16.mxu1 %v8769_v31 }
 0x118   : > { %6300 = vmatpush3.bf16.msra.mxu0 %v8517_v10 }
 0x119   : > { %6322 = vmatpush3.bf16.msra.mxu1 %v8523_v11  ;;  %6301 = vmatprep.subr.bf16.mxu0 %v8528_v12 }
 0x11a   : > { %6323 = vmatprep.subr.bf16.mxu1 %v8535_v13 }
 0x11c   : > { %6302 = vmatpush3.bf16.msra.mxu0 %v8541_v14 }
 0x11d   : > { %6324 = vmatpush3.bf16.msra.mxu1 %v8547_v15  ;;  %6303 = vmatprep.subr.bf16.mxu0 %v8552_v16  ;;  %v5686_v16 = vld [vmem:[%s8462_s21 + $0x50] sm:$0xff] }
 0x11e   : > { %6325 = vmatprep.subr.bf16.mxu1 %v8559_v17  ;;  %v5687_v17 = vld [vmem:[%s8462_s21 + $0x58] sm:$0xff] }
 0x120   : > { %6304 = vmatpush3.bf16.msra.mxu0 %v8565_v18  ;;  %v9086_v18 = vcombine.high %v5686_v16, %v5686_v16 }
 0x121   : > { %6326 = vmatpush3.bf16.msra.mxu1 %v8571_v19  ;;  %6305 = vmatprep.subr.bf16.mxu0 %v8576_v20  ;;  %v9088_v19 = vcombine.high %v5687_v17, %v5687_v17 }
 0x122   : > { %6327 = vmatprep.subr.bf16.mxu1 %v8583_v21 }
 0x124   : > { %6306 = vmatpush3.bf16.msra.mxu0 %v11477_v32 }
 0x125   : > { %6328 = vmatpush3.bf16.msra.mxu1 %v11478_v33  ;;  %6307 = vmatprep.subr.bf16.mxu0 %v11479_v34 }
 0x126   : > { %v6005_v5 = vpop.f32.mrb[0].mxu0  ;;  %6329 = vmatprep.subr.bf16.mxu1 %v11480_v35 }
 0x127   : > { %v6027_v6 = vpop.f32.mrb[0].mxu1  ;;  %v6006_v7 = vpop.f32.mrb[1].mxu0 }
 0x128   : > { %v6028_v8 = vpop.f32.mrb[1].mxu1  ;;  %v6007_v9 = vadd.f32 %v6006_v7, %v6005_v5  ;;  %v6008_v11 = vpop.f32.mrb[2].mxu0  ;;  %6308 = vmatpush3.bf16.msra.mxu0 %v11481_v36  ;;  %v9128_v5 = vcombine.low %v5686_v16, %v5686_v16  ;;  %v9172_v16 = vld [vmem:[%s11283_s1 + $0x8] sm:$0xff]  }
 0x129   : > { %v6029_v10 = vadd.f32 %v6028_v8, %v6027_v6  ;;  %v6030_v12 = vpop.f32.mrb[2].mxu1  ;;  %6330 = vmatpush3.bf16.msra.mxu1 %v11482_v37  ;;  %v6009_v13 = vpop.f32.mrb[3].mxu0  ;;  %6309 = vmatprep.subr.bf16.mxu0 %v11483_v38  ;;  %v11525_v37 = vld [vmem:[#allocation13_spill] sm:$0xff]  ;;  %v9130_v6 = vcombine.low %v5687_v17, %v5687_v17  ;;  %v9138_v8 = vld [vmem:[%s11283_s1 + $0xc0] sm:$0xff]  }
 0x12a   : > { %v6031_v14 = vpop.f32.mrb[3].mxu1  ;;  %6331 = vmatprep.subr.bf16.mxu1 %v11484_v1  ;;  %11531 = vst [vmem:[#allocation11_spill] sm:$0xff] %v9128_v5  ;;  %v9152_v11 = vld [vmem:[%s11283_s1 + $0x80] sm:$0xff]   ;;  %v9158_v12 = vld [vmem:[%s11283_s1 + $0x48] sm:$0xff]  }
 0x12b   : > { %v852_v15 = vadd.f32 %v6029_v10, %v6007_v9  ;;  %11532 = vst [vmem:[#allocation13_spill] sm:$0xff] %v9130_v6  ;;  %v9146_v10 = vld [vmem:[%s11283_s1] sm:$0xff]   ;;  %v9164_v13 = vld [vmem:[%s11283_s1 + $0xc8] sm:$0xff]  }
 0x12c   : > { %6310 = vmatpush3.bf16.msra.mxu0 %v11485_v2  ;;  %v11526_v2 = vld [vmem:[#allocation26_spill] sm:$0xff]  ;;  %v11533_v14 = vld [vmem:[#allocation17_spill] sm:$0xff] }
 0x12d   : > { %6332 = vmatpush3.bf16.msra.mxu1 %v11486_v3  ;;  %6311 = vmatprep.subr.bf16.mxu0 %v11487_v23  ;;  %v11527_v3 = vld [vmem:[#allocation27_spill] sm:$0xff]  ;;  %v9178_v17 = vld [vmem:[%s11283_s1 + $0x88] sm:$0xff]  }
 0x12e   : > { %6333 = vmatprep.subr.bf16.mxu1 %v11488_v24  ;;  %v9121_v24 = vld [vmem:[%s11285_s3] ss:$0 sm:$0xff] }
 0x130   : > { %6312 = vmatpush3.bf16.msra.mxu0 %v11498_v43  ;;  %v11529_v43 = vld [vmem:[#allocation29_spill] sm:$0xff] }
 0x131   : > { %6334 = vmatpush3.bf16.msra.mxu1 %v11499_v44  ;;  %6341 = vmatprep.subr.bf16.mxu0 %v11500_v45  ;;  %v11530_v44 = vld [vmem:[#allocation30_spill] sm:$0xff] }
 0x132   : > { %6363 = vmatprep.subr.bf16.mxu1 %v8764_v28 }
 0x133   : > { %1693 = vmatmul.mubr.bf16.vlgmr.msra.gmra.mrb[28].mxu0 %v8838_v39 }
 0x134   : > { %1733 = vmatmul.mubr.bf16.vlgmr.msra.gmra.mrb[28].mxu1 %v8840_v40  ;;  %6342 = vmatpush3.bf16.msra.mxu0 %v8776_v29  ;;  %v11528_v40 = vld [vmem:[#allocation28_spill] sm:$0xff] }
 0x135   : > { %6364 = vmatpush3.bf16.msra.mxu1 %v11505_v50  ;;  %6343 = vmatprep.subr.bf16.mxu0 %v11506_v51 }
 0x136   : > { %6365 = vmatprep.subr.bf16.mxu1 %v8794_v62  ;;  %1795 = vmatprep.mubr.bf16.mxu0 %v9086_v18 }
 0x137   : > { %1835 = vmatprep.mubr.bf16.mxu1 %v9088_v19 }
 0x138   : > { %6344 = vmatpush3.bf16.msra.mxu0 %v8802_v27 }
 0x139   : > { %6366 = vmatpush3.bf16.msra.mxu1 %v8808_v30  ;;  %6345 = vmatprep.subr.bf16.mxu0 %v8814_v63 }
 0x13a   : > { %6367 = vmatprep.subr.bf16.mxu1 %v8902_v52 }
 0x13c   : > { %6346 = vmatpush3.bf16.msra.mxu0 %v8908_v53 }
 0x13d   : > { %6368 = vmatpush3.bf16.msra.mxu1 %v8914_v54  ;;  %6347 = vmatprep.subr.bf16.mxu0 %v8920_v55 }
 0x13e   : > { %6369 = vmatprep.subr.bf16.mxu1 %v8926_v56 }
 0x140   : > { %6348 = vmatpush3.bf16.msra.mxu0 %v8932_v57 }
 0x141   : > { %6370 = vmatpush3.bf16.msra.mxu1 %v8938_v58  ;;  %6349 = vmatprep.subr.bf16.mxu0 %v8944_v59 }
 0x142   : > { %6371 = vmatprep.subr.bf16.mxu1 %v8950_v60 }
 0x144   : > { %6350 = vmatpush3.bf16.msra.mxu0 %v8956_v61 }
 0x145   : > { %6372 = vmatpush3.bf16.msra.mxu1 %v8962_v0  ;;  %6351 = vmatprep.subr.bf16.mxu0 %v8968_v4 }
 0x146   : > { %6373 = vmatprep.subr.bf16.mxu1 %v8974_v22  ;;  %v6049_v20 = vpop.f32.mrb[4].mxu0 }
 0x147   : > { %v6071_v21 = vpop.f32.mrb[4].mxu1  ;;  %v6050_v31 = vpop.f32.mrb[5].mxu0 }
 0x148   : > { %v6072_v32 = vpop.f32.mrb[5].mxu1  ;;  %v6051_v33 = vadd.f32 %v6050_v31, %v6049_v20  ;;  %v6052_v35 = vpop.f32.mrb[6].mxu0  ;;  %6352 = vmatpush3.bf16.msra.mxu0 %v8980_v25  ;;  %v9184_v20 = vld [vmem:[%s11283_s1 + $0x50] sm:$0xff]  }
 0x149   : > { %v6073_v34 = vadd.f32 %v6072_v32, %v6071_v21  ;;  %v6074_v36 = vpop.f32.mrb[6].mxu1  ;;  %6374 = vmatpush3.bf16.msra.mxu1 %v11525_v37  ;;  %v6053_v38 = vpop.f32.mrb[7].mxu0  ;;  %6353 = vmatprep.subr.bf16.mxu0 %v11526_v2  ;;  %v9190_v21 = vld [vmem:[%s11283_s1 + $0xd0] sm:$0xff]   ;;  %v9220_v35 = vld [vmem:[%s11283_s1 + $0x18] sm:$0xff]  }
 0x14a   : > { %v6075_v1 = vpop.f32.mrb[7].mxu1  ;;  %6375 = vmatprep.subr.bf16.mxu1 %v11527_v3  ;;  %v1098_v23 = vadd.f32 %v6051_v33, %v852_v15  ;;  %v11534_v15 = vld [vmem:[#allocation18_spill] sm:$0xff]  ;;  %v9232_v38 = vld [vmem:[%s11283_s1 + $0x60] sm:$0xff]  }
 0x14b   : > { %v9196_v31 = vld [vmem:[%s11283_s1 + $0x10] sm:$0xff]   ;;  %v9208_v33 = vld [vmem:[%s11283_s1 + $0x58] sm:$0xff]   ;;  %11535 = vst [vmem:[#allocation26_spill] sm:$0xff] %v9232_v38  ;;  %v9238_v1 = vld [vmem:[%s11283_s1 + $0xe0] sm:$0xff]  }
 0x14c   : > { %v1138_v39 = vadd.f32 %v6073_v34, %v1098_v23  ;;  %6354 = vmatpush3.bf16.msra.mxu0 %v11528_v40  ;;  %v9202_v32 = vld [vmem:[%s11283_s1 + $0x90] sm:$0xff]   ;;  %v9214_v34 = vld [vmem:[%s11283_s1 + $0xd8] sm:$0xff]   ;;  %11536 = vst [vmem:[#allocation27_spill] sm:$0xff] %v9238_v1  ;;  %v9244_v23 = vld [vmem:[%s11283_s1 + $0x20] sm:$0xff]  }
 0x14d   : > { %6376 = vmatpush3.bf16.msra.mxu1 %v11529_v43  ;;  %6355 = vmatprep.subr.bf16.mxu0 %v11530_v44  ;;  %v9226_v36 = vld [vmem:[%s11283_s1 + $0x98] sm:$0xff]   ;;  %11537 = vst [vmem:[#allocation28_spill] sm:$0xff] %v9244_v23 }
 0x14e   : > { %6377 = vmatprep.subr.bf16.mxu1 %v9022_v49  ;;  %v1149_v42 = vadd.f32 %v9121_v24, %v1138_v39  ;;  %v9250_v39 = vld [vmem:[%s11283_s1 + $0xa0] sm:$0xff]  }
 0x14f   : > { %11538 = vst [vmem:[#allocation29_spill] sm:$0xff] %v9250_v39 }
 0x150   : > { %v1150_v7 = vmax.f32 %v1149_v42, 0.0  ;;  %6356 = vmatpush3.bf16.msra.mxu0 %v9032_v46  ;;  %v9256_v42 = vld [vmem:[%s11283_s1 + $0x68] sm:$0xff]  }
 0x151   : > { %6378 = vmatpush3.bf16.msra.mxu1 %v9038_v48  ;;  %6385 = vmatprep.subr.bf16.mxu0 %v9044_v41  ;;  %11539 = vst [vmem:[#allocation30_spill] sm:$0xff] %v9256_v42 }
 0x152   : > { %6407 = vmatprep.subr.bf16.mxu1 %v9138_v8  ;;  %v1151_v9 = vpack.c.bf16 %v1150_v7, %v1150_v7  ;;  %v9262_v7 = vld [vmem:[%s11283_s1 + $0xe8] sm:$0xff]  }
 0x153   : > { %1796 = vmatmul.mubr.bf16.vlgmr.msra.gmra.mrb[32].mxu0 %v9128_v5  ;;  %11540 = vst [vmem:[#allocation17_spill] sm:$0xff] %v9262_v7 }
 0x154   : > { %1836 = vmatmul.mubr.bf16.vlgmr.msra.gmra.mrb[32].mxu1 %v9130_v6  ;;  %1152 = vst [vmem:[#allocation2] sm:$0xf] %v1151_v9  ;;  %6386 = vmatpush3.bf16.msra.mxu0 %v9146_v10 }
 0x155   : > { %6408 = vmatpush3.bf16.msra.mxu1 %v9152_v11  ;;  %6387 = vmatprep.subr.bf16.mxu0 %v9158_v12 }
 0x156   : > { %6409 = vmatprep.subr.bf16.mxu1 %v9164_v13  ;;  %1889 = vmatprep.mubr.bf16.mxu0 %v11533_v14 }
 0x157   : > { %1929 = vmatprep.mubr.bf16.mxu1 %v11534_v15 }
 0x158   : > { %6388 = vmatpush3.bf16.msra.mxu0 %v9172_v16 }
 0x159   : > { %6410 = vmatpush3.bf16.msra.mxu1 %v9178_v17  ;;  %6389 = vmatprep.subr.bf16.mxu0 %v9184_v20 }
 0x15a   : > { %6411 = vmatprep.subr.bf16.mxu1 %v9190_v21 }
 0x15c   : > { %6390 = vmatpush3.bf16.msra.mxu0 %v9196_v31 }
 0x15d   : > { %6412 = vmatpush3.bf16.msra.mxu1 %v9202_v32  ;;  %6391 = vmatprep.subr.bf16.mxu0 %v9208_v33 }
 0x15e   : > { %6413 = vmatprep.subr.bf16.mxu1 %v9214_v34 }
 0x160   : > { %6392 = vmatpush3.bf16.msra.mxu0 %v9220_v35 }
 0x161   : > { %6414 = vmatpush3.bf16.msra.mxu1 %v9226_v36  ;;  %6393 = vmatprep.subr.bf16.mxu0 %v9232_v38  ;;  %v9268_v38 = vld [vmem:[%s11283_s1 + $0x28] sm:$0xff]  }
 0x162   : > { %6415 = vmatprep.subr.bf16.mxu1 %v9238_v1 }
 0x164   : > { %6394 = vmatpush3.bf16.msra.mxu0 %v9244_v23 }
 0x165   : > { %6416 = vmatpush3.bf16.msra.mxu1 %v9250_v39  ;;  %6395 = vmatprep.subr.bf16.mxu0 %v9256_v42  ;;  %v9274_v42 = vld [vmem:[%s11283_s1 + $0xa8] sm:$0xff]  }
 0x166   : > { %6417 = vmatprep.subr.bf16.mxu1 %v9262_v7  ;;  %v6093_v9 = vpop.f32.mrb[8].mxu0 }
 0x167   : > { %v6115_v14 = vpop.f32.mrb[8].mxu1  ;;  %v6094_v15 = vpop.f32.mrb[9].mxu0 }
 0x168   : > { %v6116_v6 = vpop.f32.mrb[9].mxu1  ;;  %v6095_v5 = vadd.f32 %v6094_v15, %v6093_v9  ;;  %v6096_v23 = vpop.f32.mrb[10].mxu0  ;;  %6396 = vmatpush3.bf16.msra.mxu0 %v9268_v38  ;;  %v9304_v15 = vld [vmem:[%s11283_s1 + $0x78] sm:$0xff]  }
 0x169   : > { %v6117_v39 = vadd.f32 %v6116_v6, %v6115_v14  ;;  %v6118_v1 = vpop.f32.mrb[10].mxu1  ;;  %6418 = vmatpush3.bf16.msra.mxu1 %v9274_v42  ;;  %v6097_v7 = vpop.f32.mrb[11].mxu0  ;;  %v9286_v23 = vld [vmem:[%s11283_s1 + $0xf0] sm:$0xff]   ;;  %11543 = vst [vmem:[#allocation32_spill] sm:$0xff] %v9304_v15 }
 0x16a   : > { %v6119_v6 = vpop.f32.mrb[11].mxu1  ;;  %v9280_v1 = vld [vmem:[%s11283_s1 + $0x70] sm:$0xff]   ;;  %6419 = vmatprep.subr.bf16.mxu1 %v9286_v23 }
 0x16b   : > { %6397 = vmatprep.subr.bf16.mxu0 %v9280_v1  ;;  %v1247_v9 = vadd.f32 %v6117_v39, %v6095_v5  ;;  %v9292_v7 = vld [vmem:[%s11283_s1 + $0x30] sm:$0xff]   ;;  %v9310_v5 = vld [vmem:[%s11283_s1 + $0xf8] sm:$0xff]  }
 0x16c   : > { %11541 = vst [vmem:[#allocation18_spill] sm:$0xff] %v9292_v7  ;;  %6398 = vmatpush3.bf16.msra.mxu0 %v9292_v7  ;;  %v9298_v14 = vld [vmem:[%s11283_s1 + $0xb0] sm:$0xff]   ;;  %11544 = vst [vmem:[#allocation33_spill] sm:$0xff] %v9310_v5 }
 0x16d   : > { %11542 = vst [vmem:[#allocation31_spill] sm:$0xff] %v9298_v14  ;;  %6420 = vmatpush3.bf16.msra.mxu1 %v9298_v14  ;;  %6399 = vmatprep.subr.bf16.mxu0 %v9304_v15  ;;  %v5698_v39 = vld [vmem:[%s8462_s21 + $0x60] sm:$0xff]  ;;  %v5699_v6 = vld [vmem:[%s8462_s21 + $0x68] sm:$0xff] }
 0x16e   : > { %6421 = vmatprep.subr.bf16.mxu1 %v9310_v5  ;;  %v9318_v14 = vld [vmem:[%s11283_s1 + $0x38] sm:$0xff]   ;;  %v9329_v5 = vcombine.high %v5698_v39, %v5698_v39  ;;  %v9331_v7 = vcombine.high %v5699_v6, %v5699_v6 }
 0x16f   : > { %v9324_v15 = vld [vmem:[%s11283_s1 + $0xb8] sm:$0xff]  }
 0x170   : > { %6400 = vmatpush3.bf16.msra.mxu0 %v9318_v14  ;;  %11545 = vst [vmem:[#allocation34_spill] sm:$0xff] %v9329_v5  ;;  %11546 = vst [vmem:[#allocation35_spill] sm:$0xff] %v9331_v7 }
 0x171   : > { %6422 = vmatpush3.bf16.msra.mxu1 %v9324_v15  ;;  %6429 = vmatprep.subr.bf16.mxu0 %v11500_v45 }
 0x172   : > { %6451 = vmatprep.subr.bf16.mxu1 %v8764_v28 }
 0x173   : > { %1890 = vmatmul.mubr.bf16.vlgmr.msra.gmra.mrb[36].mxu0 %v9025_v47 }
 0x174   : > { %1930 = vmatmul.mubr.bf16.vlgmr.msra.gmra.mrb[36].mxu1 %v9027_v26  ;;  %6430 = vmatpush3.bf16.msra.mxu0 %v8776_v29 }
 0x175   : > { %6452 = vmatpush3.bf16.msra.mxu1 %v11505_v50  ;;  %6431 = vmatprep.subr.bf16.mxu0 %v11506_v51 }
 0x176   : > { %6453 = vmatprep.subr.bf16.mxu1 %v8794_v62  ;;  %1992 = vmatprep.mubr.bf16.mxu0 %v9329_v5 }
 0x177   : > { %2032 = vmatprep.mubr.bf16.mxu1 %v9331_v7 }
 0x178   : > { %6432 = vmatpush3.bf16.msra.mxu0 %v8802_v27 }
 0x179   : > { %6454 = vmatpush3.bf16.msra.mxu1 %v8808_v30  ;;  %6433 = vmatprep.subr.bf16.mxu0 %v8814_v63 }
 0x17a   : > { %6455 = vmatprep.subr.bf16.mxu1 %v8902_v52 }
 0x17c   : > { %6434 = vmatpush3.bf16.msra.mxu0 %v8908_v53 }
 0x17d   : > { %6456 = vmatpush3.bf16.msra.mxu1 %v8914_v54  ;;  %6435 = vmatprep.subr.bf16.mxu0 %v8920_v55 }
 0x17e   : > { %6457 = vmatprep.subr.bf16.mxu1 %v8926_v56 }
 0x180   : > { %6436 = vmatpush3.bf16.msra.mxu0 %v8932_v57 }
 0x181   : > { %6458 = vmatpush3.bf16.msra.mxu1 %v8938_v58  ;;  %6437 = vmatprep.subr.bf16.mxu0 %v8944_v59 }
 0x182   : > { %6459 = vmatprep.subr.bf16.mxu1 %v8950_v60 }
 0x184   : > { %6438 = vmatpush3.bf16.msra.mxu0 %v8956_v61 }
 0x185   : > { %6460 = vmatpush3.bf16.msra.mxu1 %v8962_v0  ;;  %6439 = vmatprep.subr.bf16.mxu0 %v8968_v4 }
 0x186   : > { %6461 = vmatprep.subr.bf16.mxu1 %v8974_v22  ;;  %v6137_v47 = vpop.f32.mrb[12].mxu0 }
 0x187   : > { %v6159_v26 = vpop.f32.mrb[12].mxu1  ;;  %v6138_v7 = vpop.f32.mrb[13].mxu0 }
 0x188   : > { %v6160_v5 = vpop.f32.mrb[13].mxu1  ;;  %v6139_v56 = vadd.f32 %v6138_v7, %v6137_v47  ;;  %v6140_v55 = vpop.f32.mrb[14].mxu0  ;;  %6440 = vmatpush3.bf16.msra.mxu0 %v8980_v25 }
 0x189   : > { %v6161_v57 = vadd.f32 %v6160_v5, %v6159_v26  ;;  %v6162_v58 = vpop.f32.mrb[14].mxu1  ;;  %6462 = vmatpush3.bf16.msra.mxu1 %v11525_v37  ;;  %v6141_v60 = vpop.f32.mrb[15].mxu0  ;;  %6441 = vmatprep.subr.bf16.mxu0 %v11526_v2 }
 0x18a   : > { %v6163_v61 = vpop.f32.mrb[15].mxu1  ;;  %6463 = vmatprep.subr.bf16.mxu1 %v11527_v3  ;;  %v1301_v4 = vadd.f32 %v6139_v56, %v1247_v9  ;;  %v9366_v58 = vcombine.low %v5698_v39, %v5698_v39  ;;  %v9368_v60 = vcombine.low %v5699_v6, %v5699_v6  ;;  %v11554_v9 = vld [vmem:[#allocation17_spill] sm:$0xff] }
 0x18c   : > { %v1341_v22 = vadd.f32 %v6161_v57, %v1301_v4  ;;  %6442 = vmatpush3.bf16.msra.mxu0 %v11528_v40  ;;  %11547 = vst [vmem:[#allocation36_spill] sm:$0xff] %v9366_v58  ;;  %11548 = vst [vmem:[#allocation37_spill] sm:$0xff] %v9368_v60  ;;  %v11549_v57 = vld [vmem:[#allocation26_spill] sm:$0xff]  ;;  %v11550_v4 = vld [vmem:[#allocation27_spill] sm:$0xff] }
 0x18d   : > { %6464 = vmatpush3.bf16.msra.mxu1 %v11529_v43  ;;  %6443 = vmatprep.subr.bf16.mxu0 %v11530_v44 }
 0x18e   : > { %6465 = vmatprep.subr.bf16.mxu1 %v9022_v49  ;;  %v1346_v55 = vadd.f32 %v9121_v24, %v1341_v22  ;;  %v11551_v22 = vld [vmem:[#allocation28_spill] sm:$0xff] }
 0x190   : > { %v1347_v61 = vmax.f32 %v1346_v55, 0.0  ;;  %6444 = vmatpush3.bf16.msra.mxu0 %v9032_v46 }
 0x191   : > { %6466 = vmatpush3.bf16.msra.mxu1 %v9038_v48  ;;  %6473 = vmatprep.subr.bf16.mxu0 %v9044_v41 }
 0x192   : > { %6495 = vmatprep.subr.bf16.mxu1 %v9138_v8  ;;  %v1348_v56 = vpack.c.bf16 %v1347_v61, %v1347_v61 }
 0x193   : > { %1993 = vmatmul.mubr.bf16.vlgmr.msra.gmra.mrb[40].mxu0 %v9366_v58 }
 0x194   : > { %2033 = vmatmul.mubr.bf16.vlgmr.msra.gmra.mrb[40].mxu1 %v9368_v60  ;;  %1349 = vst [vmem:[#allocation2 + $0x4] sm:$0xf] %v1348_v56  ;;  %6474 = vmatpush3.bf16.msra.mxu0 %v9146_v10 }
 0x195   : > { %6496 = vmatpush3.bf16.msra.mxu1 %v9152_v11  ;;  %6475 = vmatprep.subr.bf16.mxu0 %v9158_v12 }
 0x196   : > { %6497 = vmatprep.subr.bf16.mxu1 %v9164_v13  ;;  %2086 = vmatprep.mubr.bf16.mxu0 %v9086_v18  ;;  %v11552_v18 = vld [vmem:[#allocation29_spill] sm:$0xff] }
 0x197   : > { %2126 = vmatprep.mubr.bf16.mxu1 %v9088_v19  ;;  %v11553_v19 = vld [vmem:[#allocation30_spill] sm:$0xff] }
 0x198   : > { %6476 = vmatpush3.bf16.msra.mxu0 %v9172_v16 }
 0x199   : > { %6498 = vmatpush3.bf16.msra.mxu1 %v9178_v17  ;;  %6477 = vmatprep.subr.bf16.mxu0 %v9184_v20 }
 0x19a   : > { %6499 = vmatprep.subr.bf16.mxu1 %v9190_v21 }
 0x19c   : > { %6478 = vmatpush3.bf16.msra.mxu0 %v9196_v31 }
 0x19d   : > { %6500 = vmatpush3.bf16.msra.mxu1 %v9202_v32  ;;  %6479 = vmatprep.subr.bf16.mxu0 %v9208_v33 }
 0x19e   : > { %6501 = vmatprep.subr.bf16.mxu1 %v9214_v34 }
 0x1a0   : > { %6480 = vmatpush3.bf16.msra.mxu0 %v9220_v35 }
 0x1a1   : > { %6502 = vmatpush3.bf16.msra.mxu1 %v9226_v36  ;;  %6481 = vmatprep.subr.bf16.mxu0 %v11549_v57 }
 0x1a2   : > { %6503 = vmatprep.subr.bf16.mxu1 %v11550_v4 }
 0x1a4   : > { %6482 = vmatpush3.bf16.msra.mxu0 %v11551_v22 }
 0x1a5   : > { %6504 = vmatpush3.bf16.msra.mxu1 %v11552_v18  ;;  %6483 = vmatprep.subr.bf16.mxu0 %v11553_v19  ;;  %v11556_v19 = vld [vmem:[#allocation31_spill] sm:$0xff] }
 0x1a6   : > { %6505 = vmatprep.subr.bf16.mxu1 %v11554_v9  ;;  %v6181_v7 = vpop.f32.mrb[16].mxu0  ;;  %v11555_v9 = vld [vmem:[#allocation18_spill] sm:$0xff] }
 0x1a7   : > { %v6203_v5 = vpop.f32.mrb[16].mxu1  ;;  %v6182_v39 = vpop.f32.mrb[17].mxu0 }
 0x1a8   : > { %v6204_v6 = vpop.f32.mrb[17].mxu1  ;;  %v6183_v47 = vadd.f32 %v6182_v39, %v6181_v7  ;;  %v6184_v55 = vpop.f32.mrb[18].mxu0  ;;  %6484 = vmatpush3.bf16.msra.mxu0 %v9268_v38  ;;  %v11557_v7 = vld [vmem:[#allocation32_spill] sm:$0xff] }
 0x1a9   : > { %v6205_v26 = vadd.f32 %v6204_v6, %v6203_v5  ;;  %v6206_v61 = vpop.f32.mrb[18].mxu1  ;;  %6506 = vmatpush3.bf16.msra.mxu1 %v9274_v42  ;;  %v6185_v56 = vpop.f32.mrb[19].mxu0  ;;  %6485 = vmatprep.subr.bf16.mxu0 %v9280_v1  ;;  %v11558_v5 = vld [vmem:[#allocation33_spill] sm:$0xff]  ;;  %v5710_v39 = vld [vmem:[%s8462_s21 + $0x70] sm:$0xff] }
 0x1aa   : > { %v6207_v60 = vpop.f32.mrb[19].mxu1  ;;  %6507 = vmatprep.subr.bf16.mxu1 %v9286_v23  ;;  %v5711_v6 = vld [vmem:[%s8462_s21 + $0x78] sm:$0xff]  ;;  %v11563_v61 = vld [vmem:[#allocation8_spill] sm:$0xff] }
 0x1ab   : > { %v1444_v58 = vadd.f32 %v6205_v26, %v6183_v47  ;;  %v9412_v60 = vcombine.high %v5710_v39, %v5710_v39  ;;  %v9414_v47 = vcombine.high %v5711_v6, %v5711_v6  ;;  %v11561_v26 = vld [vmem:[#allocation11_spill] sm:$0xff]  ;;  %v11562_v55 = vld [vmem:[#allocation13_spill] sm:$0xff] }
 0x1ac   : > { %6486 = vmatpush3.bf16.msra.mxu0 %v11555_v9  ;;  %v11564_v56 = vld [vmem:[#allocation9_spill] sm:$0xff] }
 0x1ad   : > { %6508 = vmatpush3.bf16.msra.mxu1 %v11556_v19  ;;  %6487 = vmatprep.subr.bf16.mxu0 %v11557_v7  ;;  %11559 = vst [vmem:[#allocation26_spill] sm:$0xff] %v9412_v60  ;;  %11560 = vst [vmem:[#allocation27_spill] sm:$0xff] %v9414_v47 }
 0x1ae   : > { %6509 = vmatprep.subr.bf16.mxu1 %v11558_v5 }
 0x1b0   : > { %6488 = vmatpush3.bf16.msra.mxu0 %v9318_v14 }
 0x1b1   : > { %6510 = vmatpush3.bf16.msra.mxu1 %v9324_v15  ;;  %6517 = vmatprep.subr.bf16.mxu0 %v11500_v45 }
 0x1b2   : > { %6539 = vmatprep.subr.bf16.mxu1 %v8764_v28 }
 0x1b3   : > { %2087 = vmatmul.mubr.bf16.vlgmr.msra.gmra.mrb[44].mxu0 %v11561_v26  ;;  %v11565_v26 = vld [vmem:[#allocation22_spill] sm:$0xff] }
 0x1b4   : > { %2127 = vmatmul.mubr.bf16.vlgmr.msra.gmra.mrb[44].mxu1 %v11562_v55  ;;  %6518 = vmatpush3.bf16.msra.mxu0 %v8776_v29  ;;  %v11566_v55 = vld [vmem:[#allocation23_spill] sm:$0xff] }
 0x1b5   : > { %6540 = vmatpush3.bf16.msra.mxu1 %v11505_v50  ;;  %6519 = vmatprep.subr.bf16.mxu0 %v11506_v51 }
 0x1b6   : > { %6541 = vmatprep.subr.bf16.mxu1 %v8794_v62  ;;  %2189 = vmatprep.mubr.bf16.mxu0 %v9412_v60  ;;  %v11568_v60 = vld [vmem:[#allocation24_spill] sm:$0xff] }
 0x1b7   : > { %2229 = vmatprep.mubr.bf16.mxu1 %v9414_v47  ;;  %v11567_v47 = vld [vmem:[#allocation10_spill] sm:$0xff] }
 0x1b8   : > { %6520 = vmatpush3.bf16.msra.mxu0 %v8802_v27 }
 0x1b9   : > { %6542 = vmatpush3.bf16.msra.mxu1 %v8808_v30  ;;  %6521 = vmatprep.subr.bf16.mxu0 %v8814_v63 }
 0x1ba   : > { %6543 = vmatprep.subr.bf16.mxu1 %v8902_v52  ;;  %v11569_v52 = vld [vmem:[#allocation25_spill] sm:$0xff] }
 0x1bc   : > { %6522 = vmatpush3.bf16.msra.mxu0 %v8908_v53  ;;  %v11570_v53 = vld [vmem:[#allocation12_spill] sm:$0xff] }
 0x1bd   : > { %6544 = vmatpush3.bf16.msra.mxu1 %v8914_v54  ;;  %6523 = vmatprep.subr.bf16.mxu0 %v11563_v61 }
 0x1be   : > { %6545 = vmatprep.subr.bf16.mxu1 %v11564_v56 }
 0x1c0   : > { %6524 = vmatpush3.bf16.msra.mxu0 %v11565_v26 }
 0x1c1   : > { %6546 = vmatpush3.bf16.msra.mxu1 %v11566_v55  ;;  %6525 = vmatprep.subr.bf16.mxu0 %v8944_v59 }
 0x1c2   : > { %6547 = vmatprep.subr.bf16.mxu1 %v11567_v47 }
 0x1c4   : > { %6526 = vmatpush3.bf16.msra.mxu0 %v11568_v60 }
 0x1c5   : > { %6548 = vmatpush3.bf16.msra.mxu1 %v8962_v0  ;;  %6527 = vmatprep.subr.bf16.mxu0 %v11569_v52 }
 0x1c6   : > { %6549 = vmatprep.subr.bf16.mxu1 %v11570_v53  ;;  %v6225_v54 = vpop.f32.mrb[20].mxu0 }
 0x1c7   : > { %v6247_v61 = vpop.f32.mrb[20].mxu1  ;;  %v6226_v63 = vpop.f32.mrb[21].mxu0 }
 0x1c8   : > { %v6248_v56 = vpop.f32.mrb[21].mxu1  ;;  %v6227_v30 = vadd.f32 %v6226_v63, %v6225_v54  ;;  %v6228_v27 = vpop.f32.mrb[22].mxu0  ;;  %6528 = vmatpush3.bf16.msra.mxu0 %v8980_v25  ;;  %v9449_v63 = vcombine.low %v5710_v39, %v5710_v39  ;;  %v9451_v54 = vcombine.low %v5711_v6, %v5711_v6  ;;  %v11574_v39 = vld [vmem:[#allocation17_spill] sm:$0xff] }
 0x1c9   : > { %v6249_v26 = vadd.f32 %v6248_v56, %v6247_v61  ;;  %v6250_v55 = vpop.f32.mrb[22].mxu1  ;;  %6550 = vmatpush3.bf16.msra.mxu1 %v11525_v37  ;;  %v6229_v47 = vpop.f32.mrb[23].mxu0  ;;  %6529 = vmatprep.subr.bf16.mxu0 %v11526_v2 }
 0x1ca   : > { %v6251_v60 = vpop.f32.mrb[23].mxu1  ;;  %6551 = vmatprep.subr.bf16.mxu1 %v11527_v3  ;;  %v1498_v52 = vadd.f32 %v6227_v30, %v1444_v58  ;;  %v11573_v58 = vld [vmem:[#allocation30_spill] sm:$0xff] }
 0x1cc   : > { %v1538_v53 = vadd.f32 %v6249_v26, %v1498_v52  ;;  %6530 = vmatpush3.bf16.msra.mxu0 %v11528_v40  ;;  %v11571_v52 = vld [vmem:[#allocation34_spill] sm:$0xff] }
 0x1cd   : > { %6552 = vmatpush3.bf16.msra.mxu1 %v11529_v43  ;;  %6531 = vmatprep.subr.bf16.mxu0 %v11530_v44 }
 0x1ce   : > { %6553 = vmatprep.subr.bf16.mxu1 %v9022_v49  ;;  %v1543_v27 = vadd.f32 %v9121_v24, %v1538_v53  ;;  %v11572_v53 = vld [vmem:[#allocation35_spill] sm:$0xff] }
 0x1d0   : > { %v1544_v60 = vmax.f32 %v1543_v27, 0.0  ;;  %6532 = vmatpush3.bf16.msra.mxu0 %v9032_v46 }
 0x1d1   : > { %6554 = vmatpush3.bf16.msra.mxu1 %v9038_v48  ;;  %6561 = vmatprep.subr.bf16.mxu0 %v9044_v41 }
 0x1d2   : > { %6583 = vmatprep.subr.bf16.mxu1 %v9138_v8  ;;  %v1545_v30 = vpack.c.bf16 %v1544_v60, %v1544_v60 }
 0x1d3   : > { %2190 = vmatmul.mubr.bf16.vlgmr.msra.gmra.mrb[48].mxu0 %v9449_v63 }
 0x1d4   : > { %2230 = vmatmul.mubr.bf16.vlgmr.msra.gmra.mrb[48].mxu1 %v9451_v54  ;;  %1546 = vst [vmem:[#allocation2 + $0x8] sm:$0xf] %v1545_v30  ;;  %6562 = vmatpush3.bf16.msra.mxu0 %v9146_v10 }
 0x1d5   : > { %6584 = vmatpush3.bf16.msra.mxu1 %v9152_v11  ;;  %6563 = vmatprep.subr.bf16.mxu0 %v9158_v12 }
 0x1d6   : > { %6585 = vmatprep.subr.bf16.mxu1 %v9164_v13  ;;  %2283 = vmatprep.mubr.bf16.mxu0 %v11571_v52 }
 0x1d7   : > { %2323 = vmatprep.mubr.bf16.mxu1 %v11572_v53 }
 0x1d8   : > { %6564 = vmatpush3.bf16.msra.mxu0 %v9172_v16 }
 0x1d9   : > { %6586 = vmatpush3.bf16.msra.mxu1 %v9178_v17  ;;  %6565 = vmatprep.subr.bf16.mxu0 %v9184_v20 }
 0x1da   : > { %6587 = vmatprep.subr.bf16.mxu1 %v9190_v21 }
 0x1dc   : > { %6566 = vmatpush3.bf16.msra.mxu0 %v9196_v31 }
 0x1dd   : > { %6588 = vmatpush3.bf16.msra.mxu1 %v9202_v32  ;;  %6567 = vmatprep.subr.bf16.mxu0 %v9208_v33 }
 0x1de   : > { %6589 = vmatprep.subr.bf16.mxu1 %v9214_v34 }
 0x1e0   : > { %6568 = vmatpush3.bf16.msra.mxu0 %v9220_v35 }
 0x1e1   : > { %6590 = vmatpush3.bf16.msra.mxu1 %v9226_v36  ;;  %6569 = vmatprep.subr.bf16.mxu0 %v11549_v57 }
 0x1e2   : > { %6591 = vmatprep.subr.bf16.mxu1 %v11550_v4 }
 0x1e4   : > { %6570 = vmatpush3.bf16.msra.mxu0 %v11551_v22 }
 0x1e5   : > { %6592 = vmatpush3.bf16.msra.mxu1 %v11552_v18  ;;  %6571 = vmatprep.subr.bf16.mxu0 %v11573_v58 }
 0x1e6   : > { %6593 = vmatprep.subr.bf16.mxu1 %v11574_v39  ;;  %v6269_v6 = vpop.f32.mrb[24].mxu0 }
 0x1e7   : > { %v6291_v47 = vpop.f32.mrb[24].mxu1  ;;  %v6270_v61 = vpop.f32.mrb[25].mxu0 }
 0x1e8   : > { %v6292_v56 = vpop.f32.mrb[25].mxu1  ;;  %v6271_v26 = vadd.f32 %v6270_v61, %v6269_v6  ;;  %v6272_v27 = vpop.f32.mrb[26].mxu0  ;;  %6572 = vmatpush3.bf16.msra.mxu0 %v9268_v38  ;;  %v5722_v6 = vld [vmem:[%s8462_s21 + $0x80] sm:$0xff] }
 0x1e9   : > { %v6293_v55 = vadd.f32 %v6292_v56, %v6291_v47  ;;  %v6294_v60 = vpop.f32.mrb[26].mxu1  ;;  %6594 = vmatpush3.bf16.msra.mxu1 %v9274_v42  ;;  %v6273_v30 = vpop.f32.mrb[27].mxu0  ;;  %6573 = vmatprep.subr.bf16.mxu0 %v9280_v1  ;;  %v5723_v47 = vld [vmem:[%s8462_s21 + $0x88] sm:$0xff]  ;;  %v9495_v61 = vcombine.high %v5722_v6, %v5722_v6  ;;  %v11581_v27 = vld [vmem:[#allocation16_spill] sm:$0xff] }
 0x1ea   : > { %v6295_v52 = vpop.f32.mrb[27].mxu1  ;;  %6595 = vmatprep.subr.bf16.mxu1 %v9286_v23  ;;  %v9497_v56 = vcombine.high %v5723_v47, %v5723_v47  ;;  %v11582_v60 = vld [vmem:[#allocation19_spill] sm:$0xff]  ;;  %v11583_v30 = vld [vmem:[#allocation20_spill] sm:$0xff] }
 0x1eb   : > { %v1641_v53 = vadd.f32 %v6293_v55, %v6271_v26  ;;  %11575 = vst [vmem:[#allocation28_spill] sm:$0xff] %v9495_v61  ;;  %v11577_v26 = vld [vmem:[#allocation36_spill] sm:$0xff]  ;;  %v11578_v55 = vld [vmem:[#allocation37_spill] sm:$0xff]  ;;  %v11588_v52 = vld [vmem:[#allocation23_spill] sm:$0xff] }
 0x1ec   : > { %6574 = vmatpush3.bf16.msra.mxu0 %v11555_v9  ;;  %11576 = vst [vmem:[#allocation29_spill] sm:$0xff] %v9497_v56 }
 0x1ed   : > { %6596 = vmatpush3.bf16.msra.mxu1 %v11556_v19  ;;  %6575 = vmatprep.subr.bf16.mxu0 %v11557_v7 }
 0x1ee   : > { %6597 = vmatprep.subr.bf16.mxu1 %v11558_v5 }
 0x1f0   : > { %6576 = vmatpush3.bf16.msra.mxu0 %v9318_v14 }
 0x1f1   : > { %6598 = vmatpush3.bf16.msra.mxu1 %v9324_v15  ;;  %6605 = vmatprep.subr.bf16.mxu0 %v11500_v45  ;;  %v11580_v45 = vld [vmem:[#allocation15_spill] sm:$0xff] }
 0x1f2   : > { %6627 = vmatprep.subr.bf16.mxu1 %v8764_v28  ;;  %v11579_v28 = vld [vmem:[#allocation14_spill] sm:$0xff] }
 0x1f3   : > { %2284 = vmatmul.mubr.bf16.vlgmr.msra.gmra.mrb[52].mxu0 %v11577_v26  ;;  %v11589_v26 = vld [vmem:[#allocation10_spill] sm:$0xff] }
 0x1f4   : > { %2324 = vmatmul.mubr.bf16.vlgmr.msra.gmra.mrb[52].mxu1 %v11578_v55  ;;  %6606 = vmatpush3.bf16.msra.mxu0 %v8776_v29  ;;  %v11584_v29 = vld [vmem:[#allocation21_spill] sm:$0xff]  ;;  %v11590_v55 = vld [vmem:[#allocation24_spill] sm:$0xff] }
 0x1f5   : > { %6628 = vmatpush3.bf16.msra.mxu1 %v11505_v50  ;;  %6607 = vmatprep.subr.bf16.mxu0 %v11506_v51  ;;  %v11585_v50 = vld [vmem:[#allocation8_spill] sm:$0xff]  ;;  %v11586_v51 = vld [vmem:[#allocation9_spill] sm:$0xff] }
 0x1f6   : > { %6629 = vmatprep.subr.bf16.mxu1 %v8794_v62  ;;  %2386 = vmatprep.mubr.bf16.mxu0 %v9495_v61  ;;  %v11587_v62 = vld [vmem:[#allocation22_spill] sm:$0xff] }
 0x1f7   : > { %2426 = vmatprep.mubr.bf16.mxu1 %v9497_v56 }
 0x1f8   : > { %6608 = vmatpush3.bf16.msra.mxu0 %v11579_v28  ;;  %v11591_v28 = vld [vmem:[#allocation25_spill] sm:$0xff] }
 0x1f9   : > { %6630 = vmatpush3.bf16.msra.mxu1 %v11580_v45  ;;  %6609 = vmatprep.subr.bf16.mxu0 %v11581_v27  ;;  %v11592_v45 = vld [vmem:[#allocation12_spill] sm:$0xff] }
 0x1fa   : > { %6631 = vmatprep.subr.bf16.mxu1 %v11582_v60 }
 0x1fc   : > { %6610 = vmatpush3.bf16.msra.mxu0 %v11583_v30 }
 0x1fd   : > { %6632 = vmatpush3.bf16.msra.mxu1 %v11584_v29  ;;  %6611 = vmatprep.subr.bf16.mxu0 %v11585_v50 }
 0x1fe   : > { %6633 = vmatprep.subr.bf16.mxu1 %v11586_v51 }
 0x200   : > { %6612 = vmatpush3.bf16.msra.mxu0 %v11587_v62 }
 0x201   : > { %6634 = vmatpush3.bf16.msra.mxu1 %v11588_v52  ;;  %6613 = vmatprep.subr.bf16.mxu0 %v8944_v59 }
 0x202   : > { %6635 = vmatprep.subr.bf16.mxu1 %v11589_v26 }
 0x204   : > { %6614 = vmatpush3.bf16.msra.mxu0 %v11590_v55 }
 0x205   : > { %6636 = vmatpush3.bf16.msra.mxu1 %v8962_v0  ;;  %6615 = vmatprep.subr.bf16.mxu0 %v11591_v28 }
 0x206   : > { %6637 = vmatprep.subr.bf16.mxu1 %v11592_v45  ;;  %v6313_v27 = vpop.f32.mrb[28].mxu0 }
 0x207   : > { %v6335_v56 = vpop.f32.mrb[28].mxu1  ;;  %v6314_v61 = vpop.f32.mrb[29].mxu0 }
 0x208   : > { %v6336_v51 = vpop.f32.mrb[29].mxu1  ;;  %v6315_v50 = vadd.f32 %v6314_v61, %v6313_v27  ;;  %v6316_v29 = vpop.f32.mrb[30].mxu0  ;;  %6616 = vmatpush3.bf16.msra.mxu0 %v8980_v25  ;;  %v9532_v61 = vcombine.low %v5722_v6, %v5722_v6  ;;  %v9613_v27 = vld [vmem:[%s11284_s2 + $0x80] sm:$0xff]  }
 0x209   : > { %v6337_v62 = vadd.f32 %v6336_v51, %v6335_v56  ;;  %v6338_v52 = vpop.f32.mrb[30].mxu1  ;;  %6638 = vmatpush3.bf16.msra.mxu1 %v11525_v37  ;;  %v6317_v26 = vpop.f32.mrb[31].mxu0  ;;  %6617 = vmatprep.subr.bf16.mxu0 %v11526_v2  ;;  %v9534_v37 = vcombine.low %v5723_v47, %v5723_v47  ;;  %v9575_v51 = vld [vmem:[%s8462_s21 + $0x90] sm:$0xff] }
 0x20a   : > { %v6339_v55 = vpop.f32.mrb[31].mxu1  ;;  %6639 = vmatprep.subr.bf16.mxu1 %v11527_v3  ;;  %v1695_v28 = vadd.f32 %v6315_v50, %v1641_v53  ;;  %v9585_v52 = vld [vmem:[%s11284_s2 + $0x40] sm:$0xff]  }
 0x20b   : > { %v9591_v26 = vld [vmem:[%s11284_s2 + $0xc0] sm:$0xff]   ;;  %v9596_v55 = vcombine.high %v9575_v51, %v9575_v51 }
 0x20c   : > { %v1735_v45 = vadd.f32 %v6337_v62, %v1695_v28  ;;  %6618 = vmatpush3.bf16.msra.mxu0 %v11528_v40  ;;  %v9578_v62 = vld [vmem:[%s8462_s21 + $0x98] sm:$0xff] }
 0x20d   : > { %6640 = vmatpush3.bf16.msra.mxu1 %v11529_v43  ;;  %6619 = vmatprep.subr.bf16.mxu0 %v11530_v44  ;;  %v9600_v28 = vcombine.high %v9578_v62, %v9578_v62 }
 0x20e   : > { %6641 = vmatprep.subr.bf16.mxu1 %v9022_v49  ;;  %v1740_v25 = vadd.f32 %v9121_v24, %v1735_v45  ;;  %v9607_v45 = vld [vmem:[%s11284_s2] sm:$0xff]  }
 0x210   : > { %v1741_v56 = vmax.f32 %v1740_v25, 0.0  ;;  %6620 = vmatpush3.bf16.msra.mxu0 %v9032_v46  ;;  %v11593_v46 = vld [vmem:[#allocation26_spill] sm:$0xff]  ;;  %v9633_v25 = vld [vmem:[%s11284_s2 + $0x8] sm:$0xff]  }
 0x211   : > { %6642 = vmatpush3.bf16.msra.mxu1 %v9038_v48  ;;  %6649 = vmatprep.subr.bf16.mxu0 %v9044_v41  ;;  %v11594_v48 = vld [vmem:[#allocation27_spill] sm:$0xff]  ;;  %11595 = vst [vmem:[#allocation18_spill] sm:$0xff] %v9633_v25 }
 0x212   : > { %6671 = vmatprep.subr.bf16.mxu1 %v9138_v8  ;;  %v1742_v2 = vpack.c.bf16 %v1741_v56, %v1741_v56  ;;  %v9639_v56 = vld [vmem:[%s11284_s2 + $0x88] sm:$0xff]  }
 0x213   : > { %2387 = vmatmul.mubr.bf16.vlgmr.msra.gmra.mrb[56].mxu0 %v9532_v61  ;;  %11596 = vst [vmem:[#allocation31_spill] sm:$0xff] %v9639_v56 }
 0x214   : > { %2427 = vmatmul.mubr.bf16.vlgmr.msra.gmra.mrb[56].mxu1 %v9534_v37  ;;  %1743 = vst [vmem:[#allocation2 + $0xc] sm:$0xf] %v1742_v2  ;;  %6650 = vmatpush3.bf16.msra.mxu0 %v9146_v10  ;;  %v9645_v2 = vld [vmem:[%s11284_s2 + $0x50] sm:$0xff]  }
 0x215   : > { %6672 = vmatpush3.bf16.msra.mxu1 %v9152_v11  ;;  %6651 = vmatprep.subr.bf16.mxu0 %v9158_v12  ;;  %11597 = vst [vmem:[#allocation32_spill] sm:$0xff] %v9645_v2 }
 0x216   : > { %6673 = vmatprep.subr.bf16.mxu1 %v9164_v13  ;;  %2480 = vmatprep.mubr.bf16.mxu0 %v11593_v46  ;;  %v11598_v46 = vld [vmem:[#allocation21_spill] sm:$0xff] }
 0x217   : > { %2520 = vmatprep.mubr.bf16.mxu1 %v11594_v48  ;;  %v11599_v48 = vld [vmem:[#allocation8_spill] sm:$0xff] }
 0x218   : > { %6652 = vmatpush3.bf16.msra.mxu0 %v9172_v16 }
 0x219   : > { %6674 = vmatpush3.bf16.msra.mxu1 %v9178_v17  ;;  %6653 = vmatprep.subr.bf16.mxu0 %v9184_v20 }
 0x21a   : > { %6675 = vmatprep.subr.bf16.mxu1 %v9190_v21 }
 0x21c   : > { %6654 = vmatpush3.bf16.msra.mxu0 %v9196_v31 }
 0x21d   : > { %6676 = vmatpush3.bf16.msra.mxu1 %v9202_v32  ;;  %6655 = vmatprep.subr.bf16.mxu0 %v9208_v33 }
 0x21e   : > { %6677 = vmatprep.subr.bf16.mxu1 %v9214_v34 }
 0x220   : > { %6656 = vmatpush3.bf16.msra.mxu0 %v9220_v35 }
 0x221   : > { %6678 = vmatpush3.bf16.msra.mxu1 %v9226_v36  ;;  %6657 = vmatprep.subr.bf16.mxu0 %v11549_v57 }
 0x222   : > { %6679 = vmatprep.subr.bf16.mxu1 %v11550_v4 }
 0x224   : > { %6658 = vmatpush3.bf16.msra.mxu0 %v11551_v22 }
 0x225   : > { %6680 = vmatpush3.bf16.msra.mxu1 %v11552_v18  ;;  %6659 = vmatprep.subr.bf16.mxu0 %v11573_v58 }
 0x226   : > { %6681 = vmatprep.subr.bf16.mxu1 %v11574_v39  ;;  %v6357_v49 = vpop.f32.mrb[32].mxu0 }
 0x227   : > { %v6379_v41 = vpop.f32.mrb[32].mxu1  ;;  %v6358_v3 = vpop.f32.mrb[33].mxu0 }
 0x228   : > { %v6380_v40 = vpop.f32.mrb[33].mxu1  ;;  %v6359_v43 = vadd.f32 %v6358_v3, %v6357_v49  ;;  %v6360_v53 = vpop.f32.mrb[34].mxu0  ;;  %6660 = vmatpush3.bf16.msra.mxu0 %v9268_v38  ;;  %v11600_v49 = vld [vmem:[#allocation9_spill] sm:$0xff]  ;;  %v11602_v3 = vld [vmem:[#allocation23_spill] sm:$0xff] }
 0x229   : > { %v6381_v44 = vadd.f32 %v6380_v40, %v6379_v41  ;;  %v6382_v6 = vpop.f32.mrb[34].mxu1  ;;  %6682 = vmatpush3.bf16.msra.mxu1 %v9274_v42  ;;  %v6361_v47 = vpop.f32.mrb[35].mxu0  ;;  %6661 = vmatprep.subr.bf16.mxu0 %v9280_v1  ;;  %v11601_v41 = vld [vmem:[#allocation22_spill] sm:$0xff] }
 0x22a   : > { %v6383_v29 = vpop.f32.mrb[35].mxu1  ;;  %6683 = vmatprep.subr.bf16.mxu1 %v9286_v23  ;;  %v11603_v40 = vld [vmem:[#allocation10_spill] sm:$0xff] }
 0x22b   : > { %v9568_v50 = vadd.f32 %v6381_v44, %v6359_v43  ;;  %v11604_v43 = vld [vmem:[#allocation24_spill] sm:$0xff] }
 0x22c   : > { %6662 = vmatpush3.bf16.msra.mxu0 %v11555_v9 }
 0x22d   : > { %6684 = vmatpush3.bf16.msra.mxu1 %v11556_v19  ;;  %6663 = vmatprep.subr.bf16.mxu0 %v11557_v7 }
 0x22e   : > { %6685 = vmatprep.subr.bf16.mxu1 %v11558_v5 }
 0x230   : > { %6664 = vmatpush3.bf16.msra.mxu0 %v9318_v14 }
 0x231   : > { %6686 = vmatpush3.bf16.msra.mxu1 %v9324_v15  ;;  %6693 = vmatprep.subr.bf16.mxu0 %v9585_v52 }
 0x232   : > { %6715 = vmatprep.subr.bf16.mxu1 %v9591_v26 }
 0x233   : > { %2481 = vmatmul.mubr.bf16.vlgmr.msra.gmra.mrb[60].mxu0 %v9449_v63  ;;  %v9619_v63 = vld [vmem:[%s11284_s2 + $0x48] sm:$0xff]  }
 0x234   : > { %2521 = vmatmul.mubr.bf16.vlgmr.msra.gmra.mrb[60].mxu1 %v9451_v54  ;;  %6694 = vmatpush3.bf16.msra.mxu0 %v9607_v45  ;;  %v9625_v54 = vld [vmem:[%s11284_s2 + $0xc8] sm:$0xff]  }
 0x235   : > { %6716 = vmatpush3.bf16.msra.mxu1 %v9613_v27  ;;  %6695 = vmatprep.subr.bf16.mxu0 %v9619_v63 }
 0x236   : > { %6717 = vmatprep.subr.bf16.mxu1 %v9625_v54  ;;  %2583 = vmatprep.mubr.bf16.mxu0 %v9596_v55 }
 0x237   : > { %2623 = vmatprep.mubr.bf16.mxu1 %v9600_v28 }
 0x238   : > { %6696 = vmatpush3.bf16.msra.mxu0 %v9633_v25 }
 0x239   : > { %6718 = vmatpush3.bf16.msra.mxu1 %v9639_v56  ;;  %6697 = vmatprep.subr.bf16.mxu0 %v9645_v2 }
 0x23a   : > { %6719 = vmatprep.subr.bf16.mxu1 %v11582_v60  ;;  %v11605_v60 = vld [vmem:[#allocation25_spill] sm:$0xff] }
 0x23c   : > { %6698 = vmatpush3.bf16.msra.mxu0 %v11583_v30  ;;  %v11606_v30 = vld [vmem:[#allocation12_spill] sm:$0xff] }
 0x23d   : > { %6720 = vmatpush3.bf16.msra.mxu1 %v11598_v46  ;;  %6699 = vmatprep.subr.bf16.mxu0 %v11599_v48 }
 0x23e   : > { %6721 = vmatprep.subr.bf16.mxu1 %v11600_v49 }
 0x240   : > { %6700 = vmatpush3.bf16.msra.mxu0 %v11601_v41 }
 0x241   : > { %6722 = vmatpush3.bf16.msra.mxu1 %v11602_v3  ;;  %6701 = vmatprep.subr.bf16.mxu0 %v8944_v59  ;;  %v9664_v59 = vld [vmem:[%s11284_s2 + $0x28] sm:$0xff]  }
 0x242   : > { %6723 = vmatprep.subr.bf16.mxu1 %v11603_v40  ;;  %v9676_v40 = vld [vmem:[%s11284_s2 + $0x70] sm:$0xff]  }
 0x244   : > { %6702 = vmatpush3.bf16.msra.mxu0 %v11604_v43  ;;  %v9682_v43 = vld [vmem:[%s11284_s2 + $0xf0] sm:$0xff]  }
 0x245   : > { %6724 = vmatpush3.bf16.msra.mxu1 %v8962_v0  ;;  %6703 = vmatprep.subr.bf16.mxu0 %v11605_v60  ;;  %v9670_v0 = vld [vmem:[%s11284_s2 + $0xa8] sm:$0xff]  }
 0x246   : > { %6725 = vmatprep.subr.bf16.mxu1 %v11606_v30  ;;  %v6401_v44 = vpop.f32.mrb[36].mxu0 }
 0x247   : > { %v6423_v53 = vpop.f32.mrb[36].mxu1  ;;  %v6402_v6 = vpop.f32.mrb[37].mxu0 }
 0x248   : > { %v6424_v47 = vpop.f32.mrb[37].mxu1  ;;  %v6403_v29 = vadd.f32 %v6402_v6, %v6401_v44  ;;  %v6404_v48 = vpop.f32.mrb[38].mxu0  ;;  %6704 = vmatpush3.bf16.msra.mxu0 %v9664_v59  ;;  %v9689_v44 = vld [vmem:[%s11284_s2 + $0x30] sm:$0xff]   ;;  %v9701_v6 = vld [vmem:[%s11284_s2 + $0x78] sm:$0xff]  }
 0x249   : > { %v6425_v46 = vadd.f32 %v6424_v47, %v6423_v53  ;;  %v6426_v49 = vpop.f32.mrb[38].mxu1  ;;  %6726 = vmatpush3.bf16.msra.mxu1 %v9670_v0  ;;  %v6405_v41 = vpop.f32.mrb[39].mxu0  ;;  %6705 = vmatprep.subr.bf16.mxu0 %v9676_v40  ;;  %v9695_v53 = vld [vmem:[%s11284_s2 + $0xb0] sm:$0xff]  }
 0x24a   : > { %v6427_v3 = vpop.f32.mrb[39].mxu1  ;;  %6727 = vmatprep.subr.bf16.mxu1 %v9682_v43  ;;  %v1892_v60 = vadd.f32 %v6403_v29, %v9568_v50  ;;  %v9707_v50 = vld [vmem:[%s11284_s2 + $0xf8] sm:$0xff]   ;;  %v9713_v29 = vcombine.low %v9575_v51, %v9575_v51  ;;  %v9734_v51 = vld [vmem:[%s11283_s1 + $0x40] sm:$0xff]  }
 0x24b   : > { %v9722_v49 = vld [vmem:[%s11284_s2 + $0x38] sm:$0xff]   ;;  %v11607_v41 = vld [vmem:[#allocation28_spill] sm:$0xff]  ;;  %v11608_v3 = vld [vmem:[#allocation29_spill] sm:$0xff] }
 0x24c   : > { %v1932_v30 = vadd.f32 %v6425_v46, %v1892_v60  ;;  %6706 = vmatpush3.bf16.msra.mxu0 %v9689_v44  ;;  %v9717_v46 = vcombine.low %v9578_v62, %v9578_v62 }
 0x24d   : > { %6728 = vmatpush3.bf16.msra.mxu1 %v9695_v53  ;;  %6707 = vmatprep.subr.bf16.mxu0 %v9701_v6 }
 0x24e   : > { %6729 = vmatprep.subr.bf16.mxu1 %v9707_v50  ;;  %v1937_v47 = vadd.f32 %v9121_v24, %v1932_v30  ;;  %v9728_v24 = vld [vmem:[%s11284_s2 + $0xb8] sm:$0xff]  }
 0x250   : > { %v1938_v48 = vmax.f32 %v1937_v47, 0.0  ;;  %6708 = vmatpush3.bf16.msra.mxu0 %v9722_v49 }
 0x251   : > { %6730 = vmatpush3.bf16.msra.mxu1 %v9728_v24  ;;  %6737 = vmatprep.subr.bf16.mxu0 %v9734_v51 }
 0x252   : > { %6759 = vmatprep.subr.bf16.mxu1 %v9138_v8  ;;  %v1939_v62 = vpack.c.bf16 %v1938_v48, %v1938_v48 }
 0x253   : > { %2584 = vmatmul.mubr.bf16.vlgmr.msra.gmra.mrb[64].mxu0 %v9713_v29 }
 0x254   : > { %2624 = vmatmul.mubr.bf16.vlgmr.msra.gmra.mrb[64].mxu1 %v9717_v46  ;;  %1940 = vst [vmem:[#allocation2 + $0x10] sm:$0xf] %v1939_v62  ;;  %6738 = vmatpush3.bf16.msra.mxu0 %v9146_v10 }
 0x255   : > { %6760 = vmatpush3.bf16.msra.mxu1 %v9152_v11  ;;  %6739 = vmatprep.subr.bf16.mxu0 %v9158_v12 }
 0x256   : > { %6761 = vmatprep.subr.bf16.mxu1 %v9164_v13  ;;  %2677 = vmatprep.mubr.bf16.mxu0 %v11607_v41 }
 0x257   : > { %2717 = vmatprep.mubr.bf16.mxu1 %v11608_v3 }
 0x258   : > { %6740 = vmatpush3.bf16.msra.mxu0 %v9172_v16 }
 0x259   : > { %6762 = vmatpush3.bf16.msra.mxu1 %v9178_v17  ;;  %6741 = vmatprep.subr.bf16.mxu0 %v9184_v20 }
 0x25a   : > { %6763 = vmatprep.subr.bf16.mxu1 %v9190_v21 }
 0x25c   : > { %6742 = vmatpush3.bf16.msra.mxu0 %v9196_v31 }
 0x25d   : > { %6764 = vmatpush3.bf16.msra.mxu1 %v9202_v32  ;;  %6743 = vmatprep.subr.bf16.mxu0 %v9208_v33  ;;  %v9773_v33 = vld [vmem:[%s8462_s21 + $0xa0] sm:$0xff] }
 0x25e   : > { %6765 = vmatprep.subr.bf16.mxu1 %v9214_v34  ;;  %v9776_v34 = vld [vmem:[%s8462_s21 + $0xa8] sm:$0xff] }
 0x260   : > { %6744 = vmatpush3.bf16.msra.mxu0 %v9220_v35  ;;  %v9784_v35 = vcombine.high %v9773_v33, %v9773_v33 }
 0x261   : > { %6766 = vmatpush3.bf16.msra.mxu1 %v9226_v36  ;;  %6745 = vmatprep.subr.bf16.mxu0 %v11549_v57  ;;  %v9788_v36 = vcombine.high %v9776_v34, %v9776_v34  ;;  %v9840_v57 = vld [vmem:[%s11284_s2 + $0x98] sm:$0xff]  }
 0x262   : > { %6767 = vmatprep.subr.bf16.mxu1 %v11550_v4  ;;  %11615 = vst [vmem:[#allocation17_spill] sm:$0xff] %v9840_v57  ;;  %v9846_v4 = vld [vmem:[%s11284_s2 + $0x60] sm:$0xff]  }
 0x264   : > { %6746 = vmatpush3.bf16.msra.mxu0 %v11551_v22  ;;  %v9852_v22 = vld [vmem:[%s11284_s2 + $0xe0] sm:$0xff]  }
 0x265   : > { %6768 = vmatpush3.bf16.msra.mxu1 %v11552_v18  ;;  %6747 = vmatprep.subr.bf16.mxu0 %v11573_v58  ;;  %11616 = vst [vmem:[#allocation36_spill] sm:$0xff] %v9852_v22  ;;  %v9858_v18 = vld [vmem:[%s11284_s2 + $0x20] sm:$0xff]  }
 0x266   : > { %6769 = vmatprep.subr.bf16.mxu1 %v11574_v39  ;;  %v6445_v8 = vpop.f32.mrb[40].mxu0  ;;  %11617 = vst [vmem:[#allocation37_spill] sm:$0xff] %v9858_v18 }
 0x267   : > { %v6467_v10 = vpop.f32.mrb[40].mxu1  ;;  %v6446_v11 = vpop.f32.mrb[41].mxu0 }
 0x268   : > { %v6468_v12 = vpop.f32.mrb[41].mxu1  ;;  %v6447_v13 = vadd.f32 %v6446_v11, %v6445_v8  ;;  %v6448_v17 = vpop.f32.mrb[42].mxu0  ;;  %6748 = vmatpush3.bf16.msra.mxu0 %v9268_v38  ;;  %v9804_v38 = vld [vmem:[%s11284_s2 + $0xd0] sm:$0xff]   ;;  %v9891_v8 = vld [vmem:[%s11285_s3] ss:$0 sm:$0xff]  ;;  %v9896_v11 = vcombine.low %v9773_v33, %v9773_v33  ;;  %v9942_v33 = vld [vmem:[%s11283_s1 + $0x8] sm:$0xff]  }
 0x269   : > { %v6469_v16 = vadd.f32 %v6468_v12, %v6467_v10  ;;  %v6470_v20 = vpop.f32.mrb[42].mxu1  ;;  %6770 = vmatpush3.bf16.msra.mxu1 %v9274_v42  ;;  %v6449_v21 = vpop.f32.mrb[43].mxu0  ;;  %6749 = vmatprep.subr.bf16.mxu0 %v9280_v1  ;;  %11609 = vst [vmem:[#allocation33_spill] sm:$0xff] %v9804_v38  ;;  %v9810_v42 = vld [vmem:[%s11284_s2 + $0x10] sm:$0xff]   ;;  %v9900_v12 = vcombine.low %v9776_v34, %v9776_v34  ;;  %v9948_v34 = vld [vmem:[%s11283_s1 + $0x88] sm:$0xff]  }
 0x26a   : > { %v6471_v31 = vpop.f32.mrb[43].mxu1  ;;  %6771 = vmatprep.subr.bf16.mxu1 %v9286_v23  ;;  %11610 = vst [vmem:[#allocation11_spill] sm:$0xff] %v9810_v42  ;;  %v9816_v1 = vld [vmem:[%s11284_s2 + $0x90] sm:$0xff]   ;;  %v9822_v23 = vld [vmem:[%s11284_s2 + $0x58] sm:$0xff]   ;;  %11620 = vst [vmem:[#allocation16_spill] sm:$0xff] %v9896_v11 }
 0x26b   : > { %v9766_v32 = vadd.f32 %v6469_v16, %v6447_v13  ;;  %11611 = vst [vmem:[#allocation13_spill] sm:$0xff] %v9816_v1  ;;  %11612 = vst [vmem:[#allocation34_spill] sm:$0xff] %v9822_v23  ;;  %v9908_v16 = vld [vmem:[%s11283_s1 + $0xc0] sm:$0xff]   ;;  %v9928_v31 = vld [vmem:[%s11283_s1 + $0x48] sm:$0xff]  }
 0x26c   : > { %6750 = vmatpush3.bf16.msra.mxu0 %v11555_v9  ;;  %v9870_v9 = vld [vmem:[%s11284_s2 + $0x68] sm:$0xff]   ;;  %11621 = vst [vmem:[#allocation19_spill] sm:$0xff] %v9900_v12  ;;  %v9916_v20 = vld [vmem:[%s11283_s1] sm:$0xff]  }
 0x26d   : > { %6772 = vmatpush3.bf16.msra.mxu1 %v11556_v19  ;;  %6751 = vmatprep.subr.bf16.mxu0 %v11557_v7  ;;  %v9864_v19 = vld [vmem:[%s11284_s2 + $0xa0] sm:$0xff]   ;;  %11618 = vst [vmem:[#allocation14_spill] sm:$0xff] %v9870_v9  ;;  %v9876_v7 = vld [vmem:[%s11284_s2 + $0xe8] sm:$0xff]  }
 0x26e   : > { %6773 = vmatprep.subr.bf16.mxu1 %v11558_v5  ;;  %11619 = vst [vmem:[#allocation15_spill] sm:$0xff] %v9876_v7  ;;  %v9922_v21 = vld [vmem:[%s11283_s1 + $0x80] sm:$0xff]  }
 0x270   : > { %6752 = vmatpush3.bf16.msra.mxu0 %v9318_v14  ;;  %v9828_v14 = vld [vmem:[%s11284_s2 + $0xd8] sm:$0xff]  }
 0x271   : > { %6774 = vmatpush3.bf16.msra.mxu1 %v9324_v15  ;;  %6781 = vmatprep.subr.bf16.mxu0 %v9585_v52  ;;  %11613 = vst [vmem:[#allocation35_spill] sm:$0xff] %v9828_v14  ;;  %v9834_v15 = vld [vmem:[%s11284_s2 + $0x18] sm:$0xff]  }
 0x272   : > { %6803 = vmatprep.subr.bf16.mxu1 %v9591_v26  ;;  %11614 = vst [vmem:[#allocation30_spill] sm:$0xff] %v9834_v15 }
 0x273   : > { %2678 = vmatmul.mubr.bf16.vlgmr.msra.gmra.mrb[68].mxu0 %v9532_v61 }
 0x274   : > { %2718 = vmatmul.mubr.bf16.vlgmr.msra.gmra.mrb[68].mxu1 %v9534_v37  ;;  %6782 = vmatpush3.bf16.msra.mxu0 %v9607_v45 }
 0x275   : > { %6804 = vmatpush3.bf16.msra.mxu1 %v9613_v27  ;;  %6783 = vmatprep.subr.bf16.mxu0 %v9619_v63 }
 0x276   : > { %6805 = vmatprep.subr.bf16.mxu1 %v9625_v54  ;;  %2780 = vmatprep.mubr.bf16.mxu0 %v9784_v35 }
 0x277   : > { %2820 = vmatprep.mubr.bf16.mxu1 %v9788_v36 }
 0x278   : > { %6784 = vmatpush3.bf16.msra.mxu0 %v9633_v25 }
 0x279   : > { %6806 = vmatpush3.bf16.msra.mxu1 %v9639_v56  ;;  %6785 = vmatprep.subr.bf16.mxu0 %v9645_v2 }
 0x27a   : > { %6807 = vmatprep.subr.bf16.mxu1 %v9804_v38 }
 0x27c   : > { %6786 = vmatpush3.bf16.msra.mxu0 %v9810_v42 }
 0x27d   : > { %6808 = vmatpush3.bf16.msra.mxu1 %v9816_v1  ;;  %6787 = vmatprep.subr.bf16.mxu0 %v9822_v23 }
 0x27e   : > { %6809 = vmatprep.subr.bf16.mxu1 %v9828_v14 }
 0x280   : > { %6788 = vmatpush3.bf16.msra.mxu0 %v9834_v15 }
 0x281   : > { %6810 = vmatpush3.bf16.msra.mxu1 %v9840_v57  ;;  %6789 = vmatprep.subr.bf16.mxu0 %v9846_v4 }
 0x282   : > { %6811 = vmatprep.subr.bf16.mxu1 %v9852_v22 }
 0x284   : > { %6790 = vmatpush3.bf16.msra.mxu0 %v9858_v18 }
 0x285   : > { %6812 = vmatpush3.bf16.msra.mxu1 %v9864_v19  ;;  %6791 = vmatprep.subr.bf16.mxu0 %v9870_v9 }
 0x286   : > { %6813 = vmatprep.subr.bf16.mxu1 %v9876_v7  ;;  %v6489_v5 = vpop.f32.mrb[44].mxu0 }
 0x287   : > { %v6511_v58 = vpop.f32.mrb[44].mxu1  ;;  %v6490_v39 = vpop.f32.mrb[45].mxu0 }
 0x288   : > { %v6512_v61 = vpop.f32.mrb[45].mxu1  ;;  %v6491_v37 = vadd.f32 %v6490_v39, %v6489_v5  ;;  %v6492_v30 = vpop.f32.mrb[46].mxu0  ;;  %6792 = vmatpush3.bf16.msra.mxu0 %v9664_v59  ;;  %v9966_v5 = vld [vmem:[%s11283_s1 + $0x10] sm:$0xff]   ;;  %v9978_v39 = vld [vmem:[%s11283_s1 + $0x58] sm:$0xff]  }
 0x289   : > { %v6513_v60 = vadd.f32 %v6512_v61, %v6511_v58  ;;  %v6514_v47 = vpop.f32.mrb[46].mxu1  ;;  %6814 = vmatpush3.bf16.msra.mxu1 %v9670_v0  ;;  %v6493_v48 = vpop.f32.mrb[47].mxu0  ;;  %6793 = vmatprep.subr.bf16.mxu0 %v9676_v40  ;;  %v9972_v58 = vld [vmem:[%s11283_s1 + $0x90] sm:$0xff]   ;;  %v9984_v61 = vld [vmem:[%s11283_s1 + $0xd8] sm:$0xff]   ;;  %v10002_v30 = vld [vmem:[%s11283_s1 + $0x60] sm:$0xff]  }
 0x28a   : > { %v6515_v62 = vpop.f32.mrb[47].mxu1  ;;  %6815 = vmatprep.subr.bf16.mxu1 %v9682_v43  ;;  %v2089_v41 = vadd.f32 %v6491_v37, %v9766_v32  ;;  %v9934_v32 = vld [vmem:[%s11283_s1 + $0xc8] sm:$0xff]   ;;  %v9990_v37 = vld [vmem:[%s11283_s1 + $0x18] sm:$0xff]   ;;  %11622 = vst [vmem:[#allocation20_spill] sm:$0xff] %v10002_v30  ;;  %v10008_v47 = vld [vmem:[%s11283_s1 + $0xe0] sm:$0xff]  }
 0x28b   : > { %11623 = vst [vmem:[#allocation26_spill] sm:$0xff] %v10008_v47  ;;  %v10014_v48 = vld [vmem:[%s11283_s1 + $0x20] sm:$0xff]  }
 0x28c   : > { %v2129_v3 = vadd.f32 %v6513_v60, %v2089_v41  ;;  %6794 = vmatpush3.bf16.msra.mxu0 %v9689_v44  ;;  %v9996_v60 = vld [vmem:[%s11283_s1 + $0x98] sm:$0xff]   ;;  %11624 = vst [vmem:[#allocation27_spill] sm:$0xff] %v10014_v48  ;;  %v10020_v62 = vld [vmem:[%s11283_s1 + $0xa0] sm:$0xff]   ;;  %v10026_v41 = vld [vmem:[%s11283_s1 + $0x68] sm:$0xff]  }
 0x28d   : > { %6816 = vmatpush3.bf16.msra.mxu1 %v9695_v53  ;;  %6795 = vmatprep.subr.bf16.mxu0 %v9701_v6  ;;  %11625 = vst [vmem:[#allocation21_spill] sm:$0xff] %v10020_v62  ;;  %11626 = vst [vmem:[#allocation8_spill] sm:$0xff] %v10026_v41 }
 0x28e   : > { %6817 = vmatprep.subr.bf16.mxu1 %v9707_v50  ;;  %v2134_v10 = vadd.f32 %v9891_v8, %v2129_v3  ;;  %v10032_v3 = vld [vmem:[%s11283_s1 + $0xe8] sm:$0xff]  }
 0x28f   : > { %11627 = vst [vmem:[#allocation9_spill] sm:$0xff] %v10032_v3 }
 0x290   : > { %v2135_v13 = vmax.f32 %v2134_v10, 0.0  ;;  %6796 = vmatpush3.bf16.msra.mxu0 %v9722_v49 }
 0x291   : > { %6818 = vmatpush3.bf16.msra.mxu1 %v9728_v24  ;;  %6825 = vmatprep.subr.bf16.mxu0 %v9734_v51 }
 0x292   : > { %6847 = vmatprep.subr.bf16.mxu1 %v9908_v16  ;;  %v2136_v17 = vpack.c.bf16 %v2135_v13, %v2135_v13 }
 0x293   : > { %2781 = vmatmul.mubr.bf16.vlgmr.msra.gmra.mrb[72].mxu0 %v9896_v11 }
 0x294   : > { %2821 = vmatmul.mubr.bf16.vlgmr.msra.gmra.mrb[72].mxu1 %v9900_v12  ;;  %2137 = vst [vmem:[#allocation2 + $0x14] sm:$0xf] %v2136_v17  ;;  %6826 = vmatpush3.bf16.msra.mxu0 %v9916_v20 }
 0x295   : > { %6848 = vmatpush3.bf16.msra.mxu1 %v9922_v21  ;;  %6827 = vmatprep.subr.bf16.mxu0 %v9928_v31 }
 0x296   : > { %6849 = vmatprep.subr.bf16.mxu1 %v9934_v32  ;;  %2874 = vmatprep.mubr.bf16.mxu0 %v9596_v55  ;;  %v9954_v55 = vld [vmem:[%s11283_s1 + $0x50] sm:$0xff]  }
 0x297   : > { %2914 = vmatprep.mubr.bf16.mxu1 %v9600_v28  ;;  %v9960_v28 = vld [vmem:[%s11283_s1 + $0xd0] sm:$0xff]  }
 0x298   : > { %6828 = vmatpush3.bf16.msra.mxu0 %v9942_v33 }
 0x299   : > { %6850 = vmatpush3.bf16.msra.mxu1 %v9948_v34  ;;  %6829 = vmatprep.subr.bf16.mxu0 %v9954_v55 }
 0x29a   : > { %6851 = vmatprep.subr.bf16.mxu1 %v9960_v28 }
 0x29c   : > { %6830 = vmatpush3.bf16.msra.mxu0 %v9966_v5 }
 0x29d   : > { %6852 = vmatpush3.bf16.msra.mxu1 %v9972_v58  ;;  %6831 = vmatprep.subr.bf16.mxu0 %v9978_v39 }
 0x29e   : > { %6853 = vmatprep.subr.bf16.mxu1 %v9984_v61 }
 0x2a0   : > { %6832 = vmatpush3.bf16.msra.mxu0 %v9990_v37 }
 0x2a1   : > { %6854 = vmatpush3.bf16.msra.mxu1 %v9996_v60  ;;  %6833 = vmatprep.subr.bf16.mxu0 %v10002_v30  ;;  %v10038_v30 = vld [vmem:[%s11283_s1 + $0x28] sm:$0xff]  }
 0x2a2   : > { %6855 = vmatprep.subr.bf16.mxu1 %v10008_v47 }
 0x2a4   : > { %6834 = vmatpush3.bf16.msra.mxu0 %v10014_v48 }
 0x2a5   : > { %6856 = vmatpush3.bf16.msra.mxu1 %v10020_v62  ;;  %6835 = vmatprep.subr.bf16.mxu0 %v10026_v41  ;;  %v10044_v41 = vld [vmem:[%s11283_s1 + $0xa8] sm:$0xff]  }
 0x2a6   : > { %6857 = vmatprep.subr.bf16.mxu1 %v10032_v3  ;;  %v6533_v10 = vpop.f32.mrb[48].mxu0 }
 0x2a7   : > { %v6555_v13 = vpop.f32.mrb[48].mxu1  ;;  %v6534_v17 = vpop.f32.mrb[49].mxu0 }
 0x2a8   : > { %v6556_v12 = vpop.f32.mrb[49].mxu1  ;;  %v6535_v11 = vadd.f32 %v6534_v17, %v6533_v10  ;;  %v6536_v48 = vpop.f32.mrb[50].mxu0  ;;  %6836 = vmatpush3.bf16.msra.mxu0 %v10038_v30  ;;  %v10074_v17 = vld [vmem:[%s11283_s1 + $0x78] sm:$0xff]  }
 0x2a9   : > { %v6557_v62 = vadd.f32 %v6556_v12, %v6555_v13  ;;  %v6558_v47 = vpop.f32.mrb[50].mxu1  ;;  %6858 = vmatpush3.bf16.msra.mxu1 %v10044_v41  ;;  %v6537_v3 = vpop.f32.mrb[51].mxu0  ;;  %v10056_v48 = vld [vmem:[%s11283_s1 + $0xf0] sm:$0xff]   ;;  %11630 = vst [vmem:[#allocation10_spill] sm:$0xff] %v10074_v17 }
 0x2aa   : > { %v6559_v12 = vpop.f32.mrb[51].mxu1  ;;  %v10050_v47 = vld [vmem:[%s11283_s1 + $0x70] sm:$0xff]   ;;  %6859 = vmatprep.subr.bf16.mxu1 %v10056_v48 }
 0x2ab   : > { %6837 = vmatprep.subr.bf16.mxu0 %v10050_v47  ;;  %v2232_v10 = vadd.f32 %v6557_v62, %v6535_v11  ;;  %v10062_v3 = vld [vmem:[%s11283_s1 + $0x30] sm:$0xff]   ;;  %v10080_v11 = vld [vmem:[%s11283_s1 + $0xf8] sm:$0xff]  }
 0x2ac   : > { %11628 = vst [vmem:[#allocation22_spill] sm:$0xff] %v10062_v3  ;;  %6838 = vmatpush3.bf16.msra.mxu0 %v10062_v3  ;;  %v10068_v13 = vld [vmem:[%s11283_s1 + $0xb0] sm:$0xff]   ;;  %11631 = vst [vmem:[#allocation24_spill] sm:$0xff] %v10080_v11 }
 0x2ad   : > { %11629 = vst [vmem:[#allocation23_spill] sm:$0xff] %v10068_v13  ;;  %6860 = vmatpush3.bf16.msra.mxu1 %v10068_v13  ;;  %6839 = vmatprep.subr.bf16.mxu0 %v10074_v17  ;;  %v5758_v62 = vld [vmem:[%s8462_s21 + $0xb0] sm:$0xff]  ;;  %v5759_v12 = vld [vmem:[%s8462_s21 + $0xb8] sm:$0xff] }
 0x2ae   : > { %6861 = vmatprep.subr.bf16.mxu1 %v10080_v11  ;;  %v10088_v13 = vld [vmem:[%s11283_s1 + $0x38] sm:$0xff]   ;;  %v10099_v11 = vcombine.high %v5758_v62, %v5758_v62  ;;  %v10101_v3 = vcombine.high %v5759_v12, %v5759_v12 }
 0x2af   : > { %v10094_v17 = vld [vmem:[%s11283_s1 + $0xb8] sm:$0xff]  }
 0x2b0   : > { %6840 = vmatpush3.bf16.msra.mxu0 %v10088_v13  ;;  %11632 = vst [vmem:[#allocation25_spill] sm:$0xff] %v10099_v11  ;;  %11633 = vst [vmem:[#allocation12_spill] sm:$0xff] %v10101_v3 }
 0x2b1   : > { %6862 = vmatpush3.bf16.msra.mxu1 %v10094_v17  ;;  %6869 = vmatprep.subr.bf16.mxu0 %v9585_v52 }
 0x2b2   : > { %6891 = vmatprep.subr.bf16.mxu1 %v9591_v26 }
 0x2b3   : > { %2875 = vmatmul.mubr.bf16.vlgmr.msra.gmra.mrb[76].mxu0 %v9713_v29 }
 0x2b4   : > { %2915 = vmatmul.mubr.bf16.vlgmr.msra.gmra.mrb[76].mxu1 %v9717_v46  ;;  %6870 = vmatpush3.bf16.msra.mxu0 %v9607_v45 }
 0x2b5   : > { %6892 = vmatpush3.bf16.msra.mxu1 %v9613_v27  ;;  %6871 = vmatprep.subr.bf16.mxu0 %v9619_v63 }
 0x2b6   : > { %6893 = vmatprep.subr.bf16.mxu1 %v9625_v54  ;;  %2977 = vmatprep.mubr.bf16.mxu0 %v10099_v11 }
 0x2b7   : > { %3017 = vmatprep.mubr.bf16.mxu1 %v10101_v3 }
 0x2b8   : > { %6872 = vmatpush3.bf16.msra.mxu0 %v9633_v25 }
 0x2b9   : > { %6894 = vmatpush3.bf16.msra.mxu1 %v9639_v56  ;;  %6873 = vmatprep.subr.bf16.mxu0 %v9645_v2 }
 0x2ba   : > { %6895 = vmatprep.subr.bf16.mxu1 %v9804_v38 }
 0x2bc   : > { %6874 = vmatpush3.bf16.msra.mxu0 %v9810_v42 }
 0x2bd   : > { %6896 = vmatpush3.bf16.msra.mxu1 %v9816_v1  ;;  %6875 = vmatprep.subr.bf16.mxu0 %v9822_v23 }
 0x2be   : > { %6897 = vmatprep.subr.bf16.mxu1 %v9828_v14 }
 0x2c0   : > { %6876 = vmatpush3.bf16.msra.mxu0 %v9834_v15 }
 0x2c1   : > { %6898 = vmatpush3.bf16.msra.mxu1 %v9840_v57  ;;  %6877 = vmatprep.subr.bf16.mxu0 %v9846_v4 }
 0x2c2   : > { %6899 = vmatprep.subr.bf16.mxu1 %v9852_v22 }
 0x2c4   : > { %6878 = vmatpush3.bf16.msra.mxu0 %v9858_v18 }
 0x2c5   : > { %6900 = vmatpush3.bf16.msra.mxu1 %v9864_v19  ;;  %6879 = vmatprep.subr.bf16.mxu0 %v9870_v9 }
 0x2c6   : > { %6901 = vmatprep.subr.bf16.mxu1 %v9876_v7  ;;  %v6577_v29 = vpop.f32.mrb[52].mxu0 }
 0x2c7   : > { %v6599_v46 = vpop.f32.mrb[52].mxu1  ;;  %v6578_v3 = vpop.f32.mrb[53].mxu0 }
 0x2c8   : > { %v6600_v11 = vpop.f32.mrb[53].mxu1  ;;  %v6579_v14 = vadd.f32 %v6578_v3, %v6577_v29  ;;  %v6580_v23 = vpop.f32.mrb[54].mxu0  ;;  %6880 = vmatpush3.bf16.msra.mxu0 %v9664_v59 }
 0x2c9   : > { %v6601_v15 = vadd.f32 %v6600_v11, %v6599_v46  ;;  %v6602_v57 = vpop.f32.mrb[54].mxu1  ;;  %6902 = vmatpush3.bf16.msra.mxu1 %v9670_v0  ;;  %v6581_v22 = vpop.f32.mrb[55].mxu0  ;;  %6881 = vmatprep.subr.bf16.mxu0 %v9676_v40 }
 0x2ca   : > { %v6603_v18 = vpop.f32.mrb[55].mxu1  ;;  %6903 = vmatprep.subr.bf16.mxu1 %v9682_v43  ;;  %v2286_v9 = vadd.f32 %v6579_v14, %v2232_v10  ;;  %v10136_v57 = vcombine.low %v5758_v62, %v5758_v62  ;;  %v10138_v22 = vcombine.low %v5759_v12, %v5759_v12  ;;  %v11641_v10 = vld [vmem:[#allocation9_spill] sm:$0xff] }
 0x2cc   : > { %v2326_v7 = vadd.f32 %v6601_v15, %v2286_v9  ;;  %6882 = vmatpush3.bf16.msra.mxu0 %v9689_v44  ;;  %11634 = vst [vmem:[#allocation28_spill] sm:$0xff] %v10136_v57  ;;  %11635 = vst [vmem:[#allocation29_spill] sm:$0xff] %v10138_v22  ;;  %v11638_v15 = vld [vmem:[#allocation27_spill] sm:$0xff]  ;;  %v11639_v9 = vld [vmem:[#allocation21_spill] sm:$0xff] }
 0x2cd   : > { %6904 = vmatpush3.bf16.msra.mxu1 %v9695_v53  ;;  %6883 = vmatprep.subr.bf16.mxu0 %v9701_v6 }
 0x2ce   : > { %6905 = vmatprep.subr.bf16.mxu1 %v9707_v50  ;;  %v2331_v23 = vadd.f32 %v9891_v8, %v2326_v7  ;;  %v11640_v7 = vld [vmem:[#allocation8_spill] sm:$0xff] }
 0x2d0   : > { %v2332_v18 = vmax.f32 %v2331_v23, 0.0  ;;  %6884 = vmatpush3.bf16.msra.mxu0 %v9722_v49 }
 0x2d1   : > { %6906 = vmatpush3.bf16.msra.mxu1 %v9728_v24  ;;  %6913 = vmatprep.subr.bf16.mxu0 %v9734_v51 }
 0x2d2   : > { %6935 = vmatprep.subr.bf16.mxu1 %v9908_v16  ;;  %v2333_v14 = vpack.c.bf16 %v2332_v18, %v2332_v18 }
 0x2d3   : > { %2978 = vmatmul.mubr.bf16.vlgmr.msra.gmra.mrb[80].mxu0 %v10136_v57 }
 0x2d4   : > { %3018 = vmatmul.mubr.bf16.vlgmr.msra.gmra.mrb[80].mxu1 %v10138_v22  ;;  %2334 = vst [vmem:[#allocation2 + $0x18] sm:$0xf] %v2333_v14  ;;  %6914 = vmatpush3.bf16.msra.mxu0 %v9916_v20 }
 0x2d5   : > { %6936 = vmatpush3.bf16.msra.mxu1 %v9922_v21  ;;  %6915 = vmatprep.subr.bf16.mxu0 %v9928_v31 }
 0x2d6   : > { %6937 = vmatprep.subr.bf16.mxu1 %v9934_v32  ;;  %3071 = vmatprep.mubr.bf16.mxu0 %v9784_v35  ;;  %v11636_v35 = vld [vmem:[#allocation20_spill] sm:$0xff] }
 0x2d7   : > { %3111 = vmatprep.mubr.bf16.mxu1 %v9788_v36  ;;  %v11637_v36 = vld [vmem:[#allocation26_spill] sm:$0xff] }
 0x2d8   : > { %6916 = vmatpush3.bf16.msra.mxu0 %v9942_v33 }
 0x2d9   : > { %6938 = vmatpush3.bf16.msra.mxu1 %v9948_v34  ;;  %6917 = vmatprep.subr.bf16.mxu0 %v9954_v55 }
 0x2da   : > { %6939 = vmatprep.subr.bf16.mxu1 %v9960_v28 }
 0x2dc   : > { %6918 = vmatpush3.bf16.msra.mxu0 %v9966_v5 }
 0x2dd   : > { %6940 = vmatpush3.bf16.msra.mxu1 %v9972_v58  ;;  %6919 = vmatprep.subr.bf16.mxu0 %v9978_v39 }
 0x2de   : > { %6941 = vmatprep.subr.bf16.mxu1 %v9984_v61 }
 0x2e0   : > { %6920 = vmatpush3.bf16.msra.mxu0 %v9990_v37 }
 0x2e1   : > { %6942 = vmatpush3.bf16.msra.mxu1 %v9996_v60  ;;  %6921 = vmatprep.subr.bf16.mxu0 %v11636_v35 }
 0x2e2   : > { %6943 = vmatprep.subr.bf16.mxu1 %v11637_v36 }
 0x2e4   : > { %6922 = vmatpush3.bf16.msra.mxu0 %v11638_v15 }
 0x2e5   : > { %6944 = vmatpush3.bf16.msra.mxu1 %v11639_v9  ;;  %6923 = vmatprep.subr.bf16.mxu0 %v11640_v7  ;;  %v11643_v7 = vld [vmem:[#allocation23_spill] sm:$0xff] }
 0x2e6   : > { %6945 = vmatprep.subr.bf16.mxu1 %v11641_v10  ;;  %v6621_v3 = vpop.f32.mrb[56].mxu0  ;;  %v11642_v10 = vld [vmem:[#allocation22_spill] sm:$0xff] }
 0x2e7   : > { %v6643_v11 = vpop.f32.mrb[56].mxu1  ;;  %v6622_v62 = vpop.f32.mrb[57].mxu0 }
 0x2e8   : > { %v6644_v12 = vpop.f32.mrb[57].mxu1  ;;  %v6623_v29 = vadd.f32 %v6622_v62, %v6621_v3  ;;  %v6624_v23 = vpop.f32.mrb[58].mxu0  ;;  %6924 = vmatpush3.bf16.msra.mxu0 %v10038_v30  ;;  %v11644_v3 = vld [vmem:[#allocation10_spill] sm:$0xff] }
 0x2e9   : > { %v6645_v46 = vadd.f32 %v6644_v12, %v6643_v11  ;;  %v6646_v18 = vpop.f32.mrb[58].mxu1  ;;  %6946 = vmatpush3.bf16.msra.mxu1 %v10044_v41  ;;  %v6625_v14 = vpop.f32.mrb[59].mxu0  ;;  %6925 = vmatprep.subr.bf16.mxu0 %v10050_v47  ;;  %v11645_v11 = vld [vmem:[#allocation24_spill] sm:$0xff]  ;;  %v5771_v12 = vld [vmem:[%s8462_s21 + $0xc8] sm:$0xff] }
 0x2ea   : > { %v6647_v22 = vpop.f32.mrb[59].mxu1  ;;  %6947 = vmatprep.subr.bf16.mxu1 %v10056_v48  ;;  %v5770_v62 = vld [vmem:[%s8462_s21 + $0xc0] sm:$0xff]  ;;  %v11649_v23 = vld [vmem:[#allocation19_spill] sm:$0xff] }
 0x2eb   : > { %v2429_v57 = vadd.f32 %v6645_v46, %v6623_v29  ;;  %v10182_v22 = vcombine.high %v5770_v62, %v5770_v62  ;;  %v10184_v29 = vcombine.high %v5771_v12, %v5771_v12  ;;  %v11648_v46 = vld [vmem:[#allocation16_spill] sm:$0xff]  ;;  %v11650_v18 = vld [vmem:[#allocation34_spill] sm:$0xff]  ;;  %v11651_v14 = vld [vmem:[#allocation35_spill] sm:$0xff] }
 0x2ec   : > { %6926 = vmatpush3.bf16.msra.mxu0 %v11642_v10 }
 0x2ed   : > { %6948 = vmatpush3.bf16.msra.mxu1 %v11643_v7  ;;  %6927 = vmatprep.subr.bf16.mxu0 %v11644_v3  ;;  %11646 = vst [vmem:[#allocation20_spill] sm:$0xff] %v10182_v22  ;;  %11647 = vst [vmem:[#allocation26_spill] sm:$0xff] %v10184_v29 }
 0x2ee   : > { %6949 = vmatprep.subr.bf16.mxu1 %v11645_v11 }
 0x2f0   : > { %6928 = vmatpush3.bf16.msra.mxu0 %v10088_v13 }
 0x2f1   : > { %6950 = vmatpush3.bf16.msra.mxu1 %v10094_v17  ;;  %6957 = vmatprep.subr.bf16.mxu0 %v9585_v52 }
 0x2f2   : > { %6979 = vmatprep.subr.bf16.mxu1 %v9591_v26 }
 0x2f3   : > { %3072 = vmatmul.mubr.bf16.vlgmr.msra.gmra.mrb[84].mxu0 %v11648_v46  ;;  %v11652_v46 = vld [vmem:[#allocation30_spill] sm:$0xff] }
 0x2f4   : > { %3112 = vmatmul.mubr.bf16.vlgmr.msra.gmra.mrb[84].mxu1 %v11649_v23  ;;  %6958 = vmatpush3.bf16.msra.mxu0 %v9607_v45  ;;  %v11653_v23 = vld [vmem:[#allocation17_spill] sm:$0xff] }
 0x2f5   : > { %6980 = vmatpush3.bf16.msra.mxu1 %v9613_v27  ;;  %6959 = vmatprep.subr.bf16.mxu0 %v9619_v63 }
 0x2f6   : > { %6981 = vmatprep.subr.bf16.mxu1 %v9625_v54  ;;  %3174 = vmatprep.mubr.bf16.mxu0 %v10182_v22  ;;  %v11655_v22 = vld [vmem:[#allocation37_spill] sm:$0xff] }
 0x2f7   : > { %3214 = vmatprep.mubr.bf16.mxu1 %v10184_v29  ;;  %v11654_v29 = vld [vmem:[#allocation36_spill] sm:$0xff] }
 0x2f8   : > { %6960 = vmatpush3.bf16.msra.mxu0 %v9633_v25 }
 0x2f9   : > { %6982 = vmatpush3.bf16.msra.mxu1 %v9639_v56  ;;  %6961 = vmatprep.subr.bf16.mxu0 %v9645_v2 }
 0x2fa   : > { %6983 = vmatprep.subr.bf16.mxu1 %v9804_v38  ;;  %v11656_v38 = vld [vmem:[#allocation14_spill] sm:$0xff] }
 0x2fc   : > { %6962 = vmatpush3.bf16.msra.mxu0 %v9810_v42  ;;  %v11657_v42 = vld [vmem:[#allocation15_spill] sm:$0xff] }
 0x2fd   : > { %6984 = vmatpush3.bf16.msra.mxu1 %v9816_v1  ;;  %6963 = vmatprep.subr.bf16.mxu0 %v11650_v18 }
 0x2fe   : > { %6985 = vmatprep.subr.bf16.mxu1 %v11651_v14 }
 0x300   : > { %6964 = vmatpush3.bf16.msra.mxu0 %v11652_v46 }
 0x301   : > { %6986 = vmatpush3.bf16.msra.mxu1 %v11653_v23  ;;  %6965 = vmatprep.subr.bf16.mxu0 %v9846_v4 }
 0x302   : > { %6987 = vmatprep.subr.bf16.mxu1 %v11654_v29 }
 0x304   : > { %6966 = vmatpush3.bf16.msra.mxu0 %v11655_v22 }
 0x305   : > { %6988 = vmatpush3.bf16.msra.mxu1 %v9864_v19  ;;  %6967 = vmatprep.subr.bf16.mxu0 %v11656_v38 }
 0x306   : > { %6989 = vmatprep.subr.bf16.mxu1 %v11657_v42  ;;  %v6665_v1 = vpop.f32.mrb[60].mxu0 }
 0x307   : > { %v6687_v18 = vpop.f32.mrb[60].mxu1  ;;  %v6666_v2 = vpop.f32.mrb[61].mxu0 }
 0x308   : > { %v6688_v14 = vpop.f32.mrb[61].mxu1  ;;  %v6667_v56 = vadd.f32 %v6666_v2, %v6665_v1  ;;  %v6668_v25 = vpop.f32.mrb[62].mxu0  ;;  %6968 = vmatpush3.bf16.msra.mxu0 %v9664_v59  ;;  %v10219_v2 = vcombine.low %v5770_v62, %v5770_v62  ;;  %v10221_v1 = vcombine.low %v5771_v12, %v5771_v12  ;;  %v11661_v62 = vld [vmem:[#allocation9_spill] sm:$0xff] }
 0x309   : > { %v6689_v46 = vadd.f32 %v6688_v14, %v6687_v18  ;;  %v6690_v23 = vpop.f32.mrb[62].mxu1  ;;  %6990 = vmatpush3.bf16.msra.mxu1 %v9670_v0  ;;  %v6669_v29 = vpop.f32.mrb[63].mxu0  ;;  %6969 = vmatprep.subr.bf16.mxu0 %v9676_v40 }
 0x30a   : > { %v6691_v22 = vpop.f32.mrb[63].mxu1  ;;  %6991 = vmatprep.subr.bf16.mxu1 %v9682_v43  ;;  %v2483_v38 = vadd.f32 %v6667_v56, %v2429_v57  ;;  %v11660_v57 = vld [vmem:[#allocation8_spill] sm:$0xff] }
 0x30c   : > { %v2523_v42 = vadd.f32 %v6689_v46, %v2483_v38  ;;  %6970 = vmatpush3.bf16.msra.mxu0 %v9689_v44  ;;  %v11658_v38 = vld [vmem:[#allocation25_spill] sm:$0xff] }
 0x30d   : > { %6992 = vmatpush3.bf16.msra.mxu1 %v9695_v53  ;;  %6971 = vmatprep.subr.bf16.mxu0 %v9701_v6 }
 0x30e   : > { %6993 = vmatprep.subr.bf16.mxu1 %v9707_v50  ;;  %v2528_v25 = vadd.f32 %v9891_v8, %v2523_v42  ;;  %v11659_v42 = vld [vmem:[#allocation12_spill] sm:$0xff] }
 0x310   : > { %v2529_v22 = vmax.f32 %v2528_v25, 0.0  ;;  %6972 = vmatpush3.bf16.msra.mxu0 %v9722_v49 }
 0x311   : > { %6994 = vmatpush3.bf16.msra.mxu1 %v9728_v24  ;;  %7001 = vmatprep.subr.bf16.mxu0 %v9734_v51 }
 0x312   : > { %7023 = vmatprep.subr.bf16.mxu1 %v9908_v16  ;;  %v2530_v56 = vpack.c.bf16 %v2529_v22, %v2529_v22 }
 0x313   : > { %3175 = vmatmul.mubr.bf16.vlgmr.msra.gmra.mrb[88].mxu0 %v10219_v2 }
 0x314   : > { %3215 = vmatmul.mubr.bf16.vlgmr.msra.gmra.mrb[88].mxu1 %v10221_v1  ;;  %2531 = vst [vmem:[#allocation2 + $0x1c] sm:$0xf] %v2530_v56  ;;  %7002 = vmatpush3.bf16.msra.mxu0 %v9916_v20 }
 0x315   : > { %7024 = vmatpush3.bf16.msra.mxu1 %v9922_v21  ;;  %7003 = vmatprep.subr.bf16.mxu0 %v9928_v31 }
 0x316   : > { %7025 = vmatprep.subr.bf16.mxu1 %v9934_v32  ;;  %3268 = vmatprep.mubr.bf16.mxu0 %v11658_v38 }
 0x317   : > { %3308 = vmatprep.mubr.bf16.mxu1 %v11659_v42 }
 0x318   : > { %7004 = vmatpush3.bf16.msra.mxu0 %v9942_v33 }
 0x319   : > { %7026 = vmatpush3.bf16.msra.mxu1 %v9948_v34  ;;  %7005 = vmatprep.subr.bf16.mxu0 %v9954_v55 }
 0x31a   : > { %7027 = vmatprep.subr.bf16.mxu1 %v9960_v28 }
 0x31c   : > { %7006 = vmatpush3.bf16.msra.mxu0 %v9966_v5 }
 0x31d   : > { %7028 = vmatpush3.bf16.msra.mxu1 %v9972_v58  ;;  %7007 = vmatprep.subr.bf16.mxu0 %v9978_v39 }
 0x31e   : > { %7029 = vmatprep.subr.bf16.mxu1 %v9984_v61 }
 0x320   : > { %7008 = vmatpush3.bf16.msra.mxu0 %v9990_v37 }
 0x321   : > { %7030 = vmatpush3.bf16.msra.mxu1 %v9996_v60  ;;  %7009 = vmatprep.subr.bf16.mxu0 %v11636_v35 }
 0x322   : > { %7031 = vmatprep.subr.bf16.mxu1 %v11637_v36 }
 0x324   : > { %7010 = vmatpush3.bf16.msra.mxu0 %v11638_v15 }
 0x325   : > { %7032 = vmatpush3.bf16.msra.mxu1 %v11639_v9  ;;  %7011 = vmatprep.subr.bf16.mxu0 %v11660_v57 }
 0x326   : > { %7033 = vmatprep.subr.bf16.mxu1 %v11661_v62  ;;  %v6709_v12 = vpop.f32.mrb[64].mxu0 }
 0x327   : > { %v6731_v29 = vpop.f32.mrb[64].mxu1  ;;  %v6710_v18 = vpop.f32.mrb[65].mxu0 }
 0x328   : > { %v6732_v14 = vpop.f32.mrb[65].mxu1  ;;  %v6711_v46 = vadd.f32 %v6710_v18, %v6709_v12  ;;  %v6712_v25 = vpop.f32.mrb[66].mxu0  ;;  %7012 = vmatpush3.bf16.msra.mxu0 %v10038_v30  ;;  %v5782_v12 = vld [vmem:[%s8462_s21 + $0xd0] sm:$0xff] }
 0x329   : > { %v6733_v23 = vadd.f32 %v6732_v14, %v6731_v29  ;;  %v6734_v22 = vpop.f32.mrb[66].mxu1  ;;  %7034 = vmatpush3.bf16.msra.mxu1 %v10044_v41  ;;  %v6713_v56 = vpop.f32.mrb[67].mxu0  ;;  %7013 = vmatprep.subr.bf16.mxu0 %v10050_v47  ;;  %v5783_v29 = vld [vmem:[%s8462_s21 + $0xd8] sm:$0xff]  ;;  %v10265_v18 = vcombine.high %v5782_v12, %v5782_v12  ;;  %v11668_v25 = vld [vmem:[#allocation32_spill] sm:$0xff] }
 0x32a   : > { %v6735_v38 = vpop.f32.mrb[67].mxu1  ;;  %7035 = vmatprep.subr.bf16.mxu1 %v10056_v48  ;;  %v10267_v14 = vcombine.high %v5783_v29, %v5783_v29  ;;  %v11669_v22 = vld [vmem:[#allocation33_spill] sm:$0xff]  ;;  %v11670_v56 = vld [vmem:[#allocation11_spill] sm:$0xff] }
 0x32b   : > { %v2626_v42 = vadd.f32 %v6733_v23, %v6711_v46  ;;  %11662 = vst [vmem:[#allocation27_spill] sm:$0xff] %v10265_v18  ;;  %v11664_v46 = vld [vmem:[#allocation28_spill] sm:$0xff]  ;;  %v11665_v23 = vld [vmem:[#allocation29_spill] sm:$0xff] }
 0x32c   : > { %7014 = vmatpush3.bf16.msra.mxu0 %v11642_v10  ;;  %11663 = vst [vmem:[#allocation21_spill] sm:$0xff] %v10267_v14  ;;  %v11675_v38 = vld [vmem:[#allocation17_spill] sm:$0xff] }
 0x32d   : > { %7036 = vmatpush3.bf16.msra.mxu1 %v11643_v7  ;;  %7015 = vmatprep.subr.bf16.mxu0 %v11644_v3 }
 0x32e   : > { %7037 = vmatprep.subr.bf16.mxu1 %v11645_v11 }
 0x330   : > { %7016 = vmatpush3.bf16.msra.mxu0 %v10088_v13 }
 0x331   : > { %7038 = vmatpush3.bf16.msra.mxu1 %v10094_v17  ;;  %7045 = vmatprep.subr.bf16.mxu0 %v9585_v52  ;;  %v11666_v52 = vld [vmem:[#allocation18_spill] sm:$0xff] }
 0x332   : > { %7067 = vmatprep.subr.bf16.mxu1 %v9591_v26  ;;  %v11667_v26 = vld [vmem:[#allocation31_spill] sm:$0xff] }
 0x333   : > { %3269 = vmatmul.mubr.bf16.vlgmr.msra.gmra.mrb[92].mxu0 %v11664_v46  ;;  %v11676_v46 = vld [vmem:[#allocation36_spill] sm:$0xff] }
 0x334   : > { %3309 = vmatmul.mubr.bf16.vlgmr.msra.gmra.mrb[92].mxu1 %v11665_v23  ;;  %7046 = vmatpush3.bf16.msra.mxu0 %v9607_v45  ;;  %v11671_v45 = vld [vmem:[#allocation13_spill] sm:$0xff] }
 0x335   : > { %7068 = vmatpush3.bf16.msra.mxu1 %v9613_v27  ;;  %7047 = vmatprep.subr.bf16.mxu0 %v9619_v63  ;;  %v11672_v27 = vld [vmem:[#allocation34_spill] sm:$0xff]  ;;  %v11673_v63 = vld [vmem:[#allocation35_spill] sm:$0xff]  ;;  %v11677_v23 = vld [vmem:[#allocation37_spill] sm:$0xff] }
 0x336   : > { %7069 = vmatprep.subr.bf16.mxu1 %v9625_v54  ;;  %3371 = vmatprep.mubr.bf16.mxu0 %v10265_v18  ;;  %v11674_v54 = vld [vmem:[#allocation30_spill] sm:$0xff] }
 0x337   : > { %3411 = vmatprep.mubr.bf16.mxu1 %v10267_v14 }
 0x338   : > { %7048 = vmatpush3.bf16.msra.mxu0 %v11666_v52  ;;  %v11678_v52 = vld [vmem:[#allocation14_spill] sm:$0xff] }
 0x339   : > { %7070 = vmatpush3.bf16.msra.mxu1 %v11667_v26  ;;  %7049 = vmatprep.subr.bf16.mxu0 %v11668_v25  ;;  %v11679_v26 = vld [vmem:[#allocation15_spill] sm:$0xff] }
 0x33a   : > { %7071 = vmatprep.subr.bf16.mxu1 %v11669_v22 }
 0x33c   : > { %7050 = vmatpush3.bf16.msra.mxu0 %v11670_v56 }
 0x33d   : > { %7072 = vmatpush3.bf16.msra.mxu1 %v11671_v45  ;;  %7051 = vmatprep.subr.bf16.mxu0 %v11672_v27 }
 0x33e   : > { %7073 = vmatprep.subr.bf16.mxu1 %v11673_v63 }
 0x340   : > { %7052 = vmatpush3.bf16.msra.mxu0 %v11674_v54 }
 0x341   : > { %7074 = vmatpush3.bf16.msra.mxu1 %v11675_v38  ;;  %7053 = vmatprep.subr.bf16.mxu0 %v9846_v4 }
 0x342   : > { %7075 = vmatprep.subr.bf16.mxu1 %v11676_v46 }
 0x344   : > { %7054 = vmatpush3.bf16.msra.mxu0 %v11677_v23 }
 0x345   : > { %7076 = vmatpush3.bf16.msra.mxu1 %v9864_v19  ;;  %7055 = vmatprep.subr.bf16.mxu0 %v11678_v52 }
 0x346   : > { %7077 = vmatprep.subr.bf16.mxu1 %v11679_v26  ;;  %v6753_v25 = vpop.f32.mrb[68].mxu0 }
 0x347   : > { %v6775_v14 = vpop.f32.mrb[68].mxu1  ;;  %v6754_v18 = vpop.f32.mrb[69].mxu0 }
 0x348   : > { %v6776_v63 = vpop.f32.mrb[69].mxu1  ;;  %v6755_v27 = vadd.f32 %v6754_v18, %v6753_v25  ;;  %v6756_v45 = vpop.f32.mrb[70].mxu0  ;;  %7056 = vmatpush3.bf16.msra.mxu0 %v9664_v59  ;;  %v10302_v18 = vcombine.low %v5782_v12, %v5782_v12  ;;  %v8007_v25 = vld [vmem:[%s11284_s2 + $0x80] sm:$0xff]  }
 0x349   : > { %v6777_v54 = vadd.f32 %v6776_v63, %v6775_v14  ;;  %v6778_v38 = vpop.f32.mrb[70].mxu1  ;;  %7078 = vmatpush3.bf16.msra.mxu1 %v9670_v0  ;;  %v6757_v46 = vpop.f32.mrb[71].mxu0  ;;  %7057 = vmatprep.subr.bf16.mxu0 %v9676_v40  ;;  %v10304_v0 = vcombine.low %v5783_v29, %v5783_v29  ;;  %v10345_v63 = vld [vmem:[%s8462_s21 + $0xe0] sm:$0xff] }
 0x34a   : > { %v6779_v23 = vpop.f32.mrb[71].mxu1  ;;  %7079 = vmatprep.subr.bf16.mxu1 %v9682_v43  ;;  %v2680_v52 = vadd.f32 %v6755_v27, %v2626_v42  ;;  %v11680_v43 = vld [vmem:[#allocation20_spill] sm:$0xff] }
 0x34b   : > { %v8004_v38 = vld [vmem:[%s11284_s2 + $0x40] sm:$0xff]   ;;  %v5797_v23 = vcombine.high %v10345_v63, %v10345_v63 }
 0x34c   : > { %v2720_v26 = vadd.f32 %v6777_v54, %v2680_v52  ;;  %7058 = vmatpush3.bf16.msra.mxu0 %v9689_v44  ;;  %v11681_v44 = vld [vmem:[#allocation26_spill] sm:$0xff]  ;;  %v10348_v54 = vld [vmem:[%s8462_s21 + $0xe8] sm:$0xff]  ;;  %s435_s21 = scalar_lea.vmem [#allocation5], %s5572_s27  ;;  %s8029_s27 = sshll.u32 %s8091_s30, 4  ;;  %s8030_s27 = int_to_ptr.vmem [resolvable:$false] %s8029_s27 }
 0x34d   : > { %7080 = vmatpush3.bf16.msra.mxu1 %v9695_v53  ;;  %7059 = vmatprep.subr.bf16.mxu0 %v9701_v6  ;;  %v8005_v46 = vld [vmem:[%s11284_s2 + $0xc0] sm:$0xff]   ;;  %v5799_v52 = vcombine.high %v10348_v54, %v10348_v54  ;;  %s5501_s11 = sshll.u32 %s435_s21, 4  ;;  %s8031_s28 = scalar_lea.vmem %s8030_s27, 1024  ;;  %s11240_s11 = int_to_ptr.vmem [resolvable:$true] %s5501_s11 }
 0x34e   : > { %7081 = vmatprep.subr.bf16.mxu1 %v9707_v50  ;;  %v2725_v59 = vadd.f32 %v9891_v8, %v2720_v26  ;;  %v8006_v26 = vld [vmem:[%s11284_s2] sm:$0xff]   ;;  %s8025_s26 = scalar_lea.vmem %s11240_s11, 512  ;;  %p8032_p2 = scmp.lt.s32.totalorder %s11240_s11, %s8030_s27 }
 0x34f   : > { %p8026_p13 = scmp.ne.s32.totalorder %s11240_s11, %s8025_s26  ;;  %p8033_p3 = scmp.lt.s32.totalorder %s8031_s28, %s8025_s26 }
 0x350   : > { %v2726_v14 = vmax.f32 %v2725_v59, 0.0  ;;  %7060 = vmatpush3.bf16.msra.mxu0 %v9722_v49  ;;  %v8008_v59 = vld [vmem:[%s11284_s2 + $0x48] sm:$0xff]  }
 0x351   : > { %7082 = vmatpush3.bf16.msra.mxu1 %v9728_v24  ;;  %7089 = vmatprep.subr.bf16.mxu0 %v9734_v51  ;;  %p8027_p0 = pnand %p8026_p13, %p8185_p6  ;;  %p8034_p4 = por %p8033_p3, %p8032_p2 }
 0x352   : > { %7111 = vmatprep.subr.bf16.mxu1 %v9908_v16  ;;  %v2727_v40 = vpack.c.bf16 %v2726_v14, %v2726_v14  ;;  %v8011_v14 = vld [vmem:[%s11284_s2 + $0x88] sm:$0xff]  }
 0x353   : > { %3372 = vmatmul.mubr.bf16.vlgmr.msra.gmra.mrb[96].mxu0 %v10302_v18  ;;  %p8028_p1 = pneg %p8027_p0 }
 0x354   : > { %3412 = vmatmul.mubr.bf16.vlgmr.msra.gmra.mrb[96].mxu1 %v10304_v0  ;;  %2728 = vst [vmem:[#allocation2 + $0x20] sm:$0xf] %v2727_v40  ;;  %7090 = vmatpush3.bf16.msra.mxu0 %v9916_v20  ;;  %v8012_v40 = vld [vmem:[%s11284_s2 + $0x50] sm:$0xff]  }
 0x355   : > { %7112 = vmatpush3.bf16.msra.mxu1 %v9922_v21  ;;  %7091 = vmatprep.subr.bf16.mxu0 %v9928_v31  ;;  %p8035_p5 = pnand %p8034_p4, %p8028_p1 }
 0x356   : > { %7113 = vmatprep.subr.bf16.mxu1 %v9934_v32  ;;  %3465 = vmatprep.mubr.bf16.mxu0 %v11680_v43  ;;  %v11682_v43 = vld [vmem:[#allocation13_spill] sm:$0xff] }
 0x357   : > { %3505 = vmatprep.mubr.bf16.mxu1 %v11681_v44  ;;  %v11683_v44 = vld [vmem:[#allocation34_spill] sm:$0xff] }
 0x358   : > { %7092 = vmatpush3.bf16.msra.mxu0 %v9942_v33 }
 0x359   : > { %7114 = vmatpush3.bf16.msra.mxu1 %v9948_v34  ;;  %7093 = vmatprep.subr.bf16.mxu0 %v9954_v55 }
 0x35a   : > { %7115 = vmatprep.subr.bf16.mxu1 %v9960_v28 }
 0x35c   : > { %7094 = vmatpush3.bf16.msra.mxu0 %v9966_v5 }
 0x35d   : > { %7116 = vmatpush3.bf16.msra.mxu1 %v9972_v58  ;;  %7095 = vmatprep.subr.bf16.mxu0 %v9978_v39 }
 0x35e   : > { %7117 = vmatprep.subr.bf16.mxu1 %v9984_v61 }
 0x360   : > { %7096 = vmatpush3.bf16.msra.mxu0 %v9990_v37 }
 0x361   : > { %7118 = vmatpush3.bf16.msra.mxu1 %v9996_v60  ;;  %7097 = vmatprep.subr.bf16.mxu0 %v11636_v35 }
 0x362   : > { %7119 = vmatprep.subr.bf16.mxu1 %v11637_v36 }
 0x364   : > { %7098 = vmatpush3.bf16.msra.mxu0 %v11638_v15 }
 0x365   : > { %7120 = vmatpush3.bf16.msra.mxu1 %v11639_v9  ;;  %7099 = vmatprep.subr.bf16.mxu0 %v11660_v57 }
 0x366   : > { %7121 = vmatprep.subr.bf16.mxu1 %v11661_v62  ;;  %v6797_v53 = vpop.f32.mrb[72].mxu0 }
 0x367   : > { %v6819_v6 = vpop.f32.mrb[72].mxu1  ;;  %v6798_v50 = vpop.f32.mrb[73].mxu0 }
 0x368   : > { %v6820_v49 = vpop.f32.mrb[73].mxu1  ;;  %v6799_v24 = vadd.f32 %v6798_v50, %v6797_v53  ;;  %v6800_v42 = vpop.f32.mrb[74].mxu0  ;;  %7100 = vmatpush3.bf16.msra.mxu0 %v10038_v30  ;;  %v11684_v53 = vld [vmem:[#allocation35_spill] sm:$0xff]  ;;  %v11686_v50 = vld [vmem:[#allocation17_spill] sm:$0xff] }
 0x369   : > { %v6821_v51 = vadd.f32 %v6820_v49, %v6819_v6  ;;  %v6822_v12 = vpop.f32.mrb[74].mxu1  ;;  %7122 = vmatpush3.bf16.msra.mxu1 %v10044_v41  ;;  %v6801_v29 = vpop.f32.mrb[75].mxu0  ;;  %7101 = vmatprep.subr.bf16.mxu0 %v10050_v47  ;;  %v11685_v6 = vld [vmem:[#allocation30_spill] sm:$0xff]  ;;  %v11687_v49 = vld [vmem:[#allocation36_spill] sm:$0xff] }
 0x36a   : > { %v6823_v45 = vpop.f32.mrb[75].mxu1  ;;  %7123 = vmatprep.subr.bf16.mxu1 %v10056_v48 }
 0x36b   : > { %v10338_v27 = vadd.f32 %v6821_v51, %v6799_v24  ;;  %v11688_v24 = vld [vmem:[#allocation37_spill] sm:$0xff] }
 0x36c   : > { %7102 = vmatpush3.bf16.msra.mxu0 %v11642_v10 }
 0x36d   : > { %7124 = vmatpush3.bf16.msra.mxu1 %v11643_v7  ;;  %7103 = vmatprep.subr.bf16.mxu0 %v11644_v3 }
 0x36e   : > { %7125 = vmatprep.subr.bf16.mxu1 %v11645_v11 }
 0x370   : > { %7104 = vmatpush3.bf16.msra.mxu0 %v10088_v13 }
 0x371   : > { %7126 = vmatpush3.bf16.msra.mxu1 %v10094_v17  ;;  %7133 = vmatprep.subr.bf16.mxu0 %v8004_v38 }
 0x372   : > { %7155 = vmatprep.subr.bf16.mxu1 %v8005_v46 }
 0x373   : > { %3466 = vmatmul.mubr.bf16.vlgmr.msra.gmra.mrb[100].mxu0 %v10219_v2  ;;  %v8009_v2 = vld [vmem:[%s11284_s2 + $0xc8] sm:$0xff]  }
 0x374   : > { %3506 = vmatmul.mubr.bf16.vlgmr.msra.gmra.mrb[100].mxu1 %v10221_v1  ;;  %7134 = vmatpush3.bf16.msra.mxu0 %v8006_v26  ;;  %v8010_v1 = vld [vmem:[%s11284_s2 + $0x8] sm:$0xff]  }
 0x375   : > { %7156 = vmatpush3.bf16.msra.mxu1 %v8007_v25  ;;  %7135 = vmatprep.subr.bf16.mxu0 %v8008_v59  ;;  %v8015_v25 = vld [vmem:[%s11284_s2 + $0x70] sm:$0xff]  }
 0x376   : > { %7157 = vmatprep.subr.bf16.mxu1 %v8009_v2  ;;  %3568 = vmatprep.mubr.bf16.mxu0 %v5797_v23  ;;  %v8016_v59 = vld [vmem:[%s11284_s2 + $0xf0] sm:$0xff]  }
 0x377   : > { %3608 = vmatprep.mubr.bf16.mxu1 %v5799_v52 }
 0x378   : > { %7136 = vmatpush3.bf16.msra.mxu0 %v8010_v1 }
 0x379   : > { %7158 = vmatpush3.bf16.msra.mxu1 %v8011_v14  ;;  %7137 = vmatprep.subr.bf16.mxu0 %v8012_v40  ;;  %v8017_v14 = vld [vmem:[%s11284_s2 + $0x30] sm:$0xff]  }
 0x37a   : > { %7159 = vmatprep.subr.bf16.mxu1 %v11669_v22  ;;  %v11689_v22 = vld [vmem:[#allocation14_spill] sm:$0xff] }
 0x37b   : > { %v8018_v40 = vld [vmem:[%s11284_s2 + $0xb0] sm:$0xff]  }
 0x37c   : > { %7138 = vmatpush3.bf16.msra.mxu0 %v11670_v56  ;;  %v11690_v56 = vld [vmem:[#allocation15_spill] sm:$0xff] }
 0x37d   : > { %7160 = vmatpush3.bf16.msra.mxu1 %v11682_v43  ;;  %7139 = vmatprep.subr.bf16.mxu0 %v11683_v44  ;;  %v8019_v43 = vld [vmem:[%s11284_s2 + $0x78] sm:$0xff]  }
 0x37e   : > { %7161 = vmatprep.subr.bf16.mxu1 %v11684_v53  ;;  %v5796_v53 = vcombine.low %v10345_v63, %v10345_v63 }
 0x380   : > { %7140 = vmatpush3.bf16.msra.mxu0 %v11685_v6  ;;  %v5798_v6 = vcombine.low %v10348_v54, %v10348_v54  ;;  %v11691_v54 = vld [vmem:[#allocation27_spill] sm:$0xff] }
 0x381   : > { %7162 = vmatpush3.bf16.msra.mxu1 %v11686_v50  ;;  %7141 = vmatprep.subr.bf16.mxu0 %v9846_v4  ;;  %v8013_v4 = vld [vmem:[%s11284_s2 + $0x28] sm:$0xff]  }
 0x382   : > { %7163 = vmatprep.subr.bf16.mxu1 %v11687_v49  ;;  %v8021_v49 = vld [vmem:[%s11284_s2 + $0x38] sm:$0xff]  }
 0x384   : > { %7142 = vmatpush3.bf16.msra.mxu0 %v11688_v24  ;;  %v8022_v24 = vld [vmem:[%s11284_s2 + $0xb8] sm:$0xff]  }
 0x385   : > { %7164 = vmatpush3.bf16.msra.mxu1 %v9864_v19  ;;  %7143 = vmatprep.subr.bf16.mxu0 %v11689_v22  ;;  %v8014_v19 = vld [vmem:[%s11284_s2 + $0xa8] sm:$0xff]  }
 0x386   : > { %7165 = vmatprep.subr.bf16.mxu1 %v11690_v56  ;;  %v6841_v51 = vpop.f32.mrb[76].mxu0  ;;  %v11692_v22 = vld [vmem:[#allocation21_spill] sm:$0xff]  ;;  %v10593_v56 = vld [vmem:[%s11286_s4 + $0x20] sm:$0xff]  }
 0x387   : > { %v6863_v42 = vpop.f32.mrb[76].mxu1  ;;  %v6842_v12 = vpop.f32.mrb[77].mxu0 }
 0x388   : > { %v6864_v29 = vpop.f32.mrb[77].mxu1  ;;  %v6843_v45 = vadd.f32 %v6842_v12, %v6841_v51  ;;  %v6844_v46 = vpop.f32.mrb[78].mxu0  ;;  %7144 = vmatpush3.bf16.msra.mxu0 %v8013_v4  ;;  %v10600_v51 = vld [vmem:[%s11286_s4 + $0xa0] sm:$0xff]   ;;  %v10611_v12 = vld [vmem:[%s11286_s4 + $0xe8] sm:$0xff]   ;;  %v10635_v4 = vld [vmem:[%s11286_s4 + $0xf0] sm:$0xff]  }
 0x389   : > { %v6865_v38 = vadd.f32 %v6864_v29, %v6863_v42  ;;  %v6866_v23 = vpop.f32.mrb[78].mxu1  ;;  %7166 = vmatpush3.bf16.msra.mxu1 %v8014_v19  ;;  %v6845_v52 = vpop.f32.mrb[79].mxu0  ;;  %7145 = vmatprep.subr.bf16.mxu0 %v8015_v25  ;;  %v10605_v42 = vld [vmem:[%s11286_s4 + $0x68] sm:$0xff]  }
 0x38a   : > { %v6867_v26 = vpop.f32.mrb[79].mxu1  ;;  %7167 = vmatprep.subr.bf16.mxu1 %v8016_v59  ;;  %v2877_v2 = vadd.f32 %v6843_v45, %v10338_v27  ;;  %v8020_v27 = vld [vmem:[%s11284_s2 + $0xf8] sm:$0xff]   ;;  %v10617_v29 = vld [vmem:[%s11286_s4 + $0x28] sm:$0xff]  }
 0x38b   : > { %v10624_v45 = vld [vmem:[%s11286_s4 + $0xa8] sm:$0xff]  }
 0x38c   : > { %v2917_v1 = vadd.f32 %v6865_v38, %v2877_v2  ;;  %7146 = vmatpush3.bf16.msra.mxu0 %v8017_v14  ;;  %v10629_v38 = vld [vmem:[%s11286_s4 + $0x70] sm:$0xff]  }
 0x38d   : > { %7168 = vmatpush3.bf16.msra.mxu1 %v8018_v40  ;;  %7147 = vmatprep.subr.bf16.mxu0 %v8019_v43  ;;  %v10648_v43 = vld [vmem:[%s11286_s4 + $0xb0] sm:$0xff]  }
 0x38e   : > { %7169 = vmatprep.subr.bf16.mxu1 %v8020_v27  ;;  %v2922_v44 = vadd.f32 %v9891_v8, %v2917_v1  ;;  %v8023_v8 = vld [vmem:[%s11283_s1 + $0x40] sm:$0xff]   ;;  %v10641_v1 = vld [vmem:[%s11286_s4 + $0x30] sm:$0xff]   ;;  %v10653_v27 = vld [vmem:[%s11286_s4 + $0x78] sm:$0xff]  }
 0x390   : > { %v2923_v50 = vmax.f32 %v2922_v44, 0.0  ;;  %7148 = vmatpush3.bf16.msra.mxu0 %v8021_v49  ;;  %v10673_v49 = vld [vmem:[%s11286_s4 + $0xb8] sm:$0xff]  }
 0x391   : > { %7170 = vmatpush3.bf16.msra.mxu1 %v8022_v24  ;;  %7177 = vmatprep.subr.bf16.mxu0 %v8023_v8  ;;  %v10678_v24 = vld [vmem:[%s11285_s3] ss:$0 sm:$0xff] }
 0x392   : > { %7199 = vmatprep.subr.bf16.mxu1 %v9908_v16  ;;  %v2924_v63 = vpack.c.bf16 %v2923_v50, %v2923_v50  ;;  %v10666_v50 = vld [vmem:[%s11286_s4 + $0x38] sm:$0xff]  }
 0x393   : > { %3569 = vmatmul.mubr.bf16.vlgmr.msra.gmra.mrb[104].mxu0 %v5796_v53  ;;  %v10660_v53 = vld [vmem:[%s11286_s4 + $0xf8] sm:$0xff]  }
 0x394   : > { %3609 = vmatmul.mubr.bf16.vlgmr.msra.gmra.mrb[104].mxu1 %v5798_v6  ;;  %2925 = vst [vmem:[#allocation2 + $0x24] sm:$0xf] %v2924_v63  ;;  %7178 = vmatpush3.bf16.msra.mxu0 %v9916_v20 }
 0x395   : > { %7200 = vmatpush3.bf16.msra.mxu1 %v9922_v21  ;;  %7179 = vmatprep.subr.bf16.mxu0 %v9928_v31 }
 0x396   : > { %7201 = vmatprep.subr.bf16.mxu1 %v9934_v32  ;;  %3662 = vmatprep.mubr.bf16.mxu0 %v11691_v54 }
 0x397   : > { %3702 = vmatprep.mubr.bf16.mxu1 %v11692_v22  ;;  %v4078_v22 = vld [vmem:[#allocation2 + $0x10] sm:$0xff] }
 0x398   : > { %7180 = vmatpush3.bf16.msra.mxu0 %v9942_v33 }
 0x399   : > { %7202 = vmatpush3.bf16.msra.mxu1 %v9948_v34  ;;  %7181 = vmatprep.subr.bf16.mxu0 %v9954_v55 }
 0x39a   : > { %7203 = vmatprep.subr.bf16.mxu1 %v9960_v28 }
 0x39c   : > { %7182 = vmatpush3.bf16.msra.mxu0 %v9966_v5 }
 0x39d   : > { %7204 = vmatpush3.bf16.msra.mxu1 %v9972_v58  ;;  %7183 = vmatprep.subr.bf16.mxu0 %v9978_v39  ;;  %v10473_v39 = vld [vmem:[%s11286_s4 + $0x40] sm:$0xff]  }
 0x39e   : > { %7205 = vmatprep.subr.bf16.mxu1 %v9984_v61  ;;  %v10478_v61 = vld [vmem:[%s11286_s4 + $0xc0] sm:$0xff]  }
 0x3a0   : > { %7184 = vmatpush3.bf16.msra.mxu0 %v9990_v37  ;;  %v10480_v37 = vld [vmem:[#allocation2] sm:$0xff] }
 0x3a1   : > { %7206 = vmatpush3.bf16.msra.mxu1 %v9996_v60  ;;  %7185 = vmatprep.subr.bf16.mxu0 %v11636_v35  ;;  %v10487_v60 = vld [vmem:[%s11286_s4] sm:$0xff]   ;;  %v10520_v35 = vld [vmem:[%s11286_s4 + $0x8] sm:$0xff]   ;;  %v5805_v54 = vcombine.low %v10480_v37, %v10480_v37 }
 0x3a2   : > { %7207 = vmatprep.subr.bf16.mxu1 %v11637_v36  ;;  %v10527_v36 = vld [vmem:[%s11286_s4 + $0x88] sm:$0xff]  }
 0x3a4   : > { %7186 = vmatpush3.bf16.msra.mxu0 %v11638_v15  ;;  %v10532_v15 = vld [vmem:[%s11286_s4 + $0x50] sm:$0xff]  }
 0x3a5   : > { %7208 = vmatpush3.bf16.msra.mxu1 %v11639_v9  ;;  %7187 = vmatprep.subr.bf16.mxu0 %v11660_v57  ;;  %v10539_v9 = vld [vmem:[%s11286_s4 + $0xd0] sm:$0xff]   ;;  %v10569_v57 = vld [vmem:[%s11286_s4 + $0x18] sm:$0xff]  }
 0x3a6   : > { %7209 = vmatprep.subr.bf16.mxu1 %v11661_v62  ;;  %v6885_v16 = vpop.f32.mrb[80].mxu0  ;;  %v10576_v62 = vld [vmem:[%s11286_s4 + $0x98] sm:$0xff]  }
 0x3a7   : > { %v6907_v20 = vpop.f32.mrb[80].mxu1  ;;  %v6886_v21 = vpop.f32.mrb[81].mxu0 }
 0x3a8   : > { %v6908_v31 = vpop.f32.mrb[81].mxu1  ;;  %v6887_v32 = vadd.f32 %v6886_v21, %v6885_v16  ;;  %v6888_v34 = vpop.f32.mrb[82].mxu0  ;;  %7188 = vmatpush3.bf16.msra.mxu0 %v10038_v30  ;;  %v10489_v30 = vld [vmem:[#allocation2 + $0x8] sm:$0xff]  ;;  %v5844_v21 = vcombine.high %v4078_v22, %v4078_v22 }
 0x3a9   : > { %v6909_v33 = vadd.f32 %v6908_v31, %v6907_v20  ;;  %v6910_v55 = vpop.f32.mrb[82].mxu1  ;;  %7210 = vmatpush3.bf16.msra.mxu1 %v10044_v41  ;;  %v6889_v28 = vpop.f32.mrb[83].mxu0  ;;  %7189 = vmatprep.subr.bf16.mxu0 %v10050_v47  ;;  %v10496_v41 = vld [vmem:[%s11286_s4 + $0x80] sm:$0xff]   ;;  %v5806_v47 = vcombine.high %v10480_v37, %v10480_v37  ;;  %v5807_v16 = vcombine.low %v10489_v30, %v10489_v30 }
 0x3aa   : > { %v6911_v5 = vpop.f32.mrb[83].mxu1  ;;  %7211 = vmatprep.subr.bf16.mxu1 %v10056_v48  ;;  %v10503_v48 = vld [vmem:[%s11286_s4 + $0x48] sm:$0xff]  }
 0x3ab   : > { %v10464_v58 = vadd.f32 %v6909_v33, %v6887_v32 }
 0x3ac   : > { %7190 = vmatpush3.bf16.msra.mxu0 %v11642_v10  ;;  %v10552_v10 = vld [vmem:[%s11286_s4 + $0x90] sm:$0xff]  }
 0x3ad   : > { %7212 = vmatpush3.bf16.msra.mxu1 %v11643_v7  ;;  %7191 = vmatprep.subr.bf16.mxu0 %v11644_v3  ;;  %v10545_v7 = vld [vmem:[%s11286_s4 + $0x10] sm:$0xff]   ;;  %v10557_v3 = vld [vmem:[%s11286_s4 + $0x58] sm:$0xff]  }
 0x3ae   : > { %7213 = vmatprep.subr.bf16.mxu1 %v11645_v11  ;;  %v10563_v11 = vld [vmem:[%s11286_s4 + $0xd8] sm:$0xff]  }
 0x3b0   : > { %7192 = vmatpush3.bf16.msra.mxu0 %v10088_v13  ;;  %v10508_v13 = vld [vmem:[%s11286_s4 + $0xc8] sm:$0xff]  }
 0x3b1   : > { %7214 = vmatpush3.bf16.msra.mxu1 %v10094_v17  ;;  %7221 = vmatprep.subr.bf16.mxu0 %v10473_v39  ;;  %v10514_v17 = vcombine.high %v10489_v30, %v10489_v30 }
 0x3b2   : > { %7243 = vmatprep.subr.bf16.mxu1 %v10478_v61 }
 0x3b3   : > { %3663 = vmatmul.mubr.bf16.vlgmr.msra.gmra.mrb[108].mxu0 %v10302_v18  ;;  %v10581_v18 = vld [vmem:[%s11286_s4 + $0x60] sm:$0xff]  }
 0x3b4   : > { %3703 = vmatmul.mubr.bf16.vlgmr.msra.gmra.mrb[108].mxu1 %v10304_v0  ;;  %7222 = vmatpush3.bf16.msra.mxu0 %v10487_v60  ;;  %v10587_v0 = vld [vmem:[%s11286_s4 + $0xe0] sm:$0xff]  }
 0x3b5   : > { %4025 = vmatprep.mubr.bf16.mxu0 %v5806_v47  ;;  %7244 = vmatpush3.bf16.msra.mxu1 %v10496_v41 }
 0x3b6   : > { %4065 = vmatprep.mubr.bf16.mxu1 %v10514_v17  ;;  %7223 = vmatprep.subr.bf16.mxu0 %v10503_v48 }
 0x3b7   : > { %7245 = vmatprep.subr.bf16.mxu1 %v10508_v13 }
 0x3b8   : > { %7224 = vmatpush3.bf16.msra.mxu0 %v10520_v35 }
 0x3b9   : > { %7246 = vmatpush3.bf16.msra.mxu1 %v10527_v36  ;;  %7225 = vmatprep.subr.bf16.mxu0 %v10532_v15 }
 0x3ba   : > { %7247 = vmatprep.subr.bf16.mxu1 %v10539_v9 }
 0x3bc   : > { %7226 = vmatpush3.bf16.msra.mxu0 %v10545_v7 }
 0x3bd   : > { %7248 = vmatpush3.bf16.msra.mxu1 %v10552_v10  ;;  %7227 = vmatprep.subr.bf16.mxu0 %v10557_v3 }
 0x3be   : > { %7249 = vmatprep.subr.bf16.mxu1 %v10563_v11 }
 0x3c0   : > { %7228 = vmatpush3.bf16.msra.mxu0 %v10569_v57 }
 0x3c1   : > { %7250 = vmatpush3.bf16.msra.mxu1 %v10576_v62  ;;  %7229 = vmatprep.subr.bf16.mxu0 %v10581_v18 }
 0x3c2   : > { %7251 = vmatprep.subr.bf16.mxu1 %v10587_v0 }
 0x3c4   : > { %7230 = vmatpush3.bf16.msra.mxu0 %v10593_v56 }
 0x3c5   : > { %7252 = vmatpush3.bf16.msra.mxu1 %v10600_v51  ;;  %7231 = vmatprep.subr.bf16.mxu0 %v10605_v42 }
 0x3c6   : > { %v6929_v46 = vpop.f32.mrb[84].mxu0  ;;  %7253 = vmatprep.subr.bf16.mxu1 %v10611_v12 }
 0x3c7   : > { %v6951_v23 = vpop.f32.mrb[84].mxu1  ;;  %v6930_v19 = vpop.f32.mrb[85].mxu0 }
 0x3c8   : > { %v6952_v52 = vpop.f32.mrb[85].mxu1  ;;  %v6931_v26 = vadd.f32 %v6930_v19, %v6929_v46  ;;  %v6932_v59 = vpop.f32.mrb[86].mxu0  ;;  %7232 = vmatpush3.bf16.msra.mxu0 %v10617_v29  ;;  %v5843_v46 = vcombine.low %v4078_v22, %v4078_v22 }
 0x3c9   : > { %v6953_v25 = vadd.f32 %v6952_v52, %v6951_v23  ;;  %v6954_v2 = vpop.f32.mrb[86].mxu1  ;;  %7254 = vmatpush3.bf16.msra.mxu1 %v10624_v45  ;;  %v6933_v14 = vpop.f32.mrb[87].mxu0  ;;  %7233 = vmatprep.subr.bf16.mxu0 %v10629_v38 }
 0x3ca   : > { %v6955_v40 = vpop.f32.mrb[87].mxu1  ;;  %v3074_v44 = vadd.f32 %v6931_v26, %v10464_v58  ;;  %7255 = vmatprep.subr.bf16.mxu1 %v10635_v4 }
 0x3cc   : > { %v3114_v6 = vadd.f32 %v6953_v25, %v3074_v44  ;;  %7234 = vmatpush3.bf16.msra.mxu0 %v10641_v1 }
 0x3cd   : > { %7256 = vmatpush3.bf16.msra.mxu1 %v10648_v43  ;;  %7235 = vmatprep.subr.bf16.mxu0 %v10653_v27 }
 0x3ce   : > { %v3119_v8 = vadd.f32 %v10678_v24, %v3114_v6  ;;  %7257 = vmatprep.subr.bf16.mxu1 %v10660_v53 }
 0x3d0   : > { %v3120_v63 = vmax.f32 %v3119_v8, 0.0  ;;  %7236 = vmatpush3.bf16.msra.mxu0 %v10666_v50 }
 0x3d1   : > { %7258 = vmatpush3.bf16.msra.mxu1 %v10673_v49  ;;  %7265 = vmatprep.subr.bf16.mxu0 %v10473_v39 }
 0x3d2   : > { %v3121_v20 = vpack.c.bf16 %v3120_v63, %v3120_v63  ;;  %7287 = vmatprep.subr.bf16.mxu1 %v10478_v61 }
 0x3d3   : > { %4026 = vmatmul.mubr.bf16.vlgmr.msra.gmra.mrb[112].mxu0 %v5805_v54 }
 0x3d4   : > { %3122 = vst [vmem:[#allocation2 + $0x28] sm:$0xf] %v3121_v20  ;;  %4066 = vmatmul.mubr.bf16.vlgmr.msra.gmra.mrb[112].mxu1 %v5807_v16  ;;  %7266 = vmatpush3.bf16.msra.mxu0 %v10487_v60 }
 0x3d5   : > { %4125 = vmatprep.mubr.bf16.mxu0 %v10514_v17  ;;  %7288 = vmatpush3.bf16.msra.mxu1 %v10496_v41  ;;  %v4184_v17 = vld [vmem:[#allocation2 + $0x18] sm:$0xff] }
 0x3d6   : > { %4165 = vmatprep.mubr.bf16.mxu1 %v5844_v21  ;;  %7267 = vmatprep.subr.bf16.mxu0 %v10503_v48  ;;  %v5849_v23 = vcombine.high %v4184_v17, %v4184_v17  ;;  %v5848_v20 = vcombine.low %v4184_v17, %v4184_v17 }
 0x3d7   : > { %7289 = vmatprep.subr.bf16.mxu1 %v10508_v13 }
 0x3d8   : > { %7268 = vmatpush3.bf16.msra.mxu0 %v10520_v35 }
 0x3d9   : > { %7290 = vmatpush3.bf16.msra.mxu1 %v10527_v36  ;;  %7269 = vmatprep.subr.bf16.mxu0 %v10532_v15 }
 0x3da   : > { %7291 = vmatprep.subr.bf16.mxu1 %v10539_v9 }
 0x3dc   : > { %7270 = vmatpush3.bf16.msra.mxu0 %v10545_v7 }
 0x3dd   : > { %7292 = vmatpush3.bf16.msra.mxu1 %v10552_v10  ;;  %7271 = vmatprep.subr.bf16.mxu0 %v10557_v3 }
 0x3de   : > { %7293 = vmatprep.subr.bf16.mxu1 %v10563_v11 }
 0x3e0   : > { %7272 = vmatpush3.bf16.msra.mxu0 %v10569_v57 }
 0x3e1   : > { %7294 = vmatpush3.bf16.msra.mxu1 %v10576_v62  ;;  %7273 = vmatprep.subr.bf16.mxu0 %v10581_v18 }
 0x3e2   : > { %7295 = vmatprep.subr.bf16.mxu1 %v10587_v0 }
 0x3e4   : > { %7274 = vmatpush3.bf16.msra.mxu0 %v10593_v56 }
 0x3e5   : > { %7296 = vmatpush3.bf16.msra.mxu1 %v10600_v51  ;;  %7275 = vmatprep.subr.bf16.mxu0 %v10605_v42 }
 0x3e6   : > { %v6973_v31 = vpop.f32.mrb[88].mxu0  ;;  %7297 = vmatprep.subr.bf16.mxu1 %v10611_v12 }
 0x3e7   : > { %v6995_v32 = vpop.f32.mrb[88].mxu1  ;;  %v6974_v33 = vpop.f32.mrb[89].mxu0 }
 0x3e8   : > { %v6996_v34 = vpop.f32.mrb[89].mxu1  ;;  %v6975_v55 = vadd.f32 %v6974_v33, %v6973_v31  ;;  %v6976_v5 = vpop.f32.mrb[90].mxu0  ;;  %7276 = vmatpush3.bf16.msra.mxu0 %v10617_v29 }
 0x3e9   : > { %v6997_v28 = vadd.f32 %v6996_v34, %v6995_v32  ;;  %v6998_v58 = vpop.f32.mrb[90].mxu1  ;;  %7298 = vmatpush3.bf16.msra.mxu1 %v10624_v45  ;;  %v6977_v37 = vpop.f32.mrb[91].mxu0  ;;  %7277 = vmatprep.subr.bf16.mxu0 %v10629_v38 }
 0x3ea   : > { %v6999_v30 = vpop.f32.mrb[91].mxu1  ;;  %7299 = vmatprep.subr.bf16.mxu1 %v10635_v4 }
 0x3eb   : > { %v3217_v47 = vadd.f32 %v6997_v28, %v6975_v55 }
 0x3ec   : > { %7278 = vmatpush3.bf16.msra.mxu0 %v10641_v1 }
 0x3ed   : > { %7300 = vmatpush3.bf16.msra.mxu1 %v10648_v43  ;;  %7279 = vmatprep.subr.bf16.mxu0 %v10653_v27 }
 0x3ee   : > { %7301 = vmatprep.subr.bf16.mxu1 %v10660_v53 }
 0x3f0   : > { %7280 = vmatpush3.bf16.msra.mxu0 %v10666_v50 }
 0x3f1   : > { %7302 = vmatpush3.bf16.msra.mxu1 %v10673_v49  ;;  %7309 = vmatprep.subr.bf16.mxu0 %v10473_v39 }
 0x3f2   : > { %7331 = vmatprep.subr.bf16.mxu1 %v10478_v61 }
 0x3f3   : > { %4126 = vmatmul.mubr.bf16.vlgmr.msra.gmra.mrb[116].mxu0 %v5807_v16  ;;  %v4283_v16 = vld [vmem:[#allocation2 + $0x20] sm:$0xff] }
 0x3f4   : > { %4166 = vmatmul.mubr.bf16.vlgmr.msra.gmra.mrb[116].mxu1 %v5843_v46  ;;  %7310 = vmatpush3.bf16.msra.mxu0 %v10487_v60  ;;  %v5853_v31 = vcombine.high %v4283_v16, %v4283_v16 }
 0x3f5   : > { %4231 = vmatprep.mubr.bf16.mxu0 %v5844_v21  ;;  %7332 = vmatpush3.bf16.msra.mxu1 %v10496_v41 }
 0x3f6   : > { %4271 = vmatprep.mubr.bf16.mxu1 %v5849_v23  ;;  %7311 = vmatprep.subr.bf16.mxu0 %v10503_v48 }
 0x3f7   : > { %7333 = vmatprep.subr.bf16.mxu1 %v10508_v13 }
 0x3f8   : > { %7312 = vmatpush3.bf16.msra.mxu0 %v10520_v35 }
 0x3f9   : > { %7334 = vmatpush3.bf16.msra.mxu1 %v10527_v36  ;;  %7313 = vmatprep.subr.bf16.mxu0 %v10532_v15 }
 0x3fa   : > { %7335 = vmatprep.subr.bf16.mxu1 %v10539_v9 }
 0x3fc   : > { %7314 = vmatpush3.bf16.msra.mxu0 %v10545_v7 }
 0x3fd   : > { %7336 = vmatpush3.bf16.msra.mxu1 %v10552_v10  ;;  %7315 = vmatprep.subr.bf16.mxu0 %v10557_v3 }
 0x3fe   : > { %7337 = vmatprep.subr.bf16.mxu1 %v10563_v11 }
 0x400   : > { %7316 = vmatpush3.bf16.msra.mxu0 %v10569_v57 }
 0x401   : > { %7338 = vmatpush3.bf16.msra.mxu1 %v10576_v62  ;;  %7317 = vmatprep.subr.bf16.mxu0 %v10581_v18 }
 0x402   : > { %7339 = vmatprep.subr.bf16.mxu1 %v10587_v0 }
 0x404   : > { %7318 = vmatpush3.bf16.msra.mxu0 %v10593_v56 }
 0x405   : > { %7340 = vmatpush3.bf16.msra.mxu1 %v10600_v51  ;;  %7319 = vmatprep.subr.bf16.mxu0 %v10605_v42 }
 0x406   : > { %v7017_v19 = vpop.f32.mrb[92].mxu0  ;;  %7341 = vmatprep.subr.bf16.mxu1 %v10611_v12 }
 0x407   : > { %v7039_v52 = vpop.f32.mrb[92].mxu1  ;;  %v7018_v26 = vpop.f32.mrb[93].mxu0 }
 0x408   : > { %v7040_v25 = vpop.f32.mrb[93].mxu1  ;;  %v7019_v59 = vadd.f32 %v7018_v26, %v7017_v19  ;;  %v7020_v14 = vpop.f32.mrb[94].mxu0  ;;  %7320 = vmatpush3.bf16.msra.mxu0 %v10617_v29 }
 0x409   : > { %v7041_v2 = vadd.f32 %v7040_v25, %v7039_v52  ;;  %v7042_v40 = vpop.f32.mrb[94].mxu1  ;;  %7342 = vmatpush3.bf16.msra.mxu1 %v10624_v45  ;;  %v7021_v44 = vpop.f32.mrb[95].mxu0  ;;  %7321 = vmatprep.subr.bf16.mxu0 %v10629_v38 }
 0x40a   : > { %v7043_v6 = vpop.f32.mrb[95].mxu1  ;;  %v3271_v8 = vadd.f32 %v7019_v59, %v3217_v47  ;;  %7343 = vmatprep.subr.bf16.mxu1 %v10635_v4 }
 0x40c   : > { %v3311_v63 = vadd.f32 %v7041_v2, %v3271_v8  ;;  %7322 = vmatpush3.bf16.msra.mxu0 %v10641_v1 }
 0x40d   : > { %7344 = vmatpush3.bf16.msra.mxu1 %v10648_v43  ;;  %7323 = vmatprep.subr.bf16.mxu0 %v10653_v27 }
 0x40e   : > { %v3316_v54 = vadd.f32 %v10678_v24, %v3311_v63  ;;  %7345 = vmatprep.subr.bf16.mxu1 %v10660_v53 }
 0x410   : > { %v3317_v22 = vmax.f32 %v3316_v54, 0.0  ;;  %7324 = vmatpush3.bf16.msra.mxu0 %v10666_v50 }
 0x411   : > { %7346 = vmatpush3.bf16.msra.mxu1 %v10673_v49  ;;  %7353 = vmatprep.subr.bf16.mxu0 %v10473_v39 }
 0x412   : > { %v3318_v21 = vpack.c.bf16 %v3317_v22, %v3317_v22  ;;  %7375 = vmatprep.subr.bf16.mxu1 %v10478_v61 }
 0x413   : > { %4232 = vmatmul.mubr.bf16.vlgmr.msra.gmra.mrb[120].mxu0 %v5843_v46 }
 0x414   : > { %3319 = vst [vmem:[#allocation2 + $0x2c] sm:$0xf] %v3318_v21  ;;  %4272 = vmatmul.mubr.bf16.vlgmr.msra.gmra.mrb[120].mxu1 %v5848_v20  ;;  %7354 = vmatpush3.bf16.msra.mxu0 %v10487_v60 }
 0x415   : > { %4330 = vmatprep.mubr.bf16.mxu0 %v5849_v23  ;;  %7376 = vmatpush3.bf16.msra.mxu1 %v10496_v41  ;;  %v5852_v23 = vcombine.low %v4283_v16, %v4283_v16 }
 0x416   : > { %4370 = vmatprep.mubr.bf16.mxu1 %v5853_v31  ;;  %7355 = vmatprep.subr.bf16.mxu0 %v10503_v48 }
 0x417   : > { %7377 = vmatprep.subr.bf16.mxu1 %v10508_v13 }
 0x418   : > { %7356 = vmatpush3.bf16.msra.mxu0 %v10520_v35 }
 0x419   : > { %7378 = vmatpush3.bf16.msra.mxu1 %v10527_v36  ;;  %7357 = vmatprep.subr.bf16.mxu0 %v10532_v15 }
 0x41a   : > { %7379 = vmatprep.subr.bf16.mxu1 %v10539_v9 }
 0x41b   : > { %v4388_v46 = vld [vmem:[#allocation2 + $0x28] sm:$0xff] }
 0x41c   : > { %7358 = vmatpush3.bf16.msra.mxu0 %v10545_v7  ;;  %v5858_v19 = vcombine.high %v4388_v46, %v4388_v46 }
 0x41d   : > { %7380 = vmatpush3.bf16.msra.mxu1 %v10552_v10  ;;  %7359 = vmatprep.subr.bf16.mxu0 %v10557_v3 }
 0x41e   : > { %7381 = vmatprep.subr.bf16.mxu1 %v10563_v11 }
 0x420   : > { %7360 = vmatpush3.bf16.msra.mxu0 %v10569_v57 }
 0x421   : > { %7382 = vmatpush3.bf16.msra.mxu1 %v10576_v62  ;;  %7361 = vmatprep.subr.bf16.mxu0 %v10581_v18 }
 0x422   : > { %7383 = vmatprep.subr.bf16.mxu1 %v10587_v0 }
 0x424   : > { %7362 = vmatpush3.bf16.msra.mxu0 %v10593_v56 }
 0x425   : > { %7384 = vmatpush3.bf16.msra.mxu1 %v10600_v51  ;;  %7363 = vmatprep.subr.bf16.mxu0 %v10605_v42 }
 0x426   : > { %v7061_v32 = vpop.f32.mrb[96].mxu0  ;;  %7385 = vmatprep.subr.bf16.mxu1 %v10611_v12 }
 0x427   : > { %v7083_v33 = vpop.f32.mrb[96].mxu1  ;;  %v7062_v34 = vpop.f32.mrb[97].mxu0 }
 0x428   : > { %v7084_v55 = vpop.f32.mrb[97].mxu1  ;;  %v7063_v28 = vadd.f32 %v7062_v34, %v7061_v32  ;;  %v7064_v58 = vpop.f32.mrb[98].mxu0  ;;  %7364 = vmatpush3.bf16.msra.mxu0 %v10617_v29 }
 0x429   : > { %v7085_v5 = vadd.f32 %v7084_v55, %v7083_v33  ;;  %v7086_v37 = vpop.f32.mrb[98].mxu1  ;;  %7386 = vmatpush3.bf16.msra.mxu1 %v10624_v45  ;;  %v7065_v30 = vpop.f32.mrb[99].mxu0  ;;  %7365 = vmatprep.subr.bf16.mxu0 %v10629_v38 }
 0x42a   : > { %v7087_v47 = vpop.f32.mrb[99].mxu1  ;;  %7387 = vmatprep.subr.bf16.mxu1 %v10635_v4 }
 0x42b   : > { %v3414_v17 = vadd.f32 %v7085_v5, %v7063_v28 }
 0x42c   : > { %7366 = vmatpush3.bf16.msra.mxu0 %v10641_v1 }
 0x42d   : > { %7388 = vmatpush3.bf16.msra.mxu1 %v10648_v43  ;;  %7367 = vmatprep.subr.bf16.mxu0 %v10653_v27 }
 0x42e   : > { %7389 = vmatprep.subr.bf16.mxu1 %v10660_v53 }
 0x430   : > { %7368 = vmatpush3.bf16.msra.mxu0 %v10666_v50 }
 0x431   : > { %7390 = vmatpush3.bf16.msra.mxu1 %v10673_v49  ;;  %7397 = vmatprep.subr.bf16.mxu0 %v10473_v39 }
 0x432   : > { %7419 = vmatprep.subr.bf16.mxu1 %v10478_v61 }
 0x433   : > { %4331 = vmatmul.mubr.bf16.vlgmr.msra.gmra.mrb[124].mxu0 %v5848_v20  ;;  %v5857_v20 = vcombine.low %v4388_v46, %v4388_v46 }
 0x434   : > { %4371 = vmatmul.mubr.bf16.vlgmr.msra.gmra.mrb[124].mxu1 %v5852_v23  ;;  %7398 = vmatpush3.bf16.msra.mxu0 %v10487_v60 }
 0x435   : > { %4435 = vmatprep.mubr.bf16.mxu0 %v5853_v31  ;;  %7420 = vmatpush3.bf16.msra.mxu1 %v10496_v41 }
 0x436   : > { %4475 = vmatprep.mubr.bf16.mxu1 %v5858_v19  ;;  %7399 = vmatprep.subr.bf16.mxu0 %v10503_v48 }
 0x437   : > { %7421 = vmatprep.subr.bf16.mxu1 %v10508_v13 }
 0x438   : > { %7400 = vmatpush3.bf16.msra.mxu0 %v10520_v35 }
 0x439   : > { %7422 = vmatpush3.bf16.msra.mxu1 %v10527_v36  ;;  %7401 = vmatprep.subr.bf16.mxu0 %v10532_v15 }
 0x43a   : > { %7423 = vmatprep.subr.bf16.mxu1 %v10539_v9 }
 0x43c   : > { %7402 = vmatpush3.bf16.msra.mxu0 %v10545_v7 }
 0x43d   : > { %7424 = vmatpush3.bf16.msra.mxu1 %v10552_v10  ;;  %7403 = vmatprep.subr.bf16.mxu0 %v10557_v3 }
 0x43e   : > { %7425 = vmatprep.subr.bf16.mxu1 %v10563_v11 }
 0x440   : > { %7404 = vmatpush3.bf16.msra.mxu0 %v10569_v57 }
 0x441   : > { %7426 = vmatpush3.bf16.msra.mxu1 %v10576_v62  ;;  %7405 = vmatprep.subr.bf16.mxu0 %v10581_v18 }
 0x442   : > { %7427 = vmatprep.subr.bf16.mxu1 %v10587_v0 }
 0x444   : > { %7406 = vmatpush3.bf16.msra.mxu0 %v10593_v56 }
 0x445   : > { %7428 = vmatpush3.bf16.msra.mxu1 %v10600_v51  ;;  %7407 = vmatprep.subr.bf16.mxu0 %v10605_v42 }
 0x446   : > { %v7105_v52 = vpop.f32.mrb[100].mxu0  ;;  %7429 = vmatprep.subr.bf16.mxu1 %v10611_v12 }
 0x447   : > { %v7127_v26 = vpop.f32.mrb[100].mxu1  ;;  %v7106_v25 = vpop.f32.mrb[101].mxu0 }
 0x448   : > { %v7128_v59 = vpop.f32.mrb[101].mxu1  ;;  %v7107_v2 = vadd.f32 %v7106_v25, %v7105_v52  ;;  %v7108_v40 = vpop.f32.mrb[102].mxu0  ;;  %7408 = vmatpush3.bf16.msra.mxu0 %v10617_v29 }
 0x449   : > { %v7129_v14 = vadd.f32 %v7128_v59, %v7127_v26  ;;  %v7130_v44 = vpop.f32.mrb[102].mxu1  ;;  %7430 = vmatpush3.bf16.msra.mxu1 %v10624_v45  ;;  %v7109_v6 = vpop.f32.mrb[103].mxu0  ;;  %7409 = vmatprep.subr.bf16.mxu0 %v10629_v38 }
 0x44a   : > { %v7131_v8 = vpop.f32.mrb[103].mxu1  ;;  %v3468_v63 = vadd.f32 %v7107_v2, %v3414_v17  ;;  %7431 = vmatprep.subr.bf16.mxu1 %v10635_v4  ;;  %v7704_v44 = vld [vmem:[%s11288_s6] ss:$8 sps:$4 sm:$0xff]   ;;  %v7706_v6 = vld [vmem:[%s11288_s6 + $0x4] ss:$8 sps:$4 sm:$0xff]  }
 0x44b   : > { %v7709_v8 = vld [vmem:[%s11288_s6 + $0x14] ss:$8 sps:$4 sm:$0xff]  }
 0x44c   : > { %v3508_v54 = vadd.f32 %v7129_v14, %v3468_v63  ;;  %7410 = vmatpush3.bf16.msra.mxu0 %v10641_v1 }
 0x44d   : > { %7432 = vmatpush3.bf16.msra.mxu1 %v10648_v43  ;;  %7411 = vmatprep.subr.bf16.mxu0 %v10653_v27 }
 0x44e   : > { %v3513_v22 = vadd.f32 %v10678_v24, %v3508_v54  ;;  %7433 = vmatprep.subr.bf16.mxu1 %v10660_v53  ;;  %v7707_v54 = vld [vmem:[%s11288_s6 + $0x10] ss:$8 sps:$4 sm:$0xff]  }
 0x450   : > { %v3514_v16 = vmax.f32 %v3513_v22, 0.0  ;;  %7412 = vmatpush3.bf16.msra.mxu0 %v10666_v50 }
 0x451   : > { %7434 = vmatpush3.bf16.msra.mxu1 %v10673_v49  ;;  %7441 = vmatprep.subr.bf16.mxu0 %v10473_v39 }
 0x452   : > { %v3515_v21 = vpack.c.bf16 %v3514_v16, %v3514_v16  ;;  %7463 = vmatprep.subr.bf16.mxu1 %v10478_v61  ;;  %v7712_v16 = vld [vmem:[%s11288_s6 + $0x24] ss:$8 sps:$4 sm:$0xff]  }
 0x453   : > { %4436 = vmatmul.mubr.bf16.vlgmr.msra.gmra.mrb[128].mxu0 %v5852_v23 }
 0x454   : > { %3516 = vst [vmem:[#allocation2 + $0x30] sm:$0xf] %v3515_v21  ;;  %4476 = vmatmul.mubr.bf16.vlgmr.msra.gmra.mrb[128].mxu1 %v5857_v20  ;;  %7442 = vmatpush3.bf16.msra.mxu0 %v10487_v60  ;;  %v7710_v21 = vld [vmem:[%s11288_s6 + $0x20] ss:$8 sps:$4 sm:$0xff]  }
 0x455   : > { %4534 = vmatprep.mubr.bf16.mxu0 %v5858_v19  ;;  %7443 = vmatprep.subr.bf16.mxu0 %v10503_v48 }
 0x456   : > { %7464 = vmatpush3.bf16.msra.mxu1 %v10496_v41 }
 0x457   : > { %7465 = vmatprep.subr.bf16.mxu1 %v10508_v13 }
 0x458   : > { %7444 = vmatpush3.bf16.msra.mxu0 %v10520_v35 }
 0x459   : > { %7445 = vmatprep.subr.bf16.mxu0 %v10532_v15 }
 0x45a   : > { %7466 = vmatpush3.bf16.msra.mxu1 %v10527_v36 }
 0x45b   : > { %7467 = vmatprep.subr.bf16.mxu1 %v10539_v9 }
 0x45c   : > { %7446 = vmatpush3.bf16.msra.mxu0 %v10545_v7 }
 0x45d   : > { %7447 = vmatprep.subr.bf16.mxu0 %v10557_v3 }
 0x45e   : > { %7468 = vmatpush3.bf16.msra.mxu1 %v10552_v10 }
 0x45f   : > { %7469 = vmatprep.subr.bf16.mxu1 %v10563_v11 }
 0x460   : > { %7448 = vmatpush3.bf16.msra.mxu0 %v10569_v57 }
 0x461   : > { %7449 = vmatprep.subr.bf16.mxu0 %v10581_v18 }
 0x462   : > { %7470 = vmatpush3.bf16.msra.mxu1 %v10576_v62 }
 0x463   : > { %7471 = vmatprep.subr.bf16.mxu1 %v10587_v0 }
 0x464   : > { %7450 = vmatpush3.bf16.msra.mxu0 %v10593_v56 }
 0x465   : > { %7451 = vmatprep.subr.bf16.mxu0 %v10605_v42 }
 0x466   : > { %v7149_v39 = vpop.f32.mrb[104].mxu0  ;;  %7472 = vmatpush3.bf16.msra.mxu1 %v10600_v51 }
 0x467   : > { %v7171_v61 = vpop.f32.mrb[104].mxu1  ;;  %v7150_v60 = vpop.f32.mrb[105].mxu0  ;;  %7473 = vmatprep.subr.bf16.mxu1 %v10611_v12 }
 0x468   : > { %v7172_v41 = vpop.f32.mrb[105].mxu1  ;;  %v7151_v48 = vadd.f32 %v7150_v60, %v7149_v39  ;;  %v7152_v35 = vpop.f32.mrb[106].mxu0  ;;  %7452 = vmatpush3.bf16.msra.mxu0 %v10617_v29  ;;  %v7715_v39 = vld [vmem:[%s11288_s6 + $0x34] ss:$8 sps:$4 sm:$0xff]   ;;  %v7718_v60 = vld [vmem:[%s11288_s6 + $0x44] ss:$8 sps:$4 sm:$0xff]  }
 0x469   : > { %v7173_v13 = vadd.f32 %v7172_v41, %v7171_v61  ;;  %v7174_v36 = vpop.f32.mrb[106].mxu1  ;;  %v7153_v15 = vpop.f32.mrb[107].mxu0  ;;  %7453 = vmatprep.subr.bf16.mxu0 %v10629_v38  ;;  %v7713_v61 = vld [vmem:[%s11288_s6 + $0x30] ss:$8 sps:$4 sm:$0xff]   ;;  %v7716_v41 = vld [vmem:[%s11288_s6 + $0x40] ss:$8 sps:$4 sm:$0xff]  }
 0x46a   : > { %v7175_v9 = vpop.f32.mrb[107].mxu1  ;;  %7474 = vmatpush3.bf16.msra.mxu1 %v10624_v45  ;;  %v7724_v35 = vld [vmem:[%s11288_s6 + $0x64] ss:$8 sps:$4 sm:$0xff]   ;;  %v7722_v36 = vld [vmem:[%s11288_s6 + $0x60] ss:$8 sps:$4 sm:$0xff]  }
 0x46b   : > { %v3611_v7 = vadd.f32 %v7173_v13, %v7151_v48  ;;  %7475 = vmatprep.subr.bf16.mxu1 %v10635_v4  ;;  %v7721_v48 = vld [vmem:[%s11288_s6 + $0x54] ss:$8 sps:$4 sm:$0xff]   ;;  %v7719_v13 = vld [vmem:[%s11288_s6 + $0x50] ss:$8 sps:$4 sm:$0xff]  }
 0x46c   : > { %7454 = vmatpush3.bf16.msra.mxu0 %v10641_v1  ;;  %v7727_v15 = vld [vmem:[%s11288_s6 + $0x74] ss:$8 sps:$4 sm:$0xff]   ;;  %v7725_v9 = vld [vmem:[%s11288_s6 + $0x70] ss:$8 sps:$4 sm:$0xff]  }
 0x46d   : > { %7455 = vmatprep.subr.bf16.mxu0 %v10653_v27 }
 0x46e   : > { %7476 = vmatpush3.bf16.msra.mxu1 %v10648_v43 }
 0x46f   : > { %7477 = vmatprep.subr.bf16.mxu1 %v10660_v53 }
 0x470   : > { %7456 = vmatpush3.bf16.msra.mxu0 %v10666_v50 }
 0x471   : > { %4904 = vmatprep.subr.bf16.mxu0 %v7706_v6 }
 0x472   : > { %7478 = vmatpush3.bf16.msra.mxu1 %v10673_v49  ;;  %v10855_v49 = vld [vmem:[%s11287_s5] ss:$0 sm:$0xff] }
 0x473   : > { %4535 = vmatmul.mubr.bf16.vlgmr.msra.gmra.mrb[132].mxu0 %v5857_v20 }
 0x474   : > { %4905 = vmatpush1.bf16.msra.mxu0 %v7704_v44  ;;  %v7756_v44 = vld [vmem:[%s11288_s6 + $0x104] ss:$8 sps:$4 sm:$0xff]  }
 0x475   : > { %4906 = vmatprep.subr.bf16.mxu0 %v7709_v8 }
 0x478   : > { %4907 = vmatpush1.bf16.msra.mxu0 %v7707_v54 }
 0x479   : > { %4908 = vmatprep.subr.bf16.mxu0 %v7712_v16 }
 0x47c   : > { %4909 = vmatpush1.bf16.msra.mxu0 %v7710_v21 }
 0x47d   : > { %4910 = vmatprep.subr.bf16.mxu0 %v7715_v39 }
 0x480   : > { %4911 = vmatpush1.bf16.msra.mxu0 %v7713_v61 }
 0x481   : > { %4912 = vmatprep.subr.bf16.mxu0 %v7718_v60 }
 0x484   : > { %4913 = vmatpush1.bf16.msra.mxu0 %v7716_v41 }
 0x485   : > { %4914 = vmatprep.subr.bf16.mxu0 %v7721_v48 }
 0x486   : > { %v7193_v10 = vpop.f32.mrb[108].mxu0 }
 0x487   : > { %v7215_v3 = vpop.f32.mrb[108].mxu1  ;;  %v7194_v11 = vpop.f32.mrb[109].mxu0 }
 0x488   : > { %v7216_v57 = vpop.f32.mrb[109].mxu1  ;;  %v7195_v62 = vadd.f32 %v7194_v11, %v7193_v10  ;;  %v7196_v0 = vpop.f32.mrb[110].mxu0  ;;  %4915 = vmatpush1.bf16.msra.mxu0 %v7719_v13  ;;  %v7730_v10 = vld [vmem:[%s11288_s6 + $0x84] ss:$8 sps:$4 sm:$0xff]  }
 0x489   : > { %v7217_v18 = vadd.f32 %v7216_v57, %v7215_v3  ;;  %v7218_v56 = vpop.f32.mrb[110].mxu1  ;;  %v7197_v51 = vpop.f32.mrb[111].mxu0  ;;  %4916 = vmatprep.subr.bf16.mxu0 %v7724_v35 }
 0x48a   : > { %v7219_v42 = vpop.f32.mrb[111].mxu1  ;;  %v3665_v12 = vadd.f32 %v7195_v62, %v3611_v7 }
 0x48b   : > { %v7728_v42 = vld [vmem:[%s11288_s6 + $0x80] ss:$8 sps:$4 sm:$0xff]  }
 0x48c   : > { %v3705_v29 = vadd.f32 %v7217_v18, %v3665_v12  ;;  %4917 = vmatpush1.bf16.msra.mxu0 %v7722_v36 }
 0x48d   : > { %4918 = vmatprep.subr.bf16.mxu0 %v7727_v15 }
 0x48e   : > { %v3710_v45 = vadd.f32 %v10678_v24, %v3705_v29 }
 0x490   : > { %v3711_v38 = vmax.f32 %v3710_v45, 0.0  ;;  %4919 = vmatpush1.bf16.msra.mxu0 %v7725_v9 }
 0x491   : > { %4920 = vmatprep.subr.bf16.mxu0 %v7730_v10 }
 0x492   : > { %v3712_v4 = vpack.c.bf16 %v3711_v38, %v3711_v38 }
 0x494   : > { %3713 = vst [vmem:[#allocation2 + $0x34] sm:$0xf] %v3712_v4  ;;  %4921 = vmatpush1.bf16.msra.mxu0 %v7728_v42  ;;  %v7779_v42 = vld [vmem:[%s11290_s8] ss:$16 sps:$4 sm:$0xff]  }
 0x49b   : > { %v4487_v1 = vld [vmem:[#allocation2 + $0x30] sm:$0xff] }
 0x49c   : > { %v5861_v43 = vcombine.low %v4487_v1, %v4487_v1  ;;  %v5862_v27 = vcombine.high %v4487_v1, %v4487_v1  ;;  %v7731_v1 = vld [vmem:[%s11288_s6 + $0x90] ss:$8 sps:$4 sm:$0xff]  }
 0x49e   : > { %4574 = vmatprep.mubr.bf16.mxu1 %v5862_v27  ;;  %v7736_v27 = vld [vmem:[%s11288_s6 + $0xa4] ss:$8 sps:$4 sm:$0xff]  }
 0x49f   : > { %4575 = vmatmul.mubr.bf16.vlgmr.msra.gmra.mrb[132].mxu1 %v5861_v43  ;;  %v7733_v43 = vld [vmem:[%s11288_s6 + $0x94] ss:$8 sps:$4 sm:$0xff]  }
 0x4a0   : > { %4922 = vmatprep.subr.bf16.mxu0 %v7733_v43  ;;  %v7788_v43 = vld [vmem:[%s11290_s8 + $0x60] ss:$16 sps:$4 sm:$0xff]  }
 0x4a1   : > { %4923 = vmatpush1.bf16.msra.mxu0 %v7731_v1  ;;  %v7790_v1 = vld [vmem:[%s11290_s8 + $0x64] ss:$16 sps:$4 sm:$0xff]  }
 0x4a2   : > { %4924 = vmatprep.subr.bf16.mxu0 %v7736_v27 }
 0x4a6   : > { %v7237_v53 = vpop.f32.mrb[112].mxu0 }
 0x4a7   : > { %v7259_v50 = vpop.f32.mrb[112].mxu1  ;;  %v7238_v31 = vpop.f32.mrb[113].mxu0 }
 0x4a8   : > { %v7239_v32 = vadd.f32 %v7238_v31, %v7237_v53  ;;  %v7260_v33 = vpop.f32.mrb[113].mxu1  ;;  %v7240_v34 = vpop.f32.mrb[114].mxu0  ;;  %v7734_v53 = vld [vmem:[%s11288_s6 + $0xa0] ss:$8 sps:$4 sm:$0xff]   ;;  %v7737_v31 = vld [vmem:[%s11288_s6 + $0xb0] ss:$8 sps:$4 sm:$0xff]  }
 0x4a9   : > { %v7261_v24 = vadd.f32 %v7260_v33, %v7259_v50  ;;  %v7262_v55 = vpop.f32.mrb[114].mxu1  ;;  %v7241_v28 = vpop.f32.mrb[115].mxu0  ;;  %v7739_v50 = vld [vmem:[%s11288_s6 + $0xb4] ss:$8 sps:$4 sm:$0xff]   ;;  %4925 = vmatpush1.bf16.msra.mxu0 %v7734_v53  ;;  %v7740_v33 = vld [vmem:[%s11288_s6 + $0xc0] ss:$8 sps:$4 sm:$0xff]  }
 0x4aa   : > { %v4028_v5 = vadd.f32 %v7239_v32, %v10855_v49  ;;  %v7263_v58 = vpop.f32.mrb[115].mxu1  ;;  %4926 = vmatprep.subr.bf16.mxu0 %v7739_v50  ;;  %v7742_v32 = vld [vmem:[%s11288_s6 + $0xc4] ss:$8 sps:$4 sm:$0xff]   ;;  %v7745_v34 = vld [vmem:[%s11288_s6 + $0xd4] ss:$8 sps:$4 sm:$0xff]  }
 0x4ab   : > { %v7748_v55 = vld [vmem:[%s11288_s6 + $0xe4] ss:$8 sps:$4 sm:$0xff]   ;;  %v7791_v50 = vld [vmem:[%s11290_s8 + $0x80] ss:$16 sps:$4 sm:$0xff]  }
 0x4ac   : > { %v4068_v37 = vadd.f32 %v7261_v24, %v4028_v5  ;;  %v7743_v24 = vld [vmem:[%s11288_s6 + $0xd0] ss:$8 sps:$4 sm:$0xff]   ;;  %v7793_v53 = vld [vmem:[%s11290_s8 + $0x84] ss:$16 sps:$4 sm:$0xff]  }
 0x4ad   : > { %4927 = vmatpush1.bf16.msra.mxu0 %v7737_v31  ;;  %v7796_v31 = vld [vmem:[%s11290_s8 + $0xa4] ss:$16 sps:$4 sm:$0xff]  }
 0x4ae   : > { %v4073_v30 = vmax.f32 %v4068_v37, 0.0  ;;  %4928 = vmatprep.subr.bf16.mxu0 %v7742_v32  ;;  %v7746_v37 = vld [vmem:[%s11288_s6 + $0xe0] ss:$8 sps:$4 sm:$0xff]  }
 0x4af   : > { %v7794_v32 = vld [vmem:[%s11290_s8 + $0xa0] ss:$16 sps:$4 sm:$0xff]  }
 0x4b0   : > { %v4074_v47 = vpack.c.bf16 %v4073_v30, %v4073_v30 }
 0x4b1   : > { %4929 = vmatpush1.bf16.msra.mxu0 %v7740_v33 }
 0x4b2   : > { %4076 = vst.msk [vmem:[#allocation3] sm:$0xf] %vm4075_vm0, %v4074_v47  ;;  %4930 = vmatprep.subr.bf16.mxu0 %v7745_v34  ;;  %v7799_v34 = vld [vmem:[%s11290_s8 + $0xc4] ss:$16 sps:$4 sm:$0xff]  }
 0x4b5   : > { %4931 = vmatpush1.bf16.msra.mxu0 %v7743_v24 }
 0x4b6   : > { %4932 = vmatprep.subr.bf16.mxu0 %v7748_v55 }
 0x4b9   : > { %4933 = vmatpush1.bf16.msra.mxu0 %v7746_v37  ;;  %v7802_v37 = vld [vmem:[%s11290_s8 + $0xe4] ss:$16 sps:$4 sm:$0xff]  }
 0x4c6   : > { %v7281_v17 = vpop.f32.mrb[116].mxu0 }
 0x4c7   : > { %v7303_v46 = vpop.f32.mrb[116].mxu1  ;;  %v7282_v23 = vpop.f32.mrb[117].mxu0 }
 0x4c8   : > { %v7283_v19 = vadd.f32 %v7282_v23, %v7281_v17  ;;  %v7304_v52 = vpop.f32.mrb[117].mxu1  ;;  %v7284_v26 = vpop.f32.mrb[118].mxu0 }
 0x4c9   : > { %v7305_v25 = vadd.f32 %v7304_v52, %v7303_v46  ;;  %v7306_v59 = vpop.f32.mrb[118].mxu1  ;;  %v7285_v2 = vpop.f32.mrb[119].mxu0  ;;  %v7751_v46 = vld [vmem:[%s11288_s6 + $0xf4] ss:$8 sps:$4 sm:$0xff]  }
 0x4ca   : > { %v4128_v14 = vadd.f32 %v7283_v19, %v10855_v49  ;;  %v7307_v40 = vpop.f32.mrb[119].mxu1  ;;  %v7749_v59 = vld [vmem:[%s11288_s6 + $0xf0] ss:$8 sps:$4 sm:$0xff]   ;;  %4934 = vmatprep.subr.bf16.mxu0 %v7751_v46 }
 0x4cb   : > { %4935 = vmatpush1.bf16.msra.mxu0 %v7749_v59  ;;  %v7800_v46 = vld [vmem:[%s11290_s8 + $0xe0] ss:$16 sps:$4 sm:$0xff]  }
 0x4cc   : > { %v4168_v63 = vadd.f32 %v7305_v25, %v4128_v14  ;;  %4945 = vmatprep.subr.bf16.mxu0 %v7756_v44  ;;  %v7763_v59 = vld [vmem:[%s11288_s6 + $0x130] ss:$8 sps:$4 sm:$0xff]   ;;  %v7766_v44 = vld [vmem:[%s11288_s6 + $0x140] ss:$8 sps:$4 sm:$0xff]  }
 0x4ce   : > { %v4173_v22 = vmax.f32 %v4168_v63, 0.0 }
 0x4d0   : > { %v5985_v20 = vpack.c.bf16 %v4173_v22, %v4173_v22 }
 0x4d2   : > { %4178 = vrot.lane.b32.xlu0 %v5985_v20, %s8089_s25 }
 0x4e6   : > { %v7325_v7 = vpop.f32.mrb[120].mxu0 }
 0x4e7   : > { %v7347_v3 = vpop.f32.mrb[120].mxu1  ;;  %v7326_v11 = vpop.f32.mrb[121].mxu0 }
 0x4e8   : > { %v7327_v57 = vadd.f32 %v7326_v11, %v7325_v7  ;;  %v7348_v62 = vpop.f32.mrb[121].mxu1  ;;  %v7328_v18 = vpop.f32.mrb[122].mxu0 }
 0x4e9   : > { %v7349_v0 = vadd.f32 %v7348_v62, %v7347_v3  ;;  %v7350_v56 = vpop.f32.mrb[122].mxu1  ;;  %v7329_v51 = vpop.f32.mrb[123].mxu0 }
 0x4ea   : > { %v4234_v12 = vadd.f32 %v7327_v57, %v10855_v49  ;;  %v7351_v29 = vpop.f32.mrb[123].mxu1 }
 0x4eb   : > { %v7784_v29 = vld [vmem:[%s11290_s8 + $0x24] ss:$16 sps:$4 sm:$0xff]  }
 0x4ec   : > { %v4274_v45 = vadd.f32 %v7349_v0, %v4234_v12  ;;  %v7781_v12 = vld [vmem:[%s11290_s8 + $0x4] ss:$16 sps:$4 sm:$0xff]  }
 0x4ed   : > { %5396 = vmatprep.subr.bf16.mxu1 %v7781_v12 }
 0x4ee   : > { %v4279_v38 = vmax.f32 %v4274_v45, 0.0  ;;  %5397 = vmatpush1.bf16.msra.mxu1 %v7779_v42 }
 0x4ef   : > { %5398 = vmatprep.subr.bf16.mxu1 %v7784_v29 }
 0x4f0   : > { %v4280_v4 = vpack.c.bf16 %v4279_v38, %v4279_v38  ;;  %v7787_v38 = vld [vmem:[%s11290_s8 + $0x44] ss:$16 sps:$4 sm:$0xff]  }
 0x4f2   : > { %4281 = vst.msk [vmem:[#allocation3 + $0x4] sm:$0xf] %vm4075_vm0, %v4280_v4  ;;  %v7785_v4 = vld [vmem:[%s11290_s8 + $0x40] ss:$16 sps:$4 sm:$0xff]  }
 0x506   : > { %v7369_v28 = vpop.f32.mrb[124].mxu0 }
 0x507   : > { %v7391_v5 = vpop.f32.mrb[124].mxu1  ;;  %v7370_v58 = vpop.f32.mrb[125].mxu0 }
 0x508   : > { %v7371_v30 = vadd.f32 %v7370_v58, %v7369_v28  ;;  %v7392_v47 = vpop.f32.mrb[125].mxu1  ;;  %v7372_v17 = vpop.f32.mrb[126].mxu0  ;;  %v7754_v28 = vld [vmem:[%s11288_s6 + $0x100] ss:$8 sps:$4 sm:$0xff]  }
 0x509   : > { %v7393_v23 = vadd.f32 %v7392_v47, %v7391_v5  ;;  %v7394_v19 = vpop.f32.mrb[126].mxu1  ;;  %v7373_v52 = vpop.f32.mrb[127].mxu0  ;;  %v7759_v5 = vld [vmem:[%s11288_s6 + $0x114] ss:$8 sps:$4 sm:$0xff]   ;;  %v7797_v58 = vld [vmem:[%s11290_s8 + $0xc0] ss:$16 sps:$4 sm:$0xff]  }
 0x50a   : > { %v4333_v26 = vadd.f32 %v7371_v30, %v10855_v49  ;;  %v7395_v25 = vpop.f32.mrb[127].mxu1  ;;  %v7757_v30 = vld [vmem:[%s11288_s6 + $0x110] ss:$8 sps:$4 sm:$0xff]   ;;  %v8090_v47 = vmov 0   ;;  %v7762_v17 = vld [vmem:[%s11288_s6 + $0x124] ss:$8 sps:$4 sm:$0xff]  }
 0x50b   : > { %v7760_v19 = vld [vmem:[%s11288_s6 + $0x120] ss:$8 sps:$4 sm:$0xff]   ;;  %v7765_v52 = vld [vmem:[%s11288_s6 + $0x134] ss:$8 sps:$4 sm:$0xff]  }
 0x50c   : > { %v4373_v2 = vadd.f32 %v7393_v23, %v4333_v26  ;;  %v7805_v23 = vld [vmem:[%s11290_s8 + $0x104] ss:$16 sps:$4 sm:$0xff]   ;;  %v7803_v26 = vld [vmem:[%s11290_s8 + $0x100] ss:$16 sps:$4 sm:$0xff]  }
 0x50d   : > { %v7808_v25 = vld [vmem:[%s11290_s8 + $0x124] ss:$16 sps:$4 sm:$0xff]  }
 0x50e   : > { %v4378_v14 = vmax.f32 %v4373_v2, 0.0  ;;  %v7768_v2 = vld [vmem:[%s11288_s6 + $0x144] ss:$8 sps:$4 sm:$0xff]  }
 0x510   : > { %v5986_v40 = vpack.c.bf16 %v4378_v14, %v4378_v14  ;;  %v7806_v14 = vld [vmem:[%s11290_s8 + $0x120] ss:$16 sps:$4 sm:$0xff]  }
 0x512   : > { %4383 = vrot.lane.b32.xlu0 %v5986_v40, %s8089_s25  ;;  %v7811_v40 = vld [vmem:[%s11290_s8 + $0x144] ss:$16 sps:$4 sm:$0xff]  }
 0x526   : > { %v7413_v6 = vpop.f32.mrb[128].mxu0 }
 0x527   : > { %v7435_v8 = vpop.f32.mrb[128].mxu1  ;;  %v7414_v63 = vpop.f32.mrb[129].mxu0 }
 0x528   : > { %v7415_v54 = vadd.f32 %v7414_v63, %v7413_v6  ;;  %v7436_v22 = vpop.f32.mrb[129].mxu1  ;;  %v7416_v16 = vpop.f32.mrb[130].mxu0  ;;  %v7771_v6 = vld [vmem:[%s11288_s6 + $0x154] ss:$8 sps:$4 sm:$0xff]  }
 0x529   : > { %v7437_v20 = vadd.f32 %v7436_v22, %v7435_v8  ;;  %v7438_v21 = vpop.f32.mrb[130].mxu1  ;;  %v7417_v39 = vpop.f32.mrb[131].mxu0  ;;  %v7809_v8 = vld [vmem:[%s11290_s8 + $0x140] ss:$16 sps:$4 sm:$0xff]   ;;  %v7814_v63 = vld [vmem:[%s11290_s8 + $0x164] ss:$16 sps:$4 sm:$0xff]  }
 0x52a   : > { %v4438_v61 = vadd.f32 %v7415_v54, %v10855_v49  ;;  %v7439_v60 = vpop.f32.mrb[131].mxu1  ;;  %v7769_v54 = vld [vmem:[%s11288_s6 + $0x150] ss:$8 sps:$4 sm:$0xff]   ;;  %v7774_v22 = vld [vmem:[%s11288_s6 + $0x164] ss:$8 sps:$4 sm:$0xff]  }
 0x52b   : > { %v7812_v16 = vld [vmem:[%s11290_s8 + $0x160] ss:$16 sps:$4 sm:$0xff]   ;;  %v7777_v39 = vld [vmem:[%s11288_s6 + $0x174] ss:$8 sps:$4 sm:$0xff]  }
 0x52c   : > { %v4478_v41 = vadd.f32 %v7437_v20, %v4438_v61  ;;  %v7817_v20 = vld [vmem:[%s11290_s8 + $0x184] ss:$16 sps:$4 sm:$0xff]   ;;  %v7772_v21 = vld [vmem:[%s11288_s6 + $0x160] ss:$8 sps:$4 sm:$0xff]  }
 0x52d   : > { %v7815_v61 = vld [vmem:[%s11290_s8 + $0x180] ss:$16 sps:$4 sm:$0xff]   ;;  %v7820_v60 = vld [vmem:[%s11290_s8 + $0x1a4] ss:$16 sps:$4 sm:$0xff]  }
 0x52e   : > { %v4483_v48 = vmax.f32 %v4478_v41, 0.0  ;;  %v7775_v41 = vld [vmem:[%s11288_s6 + $0x170] ss:$8 sps:$4 sm:$0xff]  }
 0x530   : > { %v4484_v13 = vpack.c.bf16 %v4483_v48, %v4483_v48  ;;  %v7818_v48 = vld [vmem:[%s11290_s8 + $0x1a0] ss:$16 sps:$4 sm:$0xff]  }
 0x532   : > { %4485 = vst.msk [vmem:[#allocation3 + $0x8] sm:$0xf] %vm4075_vm0, %v4484_v13 }
 0x544   : > { %v4179_v35 = vpop.permute.xlu0 %4178 }
 0x545   : > { %4182 = vst.msk [vmem:[#allocation3] sm:$0xf] %vm4181_vm1, %v4179_v35 }
 0x546   : > { %v7457_v36 = vpop.f32.mrb[132].mxu0 }
 0x547   : > { %v7458_v15 = vpop.f32.mrb[133].mxu0 }
 0x548   : > { %v7459_v9 = vadd.f32 %v7458_v15, %v7457_v36  ;;  %v7460_v7 = vpop.f32.mrb[134].mxu0  ;;  %v7823_v36 = vld [vmem:[%s11290_s8 + $0x1c4] ss:$16 sps:$4 sm:$0xff]   ;;  %v7821_v15 = vld [vmem:[%s11290_s8 + $0x1c0] ss:$16 sps:$4 sm:$0xff]  }
 0x549   : > { %v7461_v10 = vpop.f32.mrb[135].mxu0  ;;  %v7824_v7 = vld [vmem:[%s11290_s8 + $0x1e0] ss:$16 sps:$4 sm:$0xff]  }
 0x54a   : > { %v4537_v57 = vadd.f32 %v7459_v9, %v10855_v49  ;;  %v7782_v49 = vld [vmem:[%s11290_s8 + $0x20] ss:$16 sps:$4 sm:$0xff]   ;;  %v7826_v9 = vld [vmem:[%s11290_s8 + $0x1e4] ss:$16 sps:$4 sm:$0xff]   ;;  %v7829_v10 = vld [vmem:[%s11290_s8 + $0xc] ss:$16 sps:$4 sm:$0xff]  }
 0x54b   : > { %5399 = vmatpush1.bf16.msra.mxu1 %v7782_v49 }
 0x54c   : > { %5400 = vmatprep.subr.bf16.mxu1 %v7787_v38 }
 0x54f   : > { %5401 = vmatpush1.bf16.msra.mxu1 %v7785_v4 }
 0x550   : > { %5402 = vmatprep.subr.bf16.mxu1 %v7790_v1 }
 0x553   : > { %5403 = vmatpush1.bf16.msra.mxu1 %v7788_v43  ;;  %v7827_v43 = vld [vmem:[%s11290_s8 + $0x8] ss:$16 sps:$4 sm:$0xff]  }
 0x554   : > { %5404 = vmatprep.subr.bf16.mxu1 %v7793_v53  ;;  %v7832_v53 = vld [vmem:[%s11290_s8 + $0x2c] ss:$16 sps:$4 sm:$0xff]  }
 0x557   : > { %5405 = vmatpush1.bf16.msra.mxu1 %v7791_v50  ;;  %v7830_v50 = vld [vmem:[%s11290_s8 + $0x28] ss:$16 sps:$4 sm:$0xff]  }
 0x558   : > { %5406 = vmatprep.subr.bf16.mxu1 %v7796_v31  ;;  %v7835_v31 = vld [vmem:[%s11290_s8 + $0x4c] ss:$16 sps:$4 sm:$0xff]  }
 0x55b   : > { %5407 = vmatpush1.bf16.msra.mxu1 %v7794_v32  ;;  %v7833_v32 = vld [vmem:[%s11290_s8 + $0x48] ss:$16 sps:$4 sm:$0xff]  }
 0x55c   : > { %5408 = vmatprep.subr.bf16.mxu1 %v7799_v34  ;;  %v7836_v34 = vld [vmem:[%s11290_s8 + $0x68] ss:$16 sps:$4 sm:$0xff]  }
 0x55f   : > { %5409 = vmatpush1.bf16.msra.mxu1 %v7797_v58  ;;  %v7847_v58 = vld [vmem:[%s11290_s8 + $0xcc] ss:$16 sps:$4 sm:$0xff]  }
 0x560   : > { %5410 = vmatprep.subr.bf16.mxu1 %v7802_v37  ;;  %v7845_v37 = vld [vmem:[%s11290_s8 + $0xc8] ss:$16 sps:$4 sm:$0xff]  }
 0x563   : > { %5411 = vmatpush1.bf16.msra.mxu1 %v7800_v46  ;;  %v7851_v46 = vld [vmem:[%s11290_s8 + $0x108] ss:$16 sps:$4 sm:$0xff]  }
 0x564   : > { %5412 = vmatprep.subr.bf16.mxu1 %v7805_v23  ;;  %v7856_v23 = vld [vmem:[%s11290_s8 + $0x12c] ss:$16 sps:$4 sm:$0xff]  }
 0x567   : > { %5413 = vmatpush1.bf16.msra.mxu1 %v7803_v26  ;;  %v7857_v26 = vld [vmem:[%s11290_s8 + $0x148] ss:$16 sps:$4 sm:$0xff]  }
 0x568   : > { %5414 = vmatprep.subr.bf16.mxu1 %v7808_v25  ;;  %v7862_v25 = vld [vmem:[%s11290_s8 + $0x16c] ss:$16 sps:$4 sm:$0xff]  }
 0x56b   : > { %5415 = vmatpush1.bf16.msra.mxu1 %v7806_v14  ;;  %v7863_v14 = vld [vmem:[%s11290_s8 + $0x188] ss:$16 sps:$4 sm:$0xff]  }
 0x56c   : > { %5416 = vmatprep.subr.bf16.mxu1 %v7811_v40  ;;  %v7868_v40 = vld [vmem:[%s11290_s8 + $0x1ac] ss:$16 sps:$4 sm:$0xff]  }
 0x56f   : > { %5417 = vmatpush1.bf16.msra.mxu1 %v7809_v8  ;;  %v7869_v8 = vld [vmem:[%s11290_s8 + $0x1c8] ss:$16 sps:$4 sm:$0xff]  }
 0x570   : > { %5418 = vmatprep.subr.bf16.mxu1 %v7814_v63  ;;  %v7874_v63 = vld [vmem:[%s11290_s8 + $0x1ec] ss:$16 sps:$4 sm:$0xff]  }
 0x572   : > { %v7479_v3 = vpop.f32.mrb[132].mxu1 }
 0x573   : > { %v7480_v11 = vpop.f32.mrb[133].mxu1  ;;  %5419 = vmatpush1.bf16.msra.mxu1 %v7812_v16 }
 0x574   : > { %v7481_v62 = vadd.f32 %v7480_v11, %v7479_v3  ;;  %v7482_v18 = vpop.f32.mrb[134].mxu1  ;;  %5420 = vmatprep.subr.bf16.mxu1 %v7817_v20  ;;  %v4643_v3 = vlaneseq }
 0x575   : > { %v7483_v0 = vpop.f32.mrb[135].mxu1 }
 0x576   : > { %v4577_v56 = vadd.f32 %v7481_v62, %v4537_v57  ;;  %v11115_v11 = vshrl.u32 %v4643_v3, 7  ;;  %v4641_v62 = vld [vmem:[%s11289_s7] sm:$0x3] }
 0x577   : > { %5421 = vmatpush1.bf16.msra.mxu1 %v7815_v61 }
 0x578   : > { %v4582_v51 = vmax.f32 %v4577_v56, 0.0  ;;  %5422 = vmatprep.subr.bf16.mxu1 %v7820_v60  ;;  %v4645_v57 = vsub.s32 0, %v11115_v11  ;;  %v4649_v18 = vsub.s32 1, %v11115_v11 }
 0x57a   : > { %v5987_v45 = vpack.c.bf16 %v4582_v51, %v4582_v51  ;;  %v4646_v0 = vrot.slane %v4641_v62, %v4645_v57  ;;  %v4650_v56 = vrot.slane %v4641_v62, %v4649_v18 }
 0x57b   : > { %5423 = vmatpush1.bf16.msra.mxu1 %v7818_v48 }
 0x57c   : > { %4587 = vrot.lane.b32.xlu1 %v5987_v45, %s8089_s25  ;;  %5424 = vmatprep.subr.bf16.mxu1 %v7823_v36  ;;  %v5066_v36 = vsub.s32 2, %v11115_v11  ;;  %s5487_s25 = scalar_lea.sflag [#allocation6], %s8404_s20 }
 0x57f   : > { %5425 = vmatpush1.bf16.msra.mxu1 %v7821_v15  ;;  %v5070_v15 = vsub.s32 3, %v11115_v11 }
 0x580   : > { %5426 = vmatprep.subr.bf16.mxu1 %v7826_v9 }
 0x583   : > { %5427 = vmatpush1.bf16.msra.mxu1 %v7824_v7 }
 0x584   : > { %v4384_v27 = vpop.permute.xlu0 %4383  ;;  %5437 = vmatprep.subr.bf16.mxu1 %v7829_v10 }
 0x585   : > { %4386 = vst.msk [vmem:[#allocation3 + $0x4] sm:$0xf] %vm4181_vm1, %v4384_v27 }
 0x58c   : > { %v4591_v33 = vld [vmem:[#allocation3] sm:$0xff] }
 0x58d   : > { %v5864_v24 = vcombine.low %v4591_v33, %v4591_v33  ;;  %v5865_v55 = vcombine.high %v4591_v33, %v4591_v33  ;;  %v7838_v33 = vld [vmem:[%s11290_s8 + $0x6c] ss:$16 sps:$4 sm:$0xff]  }
 0x58f   : > { %4936 = vmatprep.mubr.bf16.mxu0 %v5865_v55  ;;  %v7839_v55 = vld [vmem:[%s11290_s8 + $0x88] ss:$16 sps:$4 sm:$0xff]  }
 0x590   : > { %4937 = vmatmul.mubr.bf16.vlgmr.msra.gmra.mrb[136].mxu0 %v5864_v24  ;;  %v7841_v24 = vld [vmem:[%s11290_s8 + $0x8c] ss:$16 sps:$4 sm:$0xff]  }
 0x591   : > { %4946 = vmatpush1.bf16.msra.mxu0 %v7754_v28  ;;  %4977 = vmatprep.mubr.bf16.mxu0 %v8090_v47  ;;  %v7844_v28 = vld [vmem:[%s11290_s8 + $0xac] ss:$16 sps:$4 sm:$0xff]   ;;  %v7848_v47 = vld [vmem:[%s11290_s8 + $0xe8] ss:$16 sps:$4 sm:$0xff]  }
 0x592   : > { %4947 = vmatprep.subr.bf16.mxu0 %v7759_v5  ;;  %v7842_v5 = vld [vmem:[%s11290_s8 + $0xa8] ss:$16 sps:$4 sm:$0xff]  }
 0x595   : > { %4948 = vmatpush1.bf16.msra.mxu0 %v7757_v30  ;;  %v7850_v30 = vld [vmem:[%s11290_s8 + $0xec] ss:$16 sps:$4 sm:$0xff]  }
 0x596   : > { %4949 = vmatprep.subr.bf16.mxu0 %v7762_v17  ;;  %v7853_v17 = vld [vmem:[%s11290_s8 + $0x10c] ss:$16 sps:$4 sm:$0xff]  }
 0x599   : > { %4950 = vmatpush1.bf16.msra.mxu0 %v7760_v19  ;;  %v7854_v19 = vld [vmem:[%s11290_s8 + $0x128] ss:$16 sps:$4 sm:$0xff]  }
 0x59a   : > { %4951 = vmatprep.subr.bf16.mxu0 %v7765_v52  ;;  %v7859_v52 = vld [vmem:[%s11290_s8 + $0x14c] ss:$16 sps:$4 sm:$0xff]  }
 0x59d   : > { %4952 = vmatpush1.bf16.msra.mxu0 %v7763_v59  ;;  %v7860_v59 = vld [vmem:[%s11290_s8 + $0x168] ss:$16 sps:$4 sm:$0xff]  }
 0x59e   : > { %4953 = vmatprep.subr.bf16.mxu0 %v7768_v2  ;;  %v7865_v2 = vld [vmem:[%s11290_s8 + $0x18c] ss:$16 sps:$4 sm:$0xff]  }
 0x5a1   : > { %4954 = vmatpush1.bf16.msra.mxu0 %v7766_v44  ;;  %v7866_v44 = vld [vmem:[%s11290_s8 + $0x1a8] ss:$16 sps:$4 sm:$0xff]  }
 0x5a2   : > { %4955 = vmatprep.subr.bf16.mxu0 %v7771_v6  ;;  %v7871_v6 = vld [vmem:[%s11290_s8 + $0x1cc] ss:$16 sps:$4 sm:$0xff]  }
 0x5a5   : > { %4956 = vmatpush1.bf16.msra.mxu0 %v7769_v54  ;;  %v7872_v54 = vld [vmem:[%s11290_s8 + $0x1e8] ss:$16 sps:$4 sm:$0xff]  }
 0x5a6   : > { %4957 = vmatprep.subr.bf16.mxu0 %v7774_v22  ;;  %v5054_v22 = vld [vmem:[%s11291_s9] sm:$0xf] }
 0x5a7   : > { %v5059_v16 = vrot.slane %v5054_v22, %v4645_v57  ;;  %v5063_v20 = vrot.slane %v5054_v22, %v4649_v18  ;;  %v5067_v9 = vrot.slane %v5054_v22, %v5066_v36  ;;  %v5071_v7 = vrot.slane %v5054_v22, %v5070_v15 }
 0x5a9   : > { %4958 = vmatpush1.bf16.msra.mxu0 %v7772_v21 }
 0x5aa   : > { %4959 = vmatprep.subr.bf16.mxu0 %v7777_v39 }
 0x5ad   : > { %4960 = vmatpush1.bf16.msra.mxu0 %v7775_v41 }
 0x5ee   : > { %v4588_v13 = vpop.permute.xlu1 %4587 }
 0x5ef   : > { %4590 = vst.msk [vmem:[#allocation3 + $0x8] sm:$0xf] %vm4181_vm1, %v4588_v13 }
 0x5f6   : > { %v7778_v35 = vld [vmem:[#allocation3 + $0x8] ss:$0 sps:$4 sm:$0xff]  }
 0x5f7   : > { %4978 = vmatmul.mubr.bf16.vlgmr.msra.gmra.mrb[136].mxu0 %v7778_v35 }
 0x6ca   : > { %v4979_v51 = vpop.f32.mrb[136].mxu0 }
 0x6cb   : > { %v7485_v42 = vadd.f32 %v4979_v51, %v4646_v0  ;;  %v4981_v12 = vpop.f32.mrb[137].mxu0 }
 0x6cc   : > { %v7486_v29 = vadd.f32 %v4981_v12, %v4650_v56  ;;  %v4983_v45 = vpop.f32.mrb[138].mxu0 }
 0x6cd   : > { %v4986_v49 = vmax.f32 %v7485_v42, 0.0  ;;  %v4984_v38 = vpop.f32.mrb[139].mxu0 }
 0x6ce   : > { %v4987_v4 = vmax.f32 %v7486_v29, 0.0 }
 0x6cf   : > { %v11129_v27 = vpack.c.bf16 %v4986_v49, %v4986_v49 }
 0x6d0   : > { %v4989_v1 = vpack.c.bf16 %v4987_v4, %v4987_v4 }
 0x6d2   : > { %5428 = vmatprep.mubr.bf16.mxu1 %v4989_v1 }
 0x6d3   : > { %5429 = vmatmul.mubr.bf16.vlgmr.msra.gmra.mrb[136].mxu1 %v11129_v27 }
 0x6d4   : > { %5438 = vmatpush1.bf16.msra.mxu1 %v7827_v43  ;;  %5469 = vmatprep.mubr.bf16.mxu1 %v4989_v1 }
 0x6d5   : > { %5439 = vmatprep.subr.bf16.mxu1 %v7832_v53 }
 0x6d8   : > { %5440 = vmatpush1.bf16.msra.mxu1 %v7830_v50 }
 0x6d9   : > { %5441 = vmatprep.subr.bf16.mxu1 %v7835_v31 }
 0x6dc   : > { %5442 = vmatpush1.bf16.msra.mxu1 %v7833_v32 }
 0x6dd   : > { %5443 = vmatprep.subr.bf16.mxu1 %v7838_v33 }
 0x6e0   : > { %5444 = vmatpush1.bf16.msra.mxu1 %v7836_v34 }
 0x6e1   : > { %5445 = vmatprep.subr.bf16.mxu1 %v7841_v24 }
 0x6e4   : > { %5446 = vmatpush1.bf16.msra.mxu1 %v7839_v55 }
 0x6e5   : > { %5447 = vmatprep.subr.bf16.mxu1 %v7844_v28 }
 0x6e8   : > { %5448 = vmatpush1.bf16.msra.mxu1 %v7842_v5 }
 0x6e9   : > { %5449 = vmatprep.subr.bf16.mxu1 %v7847_v58 }
 0x6ec   : > { %5450 = vmatpush1.bf16.msra.mxu1 %v7845_v37 }
 0x6ed   : > { %5451 = vmatprep.subr.bf16.mxu1 %v7850_v30 }
 0x6f0   : > { %5452 = vmatpush1.bf16.msra.mxu1 %v7848_v47 }
 0x6f1   : > { %5453 = vmatprep.subr.bf16.mxu1 %v7853_v17 }
 0x6f4   : > { %5454 = vmatpush1.bf16.msra.mxu1 %v7851_v46 }
 0x6f5   : > { %5455 = vmatprep.subr.bf16.mxu1 %v7856_v23 }
 0x6f8   : > { %5456 = vmatpush1.bf16.msra.mxu1 %v7854_v19 }
 0x6f9   : > { %5457 = vmatprep.subr.bf16.mxu1 %v7859_v52 }
 0x6fc   : > { %5458 = vmatpush1.bf16.msra.mxu1 %v7857_v26 }
 0x6fd   : > { %5459 = vmatprep.subr.bf16.mxu1 %v7862_v25 }
 0x700   : > { %5460 = vmatpush1.bf16.msra.mxu1 %v7860_v59 }
 0x701   : > { %5461 = vmatprep.subr.bf16.mxu1 %v7865_v2 }
 0x704   : > { %5462 = vmatpush1.bf16.msra.mxu1 %v7863_v14 }
 0x705   : > { %5463 = vmatprep.subr.bf16.mxu1 %v7868_v40 }
 0x708   : > { %5464 = vmatpush1.bf16.msra.mxu1 %v7866_v44 }
 0x709   : > { %5465 = vmatprep.subr.bf16.mxu1 %v7871_v6 }
 0x70c   : > { %5466 = vmatpush1.bf16.msra.mxu1 %v7869_v8 }
 0x70d   : > { %5467 = vmatprep.subr.bf16.mxu1 %v7874_v63 }
 0x710   : > { %5468 = vmatpush1.bf16.msra.mxu1 %v7872_v54 }
 0x713   : > { %5470 = vmatmul.mubr.bf16.vlgmr.msra.gmra.mrb[140].mxu1 %v11129_v27 }
 0x7a6   : > { %v5430_v21 = vpop.f32.mrb[136].mxu1 }
 0x7a7   : > { %v5431_v39 = vadd.f32 %v5430_v21, %v5059_v16  ;;  %v5432_v61 = vpop.f32.mrb[137].mxu1 }
 0x7a8   : > { %v5433_v60 = vadd.f32 %v5432_v61, %v5063_v20  ;;  %v5434_v41 = vpop.f32.mrb[138].mxu1 }
 0x7a9   : > { %v5478_v48 = vmax.f32 %v5431_v39, 0.0  ;;  %v5435_v13 = vpop.f32.mrb[139].mxu1 }
 0x7aa   : > { %v5479_v35 = vmax.f32 %v5433_v60, 0.0 }
 0x7ab   : > { %5482 = vst [vmem:[%s435_s21] sm:$0xff] %v5478_v48 }
 0x7ac   : > { %5483 = vst [vmem:[%s435_s21 + $0x8] sm:$0xff] %v5479_v35 }
 0x7e6   : > { %v5471_v10 = vpop.f32.mrb[140].mxu1 }
 0x7e7   : > { %v5472_v3 = vadd.f32 %v5471_v10, %v5067_v9  ;;  %v5473_v57 = vpop.f32.mrb[141].mxu1 }
 0x7e8   : > { %v5474_v62 = vadd.f32 %v5473_v57, %v5071_v7  ;;  %v5475_v18 = vpop.f32.mrb[142].mxu1 }
 0x7e9   : > { %v5480_v0 = vmax.f32 %v5472_v3, 0.0  ;;  %v5476_v56 = vpop.f32.mrb[143].mxu1 }
 0x7ea   : > { %v5481_v51 = vmax.f32 %v5474_v62, 0.0 }
 0x7eb   : > { %5484 = vst [vmem:[%s435_s21 + $0x10] sm:$0xff] %v5480_v0 }
 0x7ec   : > { %5485 = vst [vmem:[%s435_s21 + $0x18] sm:$0xff] %v5481_v51 }
 0x7ed   : > { %8038 = shalt.err (!%p8035_p5)
}
 0x7ee   : > { %s8039_s20 = scalar_lea.hbm %s11238_s18, 512  ;;  %s8043_s12 = scalar_lea.hbm %s11292_s10, 1024 }
 0x7ef   : > { %p8040_p7 = scmp.ne.s32.totalorder %s11238_s18, %s8039_s20  ;;  %p8044_p12 = scmp.lt.u32.totalorder %s11238_s18, %s11292_s10 }
 0x7f0   : > { %p8045_p13 = scmp.lt.u32.totalorder %s8043_s12, %s8039_s20  ;;  %p8047_p1 = scmp.lt.u32.totalorder %s8039_s20, %s11238_s18 }
 0x7f1   : > { %p8041_p10 = pnand %p8040_p7, %p8185_p6 }
 0x7f2   : > { %p8046_p0 = por %p8045_p13, %p8044_p12 }
 0x7f3   : > { %p8042_p11 = pneg %p8041_p10 }
 0x7f4   : > { %p8048_p2 = por %p8047_p1, %p8046_p0 }
 0x7f6   : > { %p8049_p3 = pnand %p8048_p2, %p8042_p11 }
 0x7f8   : > { %8052 = shalt.err (!%p8049_p3)
}
 0x7f9   : > { %7493 = dma.vmem_to_hbm [thread:$0]  (%p8185_p6), %s11240_s11, 512, %s11238_s18, %s5487_s25  }
 0x7fa PF: > { %s5513_s26 = sand.u32 1, %s8075_s13   ;;  %p7496_p4 = pnand %p5568_p9, %p8189_p8 }
 0x7fb   : > { %s5514_s27 = scalar_lea.sflag [#allocation6], %s5513_s26 }
 0x7fc   : > { %8070 = dma.done.wait (!%p7496_p4), %s5514_s27, 512  }
 0x7fd   : > { %8072 = vsyncadd (!%p7496_p4), %s5514_s27, 4294966784  ;;  %p20_p5 = scmp.ge.s32.totalorder %s8170_s19, 4   ;;  %s11694_s13 = smov %s8079_s14 }
 0x7fe   : > { %s11695_s14 = smov %s8083_s15  ;;  %s11696_s15 = smov %s8183_s22 }
 0x7ff   : > { %s11697_s16 = smov %s8170_s19  ;;  %22 = sbr.rel (!%p20_p5) target bundleno = 3 (0x3), region = 137 }
 0x806   :  { %5519 = vsyncpa [#allocation6], 1 }
 0x807   :  { %5521 = vsyncpa [#allocation6 + $0x1], 1 }

</bundles_post_ra>
